<compile_context>
chip_gen: v6e
topology: v6e:2x2x1
jax: 0.10.0
libtpu: 0.0.40
codegen_flags: <defaults>
</compile_context>

<pallas_src>
import math

import numpy as np
import jax
import jax.numpy as jnp
from jax.experimental import pallas as pl
from jax.experimental.pallas import tpu as pltpu


# ---------------------------------------------------------------------------
# host-side constant builders (numpy, run once per model config)
# ---------------------------------------------------------------------------
def _bilinear_matrix(n_in, n_out):
    """align_corners=True bilinear interpolation matrix (n_out, n_in)."""
    m = np.zeros((n_out, n_in), np.float32)
    if n_in == 1:
        m[:, 0] = 1.0
        return m
    scale = (n_in - 1) / (n_out - 1)
    for i in range(n_out):
        src = i * scale
        i0 = min(int(np.floor(src)), n_in - 1)
        frac = src - i0
        i1 = min(i0 + 1, n_in - 1)
        m[i, i0] += 1.0 - frac
        m[i, i1] += frac
    return m


def _banded_conv_matrices(w_hwio, width):
    """3x3 'same' conv as banded matrices in the flat (H, W*C) layout.

    Returns (3*W*Ci, W*Co): rows [ky*W*Ci:(ky+1)*W*Ci] are the ky-tap band, so
    pre = lane_concat[A(y-1), A(y), A(y+1)] @ T.  Width zero-padding is
    implicit (out-of-range kx taps are dropped from the band).
    NOTE: expects HWIO weights; transpose PyTorch OIHW weights before use.
    """
    ci, co = w_hwio.shape[2], w_hwio.shape[3]
    t = np.zeros((3, width * ci, width * co), np.float32)
    for ky in range(3):
        for kx in range(3):
            for x in range(width):
                u = x + kx - 1
                if 0 <= u < width:
                    t[ky, u * ci:(u + 1) * ci, x * co:(x + 1) * co] += w_hwio[ky, kx]
    return t.reshape(3 * width * ci, width * co)


# ---------------------------------------------------------------------------
# fused decoder
# ---------------------------------------------------------------------------
def build_decoder_forward(params, image_size, n_filters, batch_block=8):
    """forward(x: (B, 256)) -> (B, 1, S, S), S = 32*ceil(image_size/32).

    batch_block: MXU row fill per grid step (4 on v5e, 8 on v6e/v7x; on v7x
    keep B/batch_block >= 2 so both TensorCores get grid steps).
    """
    C = n_filters
    s0 = math.ceil(image_size / 32)
    S = 32 * s0                       # spatial size after 5x (2x upsample)
    f0 = s0 * s0 * C
    Bblk = int(batch_block)
    p = {k: np.asarray(v, np.float32) for k, v in params.items()}
    K = p["fc_w"].shape[0]            # latent dim (256)

    to_bf16 = lambda a: jnp.asarray(a, jnp.bfloat16)   # MXU operands
    to_f32 = lambda a: jnp.asarray(a, jnp.float32)     # VPU elementwise

    # fc: fold the NCHW torch.reshape permutation into the weight columns so
    # the fc output lands directly in the flat (H, W*C) kernel layout.
    perm = np.empty((f0,), np.int64)
    for y in range(s0):
        for x in range(s0):
            for c in range(C):
                perm[(y * s0 + x) * C + c] = c * s0 * s0 + y * s0 + x
    fc_w = p["fc_w"][:, perm]                       # (K, f0)
    fc_b = p["fc_b"][perm][None, :]                 # (1, f0)

    # fold BatchNorm2d (eval) + conv bias into per-channel scale/shift.
    def fold(cb, g, be, m, v, eps=1e-5):
        sc = p[g] / np.sqrt(p[v] + eps)
        sh = (p[cb] - p[m]) * sc + p[be]
        return sc, sh

    sc1, sf1 = fold("c1_b", "bn1_g", "bn1_b", "bn1_m", "bn1_v")
    sc2, sf2 = fold("c2_b", "bn2_g", "bn2_b", "bn2_m", "bn2_v")

    # per-stage constants (the SAME Up module is applied 5x at growing size).
    stage_meta = []
    consts = [to_bf16(fc_w), to_f32(fc_b)]
    for k in range(5):
        h_in = s0 << k
        h_out = 2 * h_in
        wc = h_out * C
        uh = _bilinear_matrix(h_in, h_out)                      # (h_out, h_in)
        uh_blk = np.kron(np.eye(Bblk, dtype=np.float32), uh)    # batch-blocked rows
        vw = np.kron(uh.T, np.eye(C, dtype=np.float32))         # (h_in*C, wc)
        tpair = np.stack([_banded_conv_matrices(p["c1_w"], h_out),
                          _banded_conv_matrices(p["c2_w"], h_out)])  # (2, 3wc, wc)
        scsf = np.stack([np.tile(sc1, h_out), np.tile(sf1, h_out),
                         np.tile(sc2, h_out), np.tile(sf2, h_out)])  # (4, wc)
        consts += [to_bf16(uh_blk), to_bf16(vw), to_bf16(tpair), to_f32(scsf)]
        stage_meta.append((h_out, wc))

    # final 1x1 OutConv as a lane-grouped matmul: (S*C, S), plus bias.
    q = np.kron(np.eye(S, dtype=np.float32), p["out_w"].reshape(C, 1))
    consts += [to_bf16(q), to_f32(p["out_b"].reshape(1, 1))]
    n_const = len(consts)

    def kernel(x_ref, *refs):
        cr = refs[:n_const]
        o_ref = refs[n_const]

        # fc + LeakyReLU(0.5): whole batch block in one MXU issue.
        xv = x_ref[:, 0, :].astype(jnp.bfloat16)                    # (Bblk, K)
        y = jnp.dot(xv, cr[0][...], preferred_element_type=jnp.float32)
        y = y + cr[1][...]
        y = jnp.where(y >= 0.0, y, 0.5 * y)
        # activation carried flat as (Bblk*H, W*C), f32
        a = y.reshape(Bblk * s0, s0 * C)

        def conv_bn_relu(act, t_all, sc, sf, first, last, rows, wc):
            # vertical taps: XLU sublane rotate + boundary masks, no MXU work.
            dn = jnp.where(first, 0.0, pltpu.roll(act, shift=1, axis=0))
            up = jnp.where(last, 0.0, pltpu.roll(act, shift=rows - 1, axis=0))
            if wc % 128 == 0:
                # lane-aligned stages: fuse the 3 ky taps into one K=3*wc dot.
                taps = jnp.concatenate([dn, act, up], axis=1).astype(jnp.bfloat16)
                pre = jnp.dot(taps, t_all, preferred_element_type=jnp.float32)
            else:
                pre = jnp.dot(dn.astype(jnp.bfloat16), t_all[0:wc],
                              preferred_element_type=jnp.float32)
                pre = pre + jnp.dot(act.astype(jnp.bfloat16), t_all[wc:2 * wc],
                                    preferred_element_type=jnp.float32)
                pre = pre + jnp.dot(up.astype(jnp.bfloat16), t_all[2 * wc:3 * wc],
                                    preferred_element_type=jnp.float32)
            return jnp.maximum(pre * sc + sf, 0.0)    # folded BN + ReLU (f32)

        for k in range(5):                     # same Up module applied 5 times
            h_out, wc = stage_meta[k]
            rows = Bblk * h_out
            uh_r, vw_r, t_r, ss_r = cr[2 + 4 * k: 6 + 4 * k]

            # bilinear 2x upsample (align_corners=True), separable matmuls;
            # the block-diagonal uh_blk handles all Bblk stacked images.
            r = jnp.dot(uh_r[...], a.astype(jnp.bfloat16),
                        preferred_element_type=jnp.float32)
            a = jnp.dot(r.astype(jnp.bfloat16), vw_r[...],
                        preferred_element_type=jnp.float32)       # (rows, wc)

            # per-image top/bottom boundary masks (images are stacked along
            # rows, so rolled rows crossing an image edge must be zeroed).
            rid = jax.lax.broadcasted_iota(jnp.int32, (rows, wc), 0)
            first = rid == 0
            last = rid == h_out - 1
            for b in range(1, Bblk):
                first = jnp.logical_or(first, rid == b * h_out)
                last = jnp.logical_or(last, rid == b * h_out + h_out - 1)

            ss = ss_r[...]                                        # (4, wc)
            a = conv_bn_relu(a, t_r[0], ss[0:1, :], ss[1:2, :],
                             first, last, rows, wc)
            a = conv_bn_relu(a, t_r[1], ss[2:3, :], ss[3:4, :],
                             first, last, rows, wc)

        # fused 1x1 OutConv: (Bblk*S, S*C) @ (S*C, S) + bias, single store.
        out = jnp.dot(a.astype(jnp.bfloat16), cr[n_const - 2][...],
                      preferred_element_type=jnp.float32) + cr[n_const - 1][...]
        o_ref[...] = out                                          # (Bblk*S, S)

    def _const_spec(arr):
        nd = arr.ndim
        return pl.BlockSpec(arr.shape, lambda g, _n=nd: (0,) * _n)

    def forward(x):
        B = x.shape[0]
        Bp = ((B + Bblk - 1) // Bblk) * Bblk
        x3 = jnp.asarray(x, jnp.float32).reshape(B, 1, K)
        if Bp != B:                    # pad batch to a multiple of the block
            x3 = jnp.concatenate(
                [x3, jnp.zeros((Bp - B, 1, K), jnp.float32)], axis=0)
        out = pl.pallas_call(
            kernel,
            out_shape=jax.ShapeDtypeStruct((Bp * S, S), jnp.float32),
            grid=(Bp // Bblk,),
            in_specs=[pl.BlockSpec((Bblk, 1, K), lambda g: (g, 0, 0))]
                     + [_const_spec(a) for a in consts],
            out_specs=pl.BlockSpec((Bblk * S, S), lambda g: (g, 0)),
            compiler_params=pltpu.CompilerParams(
                dimension_semantics=("parallel",),   # batch blocks across TCs
                vmem_limit_bytes=32 * 1024 * 1024),
        )(x3, *consts)
        return out.reshape(Bp, 1, S, S)[:B]          # NCHW, 1 output channel

    return forward


# ---------------------------------------------------------------------------
# parameters (same layout/semantics as before; HWIO conv weights)
# ---------------------------------------------------------------------------
def init_params(key, image_size, n_filters):
    s0 = math.ceil(image_size / 32)
    f0 = s0 * s0 * n_filters
    ks = jax.random.split(key, 16)

    def nrm(k, shape, scale=0.1):
        return scale * jax.random.normal(k, shape, jnp.float32)

    nf = n_filters
    return {
        "fc_w": nrm(ks[0], (256, f0)),
        "fc_b": nrm(ks[1], (f0,)),
        # shared Up.DoubleConv parameters (the same module is applied 5x)
        "c1_w": nrm(ks[2], (3, 3, nf, nf)),
        "c1_b": nrm(ks[3], (nf,)),
        "bn1_g": 1.0 + nrm(ks[4], (nf,)),
        "bn1_b": nrm(ks[5], (nf,)),
        "bn1_m": nrm(ks[6], (nf,)),
        "bn1_v": 0.5 + jnp.abs(nrm(ks[7], (nf,))),
        "c2_w": nrm(ks[8], (3, 3, nf, nf)),
        "c2_b": nrm(ks[9], (nf,)),
        "bn2_g": 1.0 + nrm(ks[10], (nf,)),
        "bn2_b": nrm(ks[11], (nf,)),
        "bn2_m": nrm(ks[12], (nf,)),
        "bn2_v": 0.5 + jnp.abs(nrm(ks[13], (nf,))),
        # OutConv
        "out_w": nrm(ks[14], (nf, 1)),
        "out_b": nrm(ks[15], (1,)),
    }


if __name__ == "__main__":
    image_size = 32      # decoder: 1x1 latent grid -> 32x32 output
    n_filters = 8        # small but structurally faithful
    batch = 2

    key = jax.random.PRNGKey(0)
    k_x, k_p = jax.random.split(key)
    x = jax.random.normal(k_x, (batch, 256), jnp.float32)
    params = init_params(k_p, image_size, n_filters)

    # batch_block = batch keeps the tiny demo exact-fit; for throughput use
    # 4 (v5e) or 8 (v6e/v7x), keeping >= 2 grid steps on v7x.
    forward = build_decoder_forward(params, image_size, n_filters,
                                    batch_block=batch)
    out = forward(x)
    out = jax.block_until_ready(out)
    assert out.shape == (batch, 1, image_size, image_size), out.shape
    assert bool(jnp.all(jnp.isfinite(out)))
    print("KERNEL_OK")
</pallas_src>

<mosaic_0001>
module attributes {stable_mosaic.version = 11 : i64} {
  func.func @kernel(%arg0: i32, %arg1: memref<2x1x256xf32, #tpu.memory_space<vmem>>, %arg2: memref<256x8xbf16, #tpu.memory_space<vmem>>, %arg3: memref<1x8xf32, #tpu.memory_space<vmem>>, %arg4: memref<4x2xbf16, #tpu.memory_space<vmem>>, %arg5: memref<8x16xbf16, #tpu.memory_space<vmem>>, %arg6: memref<2x48x16xbf16, #tpu.memory_space<vmem>>, %arg7: memref<4x16xf32, #tpu.memory_space<vmem>>, %arg8: memref<8x4xbf16, #tpu.memory_space<vmem>>, %arg9: memref<16x32xbf16, #tpu.memory_space<vmem>>, %arg10: memref<2x96x32xbf16, #tpu.memory_space<vmem>>, %arg11: memref<4x32xf32, #tpu.memory_space<vmem>>, %arg12: memref<16x8xbf16, #tpu.memory_space<vmem>>, %arg13: memref<32x64xbf16, #tpu.memory_space<vmem>>, %arg14: memref<2x192x64xbf16, #tpu.memory_space<vmem>>, %arg15: memref<4x64xf32, #tpu.memory_space<vmem>>, %arg16: memref<32x16xbf16, #tpu.memory_space<vmem>>, %arg17: memref<64x128xbf16, #tpu.memory_space<vmem>>, %arg18: memref<2x384x128xbf16, #tpu.memory_space<vmem>>, %arg19: memref<4x128xf32, #tpu.memory_space<vmem>>, %arg20: memref<64x32xbf16, #tpu.memory_space<vmem>>, %arg21: memref<128x256xbf16, #tpu.memory_space<vmem>>, %arg22: memref<2x768x256xbf16, #tpu.memory_space<vmem>>, %arg23: memref<4x256xf32, #tpu.memory_space<vmem>>, %arg24: memref<256x32xbf16, #tpu.memory_space<vmem>>, %arg25: memref<1x1xf32, #tpu.memory_space<vmem>>, %arg26: memref<64x32xf32, #tpu.memory_space<vmem>>) attributes {dimension_semantics = [#tpu.dimension_semantics<parallel>], iteration_bounds = array<i64: 1>, scalar_prefetch = 0 : i64, scratch_operands = 0 : i64, tpu.core_type = #tpu.core_type<tc>, window_params = [{transform_indices = @transform_0, window_bounds = array<i64: 2, 1, 256>}, {pipeline_mode = #tpu.pipeline_mode<synchronous>, transform_indices = @transform_1, window_bounds = array<i64: 256, 8>}, {pipeline_mode = #tpu.pipeline_mode<synchronous>, transform_indices = @transform_2, window_bounds = array<i64: 1, 8>}, {pipeline_mode = #tpu.pipeline_mode<synchronous>, transform_indices = @transform_3, window_bounds = array<i64: 4, 2>}, {pipeline_mode = #tpu.pipeline_mode<synchronous>, transform_indices = @transform_4, window_bounds = array<i64: 8, 16>}, {pipeline_mode = #tpu.pipeline_mode<synchronous>, transform_indices = @transform_5, window_bounds = array<i64: 2, 48, 16>}, {pipeline_mode = #tpu.pipeline_mode<synchronous>, transform_indices = @transform_6, window_bounds = array<i64: 4, 16>}, {pipeline_mode = #tpu.pipeline_mode<synchronous>, transform_indices = @transform_7, window_bounds = array<i64: 8, 4>}, {pipeline_mode = #tpu.pipeline_mode<synchronous>, transform_indices = @transform_8, window_bounds = array<i64: 16, 32>}, {pipeline_mode = #tpu.pipeline_mode<synchronous>, transform_indices = @transform_9, window_bounds = array<i64: 2, 96, 32>}, {pipeline_mode = #tpu.pipeline_mode<synchronous>, transform_indices = @transform_10, window_bounds = array<i64: 4, 32>}, {pipeline_mode = #tpu.pipeline_mode<synchronous>, transform_indices = @transform_11, window_bounds = array<i64: 16, 8>}, {pipeline_mode = #tpu.pipeline_mode<synchronous>, transform_indices = @transform_12, window_bounds = array<i64: 32, 64>}, {pipeline_mode = #tpu.pipeline_mode<synchronous>, transform_indices = @transform_13, window_bounds = array<i64: 2, 192, 64>}, {pipeline_mode = #tpu.pipeline_mode<synchronous>, transform_indices = @transform_14, window_bounds = array<i64: 4, 64>}, {pipeline_mode = #tpu.pipeline_mode<synchronous>, transform_indices = @transform_15, window_bounds = array<i64: 32, 16>}, {pipeline_mode = #tpu.pipeline_mode<synchronous>, transform_indices = @transform_16, window_bounds = array<i64: 64, 128>}, {pipeline_mode = #tpu.pipeline_mode<synchronous>, transform_indices = @transform_17, window_bounds = array<i64: 2, 384, 128>}, {pipeline_mode = #tpu.pipeline_mode<synchronous>, transform_indices = @transform_18, window_bounds = array<i64: 4, 128>}, {pipeline_mode = #tpu.pipeline_mode<synchronous>, transform_indices = @transform_19, window_bounds = array<i64: 64, 32>}, {pipeline_mode = #tpu.pipeline_mode<synchronous>, transform_indices = @transform_20, window_bounds = array<i64: 128, 256>}, {pipeline_mode = #tpu.pipeline_mode<synchronous>, transform_indices = @transform_21, window_bounds = array<i64: 2, 768, 256>}, {pipeline_mode = #tpu.pipeline_mode<synchronous>, transform_indices = @transform_22, window_bounds = array<i64: 4, 256>}, {pipeline_mode = #tpu.pipeline_mode<synchronous>, transform_indices = @transform_23, window_bounds = array<i64: 256, 32>}, {pipeline_mode = #tpu.pipeline_mode<synchronous>, transform_indices = @transform_24, window_bounds = array<i64: 1, 1>}, {transform_indices = @transform_25, window_bounds = array<i64: 64, 32>}]} {
    %c0 = arith.constant 0 : index
    %c0_0 = arith.constant 0 : index
    %c0_1 = arith.constant 0 : index
    %0 = vector.load %arg1[%c0, %c0_0, %c0_1] : memref<2x1x256xf32, #tpu.memory_space<vmem>>, vector<2x1x256xf32>
    %1 = vector.shape_cast %0 : vector<2x1x256xf32> to vector<2x256xf32>
    %2 = arith.truncf %1 : vector<2x256xf32> to vector<2x256xbf16>
    %c0_2 = arith.constant 0 : index
    %c0_3 = arith.constant 0 : index
    %3 = vector.load %arg2[%c0_2, %c0_3] : memref<256x8xbf16, #tpu.memory_space<vmem>>, vector<256x8xbf16>
    %cst = arith.constant dense<0.000000e+00> : vector<2x8xf32>
    %4 = tpu.matmul %2, %3, %cst {dimension_numbers = #tpu.dot_dimension_numbers<[1], [0], [0], [1], [0, 0, 1, 1], [], []>} : vector<2x256xbf16>, vector<256x8xbf16>, vector<2x8xf32> -> vector<2x8xf32>
    %c0_4 = arith.constant 0 : index
    %c0_5 = arith.constant 0 : index
    %5 = vector.load %arg3[%c0_4, %c0_5] : memref<1x8xf32, #tpu.memory_space<vmem>>, vector<1x8xf32>
    %6 = vector.broadcast %5 : vector<1x8xf32> to vector<2x8xf32>
    %7 = arith.addf %4, %6 : vector<2x8xf32>
    %cst_6 = arith.constant 0.000000e+00 : f32
    %8 = vector.broadcast %cst_6 : f32 to vector<2x8xf32>
    %9 = arith.cmpf oge, %7, %8 : vector<2x8xf32>
    %cst_7 = arith.constant 5.000000e-01 : f32
    %10 = vector.broadcast %cst_7 : f32 to vector<2x8xf32>
    %11 = arith.mulf %10, %7 : vector<2x8xf32>
    %12 = arith.select %9, %7, %11 : vector<2x8xi1>, vector<2x8xf32>
    %c0_8 = arith.constant 0 : index
    %c0_9 = arith.constant 0 : index
    %13 = vector.load %arg4[%c0_8, %c0_9] : memref<4x2xbf16, #tpu.memory_space<vmem>>, vector<4x2xbf16>
    %14 = arith.truncf %12 : vector<2x8xf32> to vector<2x8xbf16>
    %cst_10 = arith.constant dense<0.000000e+00> : vector<4x8xf32>
    %15 = tpu.matmul %13, %14, %cst_10 {dimension_numbers = #tpu.dot_dimension_numbers<[1], [0], [0], [1], [0, 0, 1, 1], [], []>} : vector<4x2xbf16>, vector<2x8xbf16>, vector<4x8xf32> -> vector<4x8xf32>
    %16 = arith.truncf %15 : vector<4x8xf32> to vector<4x8xbf16>
    %c0_11 = arith.constant 0 : index
    %c0_12 = arith.constant 0 : index
    %17 = vector.load %arg5[%c0_11, %c0_12] : memref<8x16xbf16, #tpu.memory_space<vmem>>, vector<8x16xbf16>
    %cst_13 = arith.constant dense<0.000000e+00> : vector<4x16xf32>
    %18 = tpu.matmul %16, %17, %cst_13 {dimension_numbers = #tpu.dot_dimension_numbers<[1], [0], [0], [1], [0, 0, 1, 1], [], []>} : vector<4x8xbf16>, vector<8x16xbf16>, vector<4x16xf32> -> vector<4x16xf32>
    %19 = tpu.iota {dimensions = array<i32: 0>} : vector<4x16xi32>
    %c0_i32 = arith.constant 0 : i32
    %20 = vector.broadcast %c0_i32 : i32 to vector<4x16xi32>
    %21 = arith.cmpi eq, %19, %20 : vector<4x16xi32>
    %c1_i32 = arith.constant 1 : i32
    %22 = vector.broadcast %c1_i32 : i32 to vector<4x16xi32>
    %23 = arith.cmpi eq, %19, %22 : vector<4x16xi32>
    %c2_i32 = arith.constant 2 : i32
    %24 = vector.broadcast %c2_i32 : i32 to vector<4x16xi32>
    %25 = arith.cmpi eq, %19, %24 : vector<4x16xi32>
    %26 = arith.ori %21, %25 : vector<4x16xi1>
    %c3_i32 = arith.constant 3 : i32
    %27 = vector.broadcast %c3_i32 : i32 to vector<4x16xi32>
    %28 = arith.cmpi eq, %19, %27 : vector<4x16xi32>
    %29 = arith.ori %23, %28 : vector<4x16xi1>
    %c0_14 = arith.constant 0 : index
    %c0_15 = arith.constant 0 : index
    %30 = vector.load %arg7[%c0_14, %c0_15] : memref<4x16xf32, #tpu.memory_space<vmem>>, vector<4x16xf32>
    %c0_16 = arith.constant 0 : index
    %c0_17 = arith.constant 0 : index
    %c0_18 = arith.constant 0 : index
    %31 = vector.load %arg6[%c0_16, %c0_17, %c0_18] : memref<2x48x16xbf16, #tpu.memory_space<vmem>>, vector<1x48x16xbf16>
    %32 = vector.shape_cast %31 : vector<1x48x16xbf16> to vector<48x16xbf16>
    %33 = vector.extract_strided_slice %30 {offsets = [0, 0], sizes = [1, 16], strides = [1, 1]} : vector<4x16xf32> to vector<1x16xf32>
    %34 = vector.extract_strided_slice %30 {offsets = [1, 0], sizes = [1, 16], strides = [1, 1]} : vector<4x16xf32> to vector<1x16xf32>
    %c1_i32_19 = arith.constant 1 : i32
    %35 = tpu.dynamic_rotate %18 by %c1_i32_19 dim 0 : vector<4x16xf32>, i32 -> vector<4x16xf32>
    %cst_20 = arith.constant 0.000000e+00 : f32
    %36 = vector.broadcast %cst_20 : f32 to vector<4x16xf32>
    %37 = arith.select %26, %36, %35 : vector<4x16xi1>, vector<4x16xf32>
    %c3_i32_21 = arith.constant 3 : i32
    %38 = tpu.dynamic_rotate %18 by %c3_i32_21 dim 0 : vector<4x16xf32>, i32 -> vector<4x16xf32>
    %cst_22 = arith.constant 0.000000e+00 : f32
    %39 = vector.broadcast %cst_22 : f32 to vector<4x16xf32>
    %40 = arith.select %29, %39, %38 : vector<4x16xi1>, vector<4x16xf32>
    %41 = arith.truncf %37 : vector<4x16xf32> to vector<4x16xbf16>
    %42 = vector.extract_strided_slice %32 {offsets = [0, 0], sizes = [16, 16], strides = [1, 1]} : vector<48x16xbf16> to vector<16x16xbf16>
    %cst_23 = arith.constant dense<0.000000e+00> : vector<4x16xf32>
    %43 = tpu.matmul %41, %42, %cst_23 {dimension_numbers = #tpu.dot_dimension_numbers<[1], [0], [0], [1], [0, 0, 1, 1], [], []>} : vector<4x16xbf16>, vector<16x16xbf16>, vector<4x16xf32> -> vector<4x16xf32>
    %44 = arith.truncf %18 : vector<4x16xf32> to vector<4x16xbf16>
    %45 = vector.extract_strided_slice %32 {offsets = [16, 0], sizes = [16, 16], strides = [1, 1]} : vector<48x16xbf16> to vector<16x16xbf16>
    %cst_24 = arith.constant dense<0.000000e+00> : vector<4x16xf32>
    %46 = tpu.matmul %44, %45, %cst_24 {dimension_numbers = #tpu.dot_dimension_numbers<[1], [0], [0], [1], [0, 0, 1, 1], [], []>} : vector<4x16xbf16>, vector<16x16xbf16>, vector<4x16xf32> -> vector<4x16xf32>
    %47 = arith.addf %43, %46 : vector<4x16xf32>
    %48 = arith.truncf %40 : vector<4x16xf32> to vector<4x16xbf16>
    %49 = vector.extract_strided_slice %32 {offsets = [32, 0], sizes = [16, 16], strides = [1, 1]} : vector<48x16xbf16> to vector<16x16xbf16>
    %cst_25 = arith.constant dense<0.000000e+00> : vector<4x16xf32>
    %50 = tpu.matmul %48, %49, %cst_25 {dimension_numbers = #tpu.dot_dimension_numbers<[1], [0], [0], [1], [0, 0, 1, 1], [], []>} : vector<4x16xbf16>, vector<16x16xbf16>, vector<4x16xf32> -> vector<4x16xf32>
    %51 = arith.addf %47, %50 : vector<4x16xf32>
    %52 = vector.broadcast %33 : vector<1x16xf32> to vector<4x16xf32>
    %53 = arith.mulf %51, %52 : vector<4x16xf32>
    %54 = vector.broadcast %34 : vector<1x16xf32> to vector<4x16xf32>
    %55 = arith.addf %53, %54 : vector<4x16xf32>
    %cst_26 = arith.constant 0.000000e+00 : f32
    %56 = vector.broadcast %cst_26 : f32 to vector<4x16xf32>
    %57 = arith.maximumf %55, %56 : vector<4x16xf32>
    %c1 = arith.constant 1 : index
    %c0_27 = arith.constant 0 : index
    %c0_28 = arith.constant 0 : index
    %58 = vector.load %arg6[%c1, %c0_27, %c0_28] : memref<2x48x16xbf16, #tpu.memory_space<vmem>>, vector<1x48x16xbf16>
    %59 = vector.shape_cast %58 : vector<1x48x16xbf16> to vector<48x16xbf16>
    %60 = vector.extract_strided_slice %30 {offsets = [2, 0], sizes = [1, 16], strides = [1, 1]} : vector<4x16xf32> to vector<1x16xf32>
    %61 = vector.extract_strided_slice %30 {offsets = [3, 0], sizes = [1, 16], strides = [1, 1]} : vector<4x16xf32> to vector<1x16xf32>
    %c1_i32_29 = arith.constant 1 : i32
    %62 = tpu.dynamic_rotate %57 by %c1_i32_29 dim 0 : vector<4x16xf32>, i32 -> vector<4x16xf32>
    %cst_30 = arith.constant 0.000000e+00 : f32
    %63 = vector.broadcast %cst_30 : f32 to vector<4x16xf32>
    %64 = arith.select %26, %63, %62 : vector<4x16xi1>, vector<4x16xf32>
    %c3_i32_31 = arith.constant 3 : i32
    %65 = tpu.dynamic_rotate %57 by %c3_i32_31 dim 0 : vector<4x16xf32>, i32 -> vector<4x16xf32>
    %cst_32 = arith.constant 0.000000e+00 : f32
    %66 = vector.broadcast %cst_32 : f32 to vector<4x16xf32>
    %67 = arith.select %29, %66, %65 : vector<4x16xi1>, vector<4x16xf32>
    %68 = arith.truncf %64 : vector<4x16xf32> to vector<4x16xbf16>
    %69 = vector.extract_strided_slice %59 {offsets = [0, 0], sizes = [16, 16], strides = [1, 1]} : vector<48x16xbf16> to vector<16x16xbf16>
    %cst_33 = arith.constant dense<0.000000e+00> : vector<4x16xf32>
    %70 = tpu.matmul %68, %69, %cst_33 {dimension_numbers = #tpu.dot_dimension_numbers<[1], [0], [0], [1], [0, 0, 1, 1], [], []>} : vector<4x16xbf16>, vector<16x16xbf16>, vector<4x16xf32> -> vector<4x16xf32>
    %71 = arith.truncf %57 : vector<4x16xf32> to vector<4x16xbf16>
    %72 = vector.extract_strided_slice %59 {offsets = [16, 0], sizes = [16, 16], strides = [1, 1]} : vector<48x16xbf16> to vector<16x16xbf16>
    %cst_34 = arith.constant dense<0.000000e+00> : vector<4x16xf32>
    %73 = tpu.matmul %71, %72, %cst_34 {dimension_numbers = #tpu.dot_dimension_numbers<[1], [0], [0], [1], [0, 0, 1, 1], [], []>} : vector<4x16xbf16>, vector<16x16xbf16>, vector<4x16xf32> -> vector<4x16xf32>
    %74 = arith.addf %70, %73 : vector<4x16xf32>
    %75 = arith.truncf %67 : vector<4x16xf32> to vector<4x16xbf16>
    %76 = vector.extract_strided_slice %59 {offsets = [32, 0], sizes = [16, 16], strides = [1, 1]} : vector<48x16xbf16> to vector<16x16xbf16>
    %cst_35 = arith.constant dense<0.000000e+00> : vector<4x16xf32>
    %77 = tpu.matmul %75, %76, %cst_35 {dimension_numbers = #tpu.dot_dimension_numbers<[1], [0], [0], [1], [0, 0, 1, 1], [], []>} : vector<4x16xbf16>, vector<16x16xbf16>, vector<4x16xf32> -> vector<4x16xf32>
    %78 = arith.addf %74, %77 : vector<4x16xf32>
    %79 = vector.broadcast %60 : vector<1x16xf32> to vector<4x16xf32>
    %80 = arith.mulf %78, %79 : vector<4x16xf32>
    %81 = vector.broadcast %61 : vector<1x16xf32> to vector<4x16xf32>
    %82 = arith.addf %80, %81 : vector<4x16xf32>
    %cst_36 = arith.constant 0.000000e+00 : f32
    %83 = vector.broadcast %cst_36 : f32 to vector<4x16xf32>
    %84 = arith.maximumf %82, %83 : vector<4x16xf32>
    %c0_37 = arith.constant 0 : index
    %c0_38 = arith.constant 0 : index
    %85 = vector.load %arg8[%c0_37, %c0_38] : memref<8x4xbf16, #tpu.memory_space<vmem>>, vector<8x4xbf16>
    %86 = arith.truncf %84 : vector<4x16xf32> to vector<4x16xbf16>
    %cst_39 = arith.constant dense<0.000000e+00> : vector<8x16xf32>
    %87 = tpu.matmul %85, %86, %cst_39 {dimension_numbers = #tpu.dot_dimension_numbers<[1], [0], [0], [1], [0, 0, 1, 1], [], []>} : vector<8x4xbf16>, vector<4x16xbf16>, vector<8x16xf32> -> vector<8x16xf32>
    %88 = arith.truncf %87 : vector<8x16xf32> to vector<8x16xbf16>
    %c0_40 = arith.constant 0 : index
    %c0_41 = arith.constant 0 : index
    %89 = vector.load %arg9[%c0_40, %c0_41] : memref<16x32xbf16, #tpu.memory_space<vmem>>, vector<16x32xbf16>
    %cst_42 = arith.constant dense<0.000000e+00> : vector<8x32xf32>
    %90 = tpu.matmul %88, %89, %cst_42 {dimension_numbers = #tpu.dot_dimension_numbers<[1], [0], [0], [1], [0, 0, 1, 1], [], []>} : vector<8x16xbf16>, vector<16x32xbf16>, vector<8x32xf32> -> vector<8x32xf32>
    %91 = tpu.iota {dimensions = array<i32: 0>} : vector<8x32xi32>
    %c0_i32_43 = arith.constant 0 : i32
    %92 = vector.broadcast %c0_i32_43 : i32 to vector<8x32xi32>
    %93 = arith.cmpi eq, %91, %92 : vector<8x32xi32>
    %c3_i32_44 = arith.constant 3 : i32
    %94 = vector.broadcast %c3_i32_44 : i32 to vector<8x32xi32>
    %95 = arith.cmpi eq, %91, %94 : vector<8x32xi32>
    %c4_i32 = arith.constant 4 : i32
    %96 = vector.broadcast %c4_i32 : i32 to vector<8x32xi32>
    %97 = arith.cmpi eq, %91, %96 : vector<8x32xi32>
    %98 = arith.ori %93, %97 : vector<8x32xi1>
    %c7_i32 = arith.constant 7 : i32
    %99 = vector.broadcast %c7_i32 : i32 to vector<8x32xi32>
    %100 = arith.cmpi eq, %91, %99 : vector<8x32xi32>
    %101 = arith.ori %95, %100 : vector<8x32xi1>
    %c0_45 = arith.constant 0 : index
    %c0_46 = arith.constant 0 : index
    %102 = vector.load %arg11[%c0_45, %c0_46] : memref<4x32xf32, #tpu.memory_space<vmem>>, vector<4x32xf32>
    %c0_47 = arith.constant 0 : index
    %c0_48 = arith.constant 0 : index
    %c0_49 = arith.constant 0 : index
    %103 = vector.load %arg10[%c0_47, %c0_48, %c0_49] : memref<2x96x32xbf16, #tpu.memory_space<vmem>>, vector<1x96x32xbf16>
    %104 = vector.shape_cast %103 : vector<1x96x32xbf16> to vector<96x32xbf16>
    %105 = vector.extract_strided_slice %102 {offsets = [0, 0], sizes = [1, 32], strides = [1, 1]} : vector<4x32xf32> to vector<1x32xf32>
    %106 = vector.extract_strided_slice %102 {offsets = [1, 0], sizes = [1, 32], strides = [1, 1]} : vector<4x32xf32> to vector<1x32xf32>
    %c1_i32_50 = arith.constant 1 : i32
    %107 = tpu.dynamic_rotate %90 by %c1_i32_50 dim 0 : vector<8x32xf32>, i32 -> vector<8x32xf32>
    %cst_51 = arith.constant 0.000000e+00 : f32
    %108 = vector.broadcast %cst_51 : f32 to vector<8x32xf32>
    %109 = arith.select %98, %108, %107 : vector<8x32xi1>, vector<8x32xf32>
    %c7_i32_52 = arith.constant 7 : i32
    %110 = tpu.dynamic_rotate %90 by %c7_i32_52 dim 0 : vector<8x32xf32>, i32 -> vector<8x32xf32>
    %cst_53 = arith.constant 0.000000e+00 : f32
    %111 = vector.broadcast %cst_53 : f32 to vector<8x32xf32>
    %112 = arith.select %101, %111, %110 : vector<8x32xi1>, vector<8x32xf32>
    %113 = arith.truncf %109 : vector<8x32xf32> to vector<8x32xbf16>
    %114 = vector.extract_strided_slice %104 {offsets = [0, 0], sizes = [32, 32], strides = [1, 1]} : vector<96x32xbf16> to vector<32x32xbf16>
    %cst_54 = arith.constant dense<0.000000e+00> : vector<8x32xf32>
    %115 = tpu.matmul %113, %114, %cst_54 {dimension_numbers = #tpu.dot_dimension_numbers<[1], [0], [0], [1], [0, 0, 1, 1], [], []>} : vector<8x32xbf16>, vector<32x32xbf16>, vector<8x32xf32> -> vector<8x32xf32>
    %116 = arith.truncf %90 : vector<8x32xf32> to vector<8x32xbf16>
    %117 = vector.extract_strided_slice %104 {offsets = [32, 0], sizes = [32, 32], strides = [1, 1]} : vector<96x32xbf16> to vector<32x32xbf16>
    %cst_55 = arith.constant dense<0.000000e+00> : vector<8x32xf32>
    %118 = tpu.matmul %116, %117, %cst_55 {dimension_numbers = #tpu.dot_dimension_numbers<[1], [0], [0], [1], [0, 0, 1, 1], [], []>} : vector<8x32xbf16>, vector<32x32xbf16>, vector<8x32xf32> -> vector<8x32xf32>
    %119 = arith.addf %115, %118 : vector<8x32xf32>
    %120 = arith.truncf %112 : vector<8x32xf32> to vector<8x32xbf16>
    %121 = vector.extract_strided_slice %104 {offsets = [64, 0], sizes = [32, 32], strides = [1, 1]} : vector<96x32xbf16> to vector<32x32xbf16>
    %cst_56 = arith.constant dense<0.000000e+00> : vector<8x32xf32>
    %122 = tpu.matmul %120, %121, %cst_56 {dimension_numbers = #tpu.dot_dimension_numbers<[1], [0], [0], [1], [0, 0, 1, 1], [], []>} : vector<8x32xbf16>, vector<32x32xbf16>, vector<8x32xf32> -> vector<8x32xf32>
    %123 = arith.addf %119, %122 : vector<8x32xf32>
    %124 = vector.broadcast %105 : vector<1x32xf32> to vector<8x32xf32>
    %125 = arith.mulf %123, %124 : vector<8x32xf32>
    %126 = vector.broadcast %106 : vector<1x32xf32> to vector<8x32xf32>
    %127 = arith.addf %125, %126 : vector<8x32xf32>
    %cst_57 = arith.constant 0.000000e+00 : f32
    %128 = vector.broadcast %cst_57 : f32 to vector<8x32xf32>
    %129 = arith.maximumf %127, %128 : vector<8x32xf32>
    %c1_58 = arith.constant 1 : index
    %c0_59 = arith.constant 0 : index
    %c0_60 = arith.constant 0 : index
    %130 = vector.load %arg10[%c1_58, %c0_59, %c0_60] : memref<2x96x32xbf16, #tpu.memory_space<vmem>>, vector<1x96x32xbf16>
    %131 = vector.shape_cast %130 : vector<1x96x32xbf16> to vector<96x32xbf16>
    %132 = vector.extract_strided_slice %102 {offsets = [2, 0], sizes = [1, 32], strides = [1, 1]} : vector<4x32xf32> to vector<1x32xf32>
    %133 = vector.extract_strided_slice %102 {offsets = [3, 0], sizes = [1, 32], strides = [1, 1]} : vector<4x32xf32> to vector<1x32xf32>
    %c1_i32_61 = arith.constant 1 : i32
    %134 = tpu.dynamic_rotate %129 by %c1_i32_61 dim 0 : vector<8x32xf32>, i32 -> vector<8x32xf32>
    %cst_62 = arith.constant 0.000000e+00 : f32
    %135 = vector.broadcast %cst_62 : f32 to vector<8x32xf32>
    %136 = arith.select %98, %135, %134 : vector<8x32xi1>, vector<8x32xf32>
    %c7_i32_63 = arith.constant 7 : i32
    %137 = tpu.dynamic_rotate %129 by %c7_i32_63 dim 0 : vector<8x32xf32>, i32 -> vector<8x32xf32>
    %cst_64 = arith.constant 0.000000e+00 : f32
    %138 = vector.broadcast %cst_64 : f32 to vector<8x32xf32>
    %139 = arith.select %101, %138, %137 : vector<8x32xi1>, vector<8x32xf32>
    %140 = arith.truncf %136 : vector<8x32xf32> to vector<8x32xbf16>
    %141 = vector.extract_strided_slice %131 {offsets = [0, 0], sizes = [32, 32], strides = [1, 1]} : vector<96x32xbf16> to vector<32x32xbf16>
    %cst_65 = arith.constant dense<0.000000e+00> : vector<8x32xf32>
    %142 = tpu.matmul %140, %141, %cst_65 {dimension_numbers = #tpu.dot_dimension_numbers<[1], [0], [0], [1], [0, 0, 1, 1], [], []>} : vector<8x32xbf16>, vector<32x32xbf16>, vector<8x32xf32> -> vector<8x32xf32>
    %143 = arith.truncf %129 : vector<8x32xf32> to vector<8x32xbf16>
    %144 = vector.extract_strided_slice %131 {offsets = [32, 0], sizes = [32, 32], strides = [1, 1]} : vector<96x32xbf16> to vector<32x32xbf16>
    %cst_66 = arith.constant dense<0.000000e+00> : vector<8x32xf32>
    %145 = tpu.matmul %143, %144, %cst_66 {dimension_numbers = #tpu.dot_dimension_numbers<[1], [0], [0], [1], [0, 0, 1, 1], [], []>} : vector<8x32xbf16>, vector<32x32xbf16>, vector<8x32xf32> -> vector<8x32xf32>
    %146 = arith.addf %142, %145 : vector<8x32xf32>
    %147 = arith.truncf %139 : vector<8x32xf32> to vector<8x32xbf16>
    %148 = vector.extract_strided_slice %131 {offsets = [64, 0], sizes = [32, 32], strides = [1, 1]} : vector<96x32xbf16> to vector<32x32xbf16>
    %cst_67 = arith.constant dense<0.000000e+00> : vector<8x32xf32>
    %149 = tpu.matmul %147, %148, %cst_67 {dimension_numbers = #tpu.dot_dimension_numbers<[1], [0], [0], [1], [0, 0, 1, 1], [], []>} : vector<8x32xbf16>, vector<32x32xbf16>, vector<8x32xf32> -> vector<8x32xf32>
    %150 = arith.addf %146, %149 : vector<8x32xf32>
    %151 = vector.broadcast %132 : vector<1x32xf32> to vector<8x32xf32>
    %152 = arith.mulf %150, %151 : vector<8x32xf32>
    %153 = vector.broadcast %133 : vector<1x32xf32> to vector<8x32xf32>
    %154 = arith.addf %152, %153 : vector<8x32xf32>
    %cst_68 = arith.constant 0.000000e+00 : f32
    %155 = vector.broadcast %cst_68 : f32 to vector<8x32xf32>
    %156 = arith.maximumf %154, %155 : vector<8x32xf32>
    %c0_69 = arith.constant 0 : index
    %c0_70 = arith.constant 0 : index
    %157 = vector.load %arg12[%c0_69, %c0_70] : memref<16x8xbf16, #tpu.memory_space<vmem>>, vector<16x8xbf16>
    %158 = arith.truncf %156 : vector<8x32xf32> to vector<8x32xbf16>
    %cst_71 = arith.constant dense<0.000000e+00> : vector<16x32xf32>
    %159 = tpu.matmul %157, %158, %cst_71 {dimension_numbers = #tpu.dot_dimension_numbers<[1], [0], [0], [1], [0, 0, 1, 1], [], []>} : vector<16x8xbf16>, vector<8x32xbf16>, vector<16x32xf32> -> vector<16x32xf32>
    %160 = arith.truncf %159 : vector<16x32xf32> to vector<16x32xbf16>
    %c0_72 = arith.constant 0 : index
    %c0_73 = arith.constant 0 : index
    %161 = vector.load %arg13[%c0_72, %c0_73] : memref<32x64xbf16, #tpu.memory_space<vmem>>, vector<32x64xbf16>
    %cst_74 = arith.constant dense<0.000000e+00> : vector<16x64xf32>
    %162 = tpu.matmul %160, %161, %cst_74 {dimension_numbers = #tpu.dot_dimension_numbers<[1], [0], [0], [1], [0, 0, 1, 1], [], []>} : vector<16x32xbf16>, vector<32x64xbf16>, vector<16x64xf32> -> vector<16x64xf32>
    %163 = tpu.iota {dimensions = array<i32: 0>} : vector<16x64xi32>
    %c0_i32_75 = arith.constant 0 : i32
    %164 = vector.broadcast %c0_i32_75 : i32 to vector<16x64xi32>
    %165 = arith.cmpi eq, %163, %164 : vector<16x64xi32>
    %c7_i32_76 = arith.constant 7 : i32
    %166 = vector.broadcast %c7_i32_76 : i32 to vector<16x64xi32>
    %167 = arith.cmpi eq, %163, %166 : vector<16x64xi32>
    %c8_i32 = arith.constant 8 : i32
    %168 = vector.broadcast %c8_i32 : i32 to vector<16x64xi32>
    %169 = arith.cmpi eq, %163, %168 : vector<16x64xi32>
    %170 = arith.ori %165, %169 : vector<16x64xi1>
    %c15_i32 = arith.constant 15 : i32
    %171 = vector.broadcast %c15_i32 : i32 to vector<16x64xi32>
    %172 = arith.cmpi eq, %163, %171 : vector<16x64xi32>
    %173 = arith.ori %167, %172 : vector<16x64xi1>
    %c0_77 = arith.constant 0 : index
    %c0_78 = arith.constant 0 : index
    %174 = vector.load %arg15[%c0_77, %c0_78] : memref<4x64xf32, #tpu.memory_space<vmem>>, vector<4x64xf32>
    %c0_79 = arith.constant 0 : index
    %c0_80 = arith.constant 0 : index
    %c0_81 = arith.constant 0 : index
    %175 = vector.load %arg14[%c0_79, %c0_80, %c0_81] : memref<2x192x64xbf16, #tpu.memory_space<vmem>>, vector<1x192x64xbf16>
    %176 = vector.shape_cast %175 : vector<1x192x64xbf16> to vector<192x64xbf16>
    %177 = vector.extract_strided_slice %174 {offsets = [0, 0], sizes = [1, 64], strides = [1, 1]} : vector<4x64xf32> to vector<1x64xf32>
    %178 = vector.extract_strided_slice %174 {offsets = [1, 0], sizes = [1, 64], strides = [1, 1]} : vector<4x64xf32> to vector<1x64xf32>
    %c1_i32_82 = arith.constant 1 : i32
    %179 = tpu.dynamic_rotate %162 by %c1_i32_82 dim 0 : vector<16x64xf32>, i32 -> vector<16x64xf32>
    %cst_83 = arith.constant 0.000000e+00 : f32
    %180 = vector.broadcast %cst_83 : f32 to vector<16x64xf32>
    %181 = arith.select %170, %180, %179 : vector<16x64xi1>, vector<16x64xf32>
    %c15_i32_84 = arith.constant 15 : i32
    %182 = tpu.dynamic_rotate %162 by %c15_i32_84 dim 0 : vector<16x64xf32>, i32 -> vector<16x64xf32>
    %cst_85 = arith.constant 0.000000e+00 : f32
    %183 = vector.broadcast %cst_85 : f32 to vector<16x64xf32>
    %184 = arith.select %173, %183, %182 : vector<16x64xi1>, vector<16x64xf32>
    %185 = arith.truncf %181 : vector<16x64xf32> to vector<16x64xbf16>
    %186 = vector.extract_strided_slice %176 {offsets = [0, 0], sizes = [64, 64], strides = [1, 1]} : vector<192x64xbf16> to vector<64x64xbf16>
    %cst_86 = arith.constant dense<0.000000e+00> : vector<16x64xf32>
    %187 = tpu.matmul %185, %186, %cst_86 {dimension_numbers = #tpu.dot_dimension_numbers<[1], [0], [0], [1], [0, 0, 1, 1], [], []>} : vector<16x64xbf16>, vector<64x64xbf16>, vector<16x64xf32> -> vector<16x64xf32>
    %188 = arith.truncf %162 : vector<16x64xf32> to vector<16x64xbf16>
    %189 = vector.extract_strided_slice %176 {offsets = [64, 0], sizes = [64, 64], strides = [1, 1]} : vector<192x64xbf16> to vector<64x64xbf16>
    %cst_87 = arith.constant dense<0.000000e+00> : vector<16x64xf32>
    %190 = tpu.matmul %188, %189, %cst_87 {dimension_numbers = #tpu.dot_dimension_numbers<[1], [0], [0], [1], [0, 0, 1, 1], [], []>} : vector<16x64xbf16>, vector<64x64xbf16>, vector<16x64xf32> -> vector<16x64xf32>
    %191 = arith.addf %187, %190 : vector<16x64xf32>
    %192 = arith.truncf %184 : vector<16x64xf32> to vector<16x64xbf16>
    %193 = vector.extract_strided_slice %176 {offsets = [128, 0], sizes = [64, 64], strides = [1, 1]} : vector<192x64xbf16> to vector<64x64xbf16>
    %cst_88 = arith.constant dense<0.000000e+00> : vector<16x64xf32>
    %194 = tpu.matmul %192, %193, %cst_88 {dimension_numbers = #tpu.dot_dimension_numbers<[1], [0], [0], [1], [0, 0, 1, 1], [], []>} : vector<16x64xbf16>, vector<64x64xbf16>, vector<16x64xf32> -> vector<16x64xf32>
    %195 = arith.addf %191, %194 : vector<16x64xf32>
    %196 = vector.broadcast %177 : vector<1x64xf32> to vector<16x64xf32>
    %197 = arith.mulf %195, %196 : vector<16x64xf32>
    %198 = vector.broadcast %178 : vector<1x64xf32> to vector<16x64xf32>
    %199 = arith.addf %197, %198 : vector<16x64xf32>
    %cst_89 = arith.constant 0.000000e+00 : f32
    %200 = vector.broadcast %cst_89 : f32 to vector<16x64xf32>
    %201 = arith.maximumf %199, %200 : vector<16x64xf32>
    %c1_90 = arith.constant 1 : index
    %c0_91 = arith.constant 0 : index
    %c0_92 = arith.constant 0 : index
    %202 = vector.load %arg14[%c1_90, %c0_91, %c0_92] : memref<2x192x64xbf16, #tpu.memory_space<vmem>>, vector<1x192x64xbf16>
    %203 = vector.shape_cast %202 : vector<1x192x64xbf16> to vector<192x64xbf16>
    %204 = vector.extract_strided_slice %174 {offsets = [2, 0], sizes = [1, 64], strides = [1, 1]} : vector<4x64xf32> to vector<1x64xf32>
    %205 = vector.extract_strided_slice %174 {offsets = [3, 0], sizes = [1, 64], strides = [1, 1]} : vector<4x64xf32> to vector<1x64xf32>
    %c1_i32_93 = arith.constant 1 : i32
    %206 = tpu.dynamic_rotate %201 by %c1_i32_93 dim 0 : vector<16x64xf32>, i32 -> vector<16x64xf32>
    %cst_94 = arith.constant 0.000000e+00 : f32
    %207 = vector.broadcast %cst_94 : f32 to vector<16x64xf32>
    %208 = arith.select %170, %207, %206 : vector<16x64xi1>, vector<16x64xf32>
    %c15_i32_95 = arith.constant 15 : i32
    %209 = tpu.dynamic_rotate %201 by %c15_i32_95 dim 0 : vector<16x64xf32>, i32 -> vector<16x64xf32>
    %cst_96 = arith.constant 0.000000e+00 : f32
    %210 = vector.broadcast %cst_96 : f32 to vector<16x64xf32>
    %211 = arith.select %173, %210, %209 : vector<16x64xi1>, vector<16x64xf32>
    %212 = arith.truncf %208 : vector<16x64xf32> to vector<16x64xbf16>
    %213 = vector.extract_strided_slice %203 {offsets = [0, 0], sizes = [64, 64], strides = [1, 1]} : vector<192x64xbf16> to vector<64x64xbf16>
    %cst_97 = arith.constant dense<0.000000e+00> : vector<16x64xf32>
    %214 = tpu.matmul %212, %213, %cst_97 {dimension_numbers = #tpu.dot_dimension_numbers<[1], [0], [0], [1], [0, 0, 1, 1], [], []>} : vector<16x64xbf16>, vector<64x64xbf16>, vector<16x64xf32> -> vector<16x64xf32>
    %215 = arith.truncf %201 : vector<16x64xf32> to vector<16x64xbf16>
    %216 = vector.extract_strided_slice %203 {offsets = [64, 0], sizes = [64, 64], strides = [1, 1]} : vector<192x64xbf16> to vector<64x64xbf16>
    %cst_98 = arith.constant dense<0.000000e+00> : vector<16x64xf32>
    %217 = tpu.matmul %215, %216, %cst_98 {dimension_numbers = #tpu.dot_dimension_numbers<[1], [0], [0], [1], [0, 0, 1, 1], [], []>} : vector<16x64xbf16>, vector<64x64xbf16>, vector<16x64xf32> -> vector<16x64xf32>
    %218 = arith.addf %214, %217 : vector<16x64xf32>
    %219 = arith.truncf %211 : vector<16x64xf32> to vector<16x64xbf16>
    %220 = vector.extract_strided_slice %203 {offsets = [128, 0], sizes = [64, 64], strides = [1, 1]} : vector<192x64xbf16> to vector<64x64xbf16>
    %cst_99 = arith.constant dense<0.000000e+00> : vector<16x64xf32>
    %221 = tpu.matmul %219, %220, %cst_99 {dimension_numbers = #tpu.dot_dimension_numbers<[1], [0], [0], [1], [0, 0, 1, 1], [], []>} : vector<16x64xbf16>, vector<64x64xbf16>, vector<16x64xf32> -> vector<16x64xf32>
    %222 = arith.addf %218, %221 : vector<16x64xf32>
    %223 = vector.broadcast %204 : vector<1x64xf32> to vector<16x64xf32>
    %224 = arith.mulf %222, %223 : vector<16x64xf32>
    %225 = vector.broadcast %205 : vector<1x64xf32> to vector<16x64xf32>
    %226 = arith.addf %224, %225 : vector<16x64xf32>
    %cst_100 = arith.constant 0.000000e+00 : f32
    %227 = vector.broadcast %cst_100 : f32 to vector<16x64xf32>
    %228 = arith.maximumf %226, %227 : vector<16x64xf32>
    %c0_101 = arith.constant 0 : index
    %c0_102 = arith.constant 0 : index
    %229 = vector.load %arg16[%c0_101, %c0_102] : memref<32x16xbf16, #tpu.memory_space<vmem>>, vector<32x16xbf16>
    %230 = arith.truncf %228 : vector<16x64xf32> to vector<16x64xbf16>
    %cst_103 = arith.constant dense<0.000000e+00> : vector<32x64xf32>
    %231 = tpu.matmul %229, %230, %cst_103 {dimension_numbers = #tpu.dot_dimension_numbers<[1], [0], [0], [1], [0, 0, 1, 1], [], []>} : vector<32x16xbf16>, vector<16x64xbf16>, vector<32x64xf32> -> vector<32x64xf32>
    %232 = arith.truncf %231 : vector<32x64xf32> to vector<32x64xbf16>
    %c0_104 = arith.constant 0 : index
    %c0_105 = arith.constant 0 : index
    %233 = vector.load %arg17[%c0_104, %c0_105] : memref<64x128xbf16, #tpu.memory_space<vmem>>, vector<64x128xbf16>
    %cst_106 = arith.constant dense<0.000000e+00> : vector<32x128xf32>
    %234 = tpu.matmul %232, %233, %cst_106 {dimension_numbers = #tpu.dot_dimension_numbers<[1], [0], [0], [1], [0, 0, 1, 1], [], []>} : vector<32x64xbf16>, vector<64x128xbf16>, vector<32x128xf32> -> vector<32x128xf32>
    %235 = tpu.iota {dimensions = array<i32: 0>} : vector<32x128xi32>
    %c0_i32_107 = arith.constant 0 : i32
    %236 = vector.broadcast %c0_i32_107 : i32 to vector<32x128xi32>
    %237 = arith.cmpi eq, %235, %236 : vector<32x128xi32>
    %c15_i32_108 = arith.constant 15 : i32
    %238 = vector.broadcast %c15_i32_108 : i32 to vector<32x128xi32>
    %239 = arith.cmpi eq, %235, %238 : vector<32x128xi32>
    %c16_i32 = arith.constant 16 : i32
    %240 = vector.broadcast %c16_i32 : i32 to vector<32x128xi32>
    %241 = arith.cmpi eq, %235, %240 : vector<32x128xi32>
    %242 = arith.ori %237, %241 : vector<32x128xi1>
    %c31_i32 = arith.constant 31 : i32
    %243 = vector.broadcast %c31_i32 : i32 to vector<32x128xi32>
    %244 = arith.cmpi eq, %235, %243 : vector<32x128xi32>
    %245 = arith.ori %239, %244 : vector<32x128xi1>
    %c0_109 = arith.constant 0 : index
    %c0_110 = arith.constant 0 : index
    %246 = vector.load %arg19[%c0_109, %c0_110] : memref<4x128xf32, #tpu.memory_space<vmem>>, vector<4x128xf32>
    %c0_111 = arith.constant 0 : index
    %c0_112 = arith.constant 0 : index
    %c0_113 = arith.constant 0 : index
    %247 = vector.load %arg18[%c0_111, %c0_112, %c0_113] : memref<2x384x128xbf16, #tpu.memory_space<vmem>>, vector<1x384x128xbf16>
    %248 = vector.shape_cast %247 : vector<1x384x128xbf16> to vector<384x128xbf16>
    %249 = vector.extract_strided_slice %246 {offsets = [0, 0], sizes = [1, 128], strides = [1, 1]} : vector<4x128xf32> to vector<1x128xf32>
    %250 = vector.extract_strided_slice %246 {offsets = [1, 0], sizes = [1, 128], strides = [1, 1]} : vector<4x128xf32> to vector<1x128xf32>
    %c1_i32_114 = arith.constant 1 : i32
    %251 = tpu.dynamic_rotate %234 by %c1_i32_114 dim 0 : vector<32x128xf32>, i32 -> vector<32x128xf32>
    %cst_115 = arith.constant 0.000000e+00 : f32
    %252 = vector.broadcast %cst_115 : f32 to vector<32x128xf32>
    %253 = arith.select %242, %252, %251 : vector<32x128xi1>, vector<32x128xf32>
    %c31_i32_116 = arith.constant 31 : i32
    %254 = tpu.dynamic_rotate %234 by %c31_i32_116 dim 0 : vector<32x128xf32>, i32 -> vector<32x128xf32>
    %cst_117 = arith.constant 0.000000e+00 : f32
    %255 = vector.broadcast %cst_117 : f32 to vector<32x128xf32>
    %256 = arith.select %245, %255, %254 : vector<32x128xi1>, vector<32x128xf32>
    %257 = tpu.concatenate %253, %234, %256 in 1 : vector<32x128xf32>, vector<32x128xf32>, vector<32x128xf32> -> vector<32x384xf32>
    %258 = arith.truncf %257 : vector<32x384xf32> to vector<32x384xbf16>
    %cst_118 = arith.constant dense<0.000000e+00> : vector<32x128xf32>
    %259 = tpu.matmul %258, %248, %cst_118 {dimension_numbers = #tpu.dot_dimension_numbers<[1], [0], [0], [1], [0, 0, 1, 1], [], []>} : vector<32x384xbf16>, vector<384x128xbf16>, vector<32x128xf32> -> vector<32x128xf32>
    %260 = vector.broadcast %249 : vector<1x128xf32> to vector<32x128xf32>
    %261 = arith.mulf %259, %260 : vector<32x128xf32>
    %262 = vector.broadcast %250 : vector<1x128xf32> to vector<32x128xf32>
    %263 = arith.addf %261, %262 : vector<32x128xf32>
    %cst_119 = arith.constant 0.000000e+00 : f32
    %264 = vector.broadcast %cst_119 : f32 to vector<32x128xf32>
    %265 = arith.maximumf %263, %264 : vector<32x128xf32>
    %c1_120 = arith.constant 1 : index
    %c0_121 = arith.constant 0 : index
    %c0_122 = arith.constant 0 : index
    %266 = vector.load %arg18[%c1_120, %c0_121, %c0_122] : memref<2x384x128xbf16, #tpu.memory_space<vmem>>, vector<1x384x128xbf16>
    %267 = vector.shape_cast %266 : vector<1x384x128xbf16> to vector<384x128xbf16>
    %268 = vector.extract_strided_slice %246 {offsets = [2, 0], sizes = [1, 128], strides = [1, 1]} : vector<4x128xf32> to vector<1x128xf32>
    %269 = vector.extract_strided_slice %246 {offsets = [3, 0], sizes = [1, 128], strides = [1, 1]} : vector<4x128xf32> to vector<1x128xf32>
    %c1_i32_123 = arith.constant 1 : i32
    %270 = tpu.dynamic_rotate %265 by %c1_i32_123 dim 0 : vector<32x128xf32>, i32 -> vector<32x128xf32>
    %cst_124 = arith.constant 0.000000e+00 : f32
    %271 = vector.broadcast %cst_124 : f32 to vector<32x128xf32>
    %272 = arith.select %242, %271, %270 : vector<32x128xi1>, vector<32x128xf32>
    %c31_i32_125 = arith.constant 31 : i32
    %273 = tpu.dynamic_rotate %265 by %c31_i32_125 dim 0 : vector<32x128xf32>, i32 -> vector<32x128xf32>
    %cst_126 = arith.constant 0.000000e+00 : f32
    %274 = vector.broadcast %cst_126 : f32 to vector<32x128xf32>
    %275 = arith.select %245, %274, %273 : vector<32x128xi1>, vector<32x128xf32>
    %276 = tpu.concatenate %272, %265, %275 in 1 : vector<32x128xf32>, vector<32x128xf32>, vector<32x128xf32> -> vector<32x384xf32>
    %277 = arith.truncf %276 : vector<32x384xf32> to vector<32x384xbf16>
    %cst_127 = arith.constant dense<0.000000e+00> : vector<32x128xf32>
    %278 = tpu.matmul %277, %267, %cst_127 {dimension_numbers = #tpu.dot_dimension_numbers<[1], [0], [0], [1], [0, 0, 1, 1], [], []>} : vector<32x384xbf16>, vector<384x128xbf16>, vector<32x128xf32> -> vector<32x128xf32>
    %279 = vector.broadcast %268 : vector<1x128xf32> to vector<32x128xf32>
    %280 = arith.mulf %278, %279 : vector<32x128xf32>
    %281 = vector.broadcast %269 : vector<1x128xf32> to vector<32x128xf32>
    %282 = arith.addf %280, %281 : vector<32x128xf32>
    %cst_128 = arith.constant 0.000000e+00 : f32
    %283 = vector.broadcast %cst_128 : f32 to vector<32x128xf32>
    %284 = arith.maximumf %282, %283 : vector<32x128xf32>
    %c0_129 = arith.constant 0 : index
    %c0_130 = arith.constant 0 : index
    %285 = vector.load %arg20[%c0_129, %c0_130] : memref<64x32xbf16, #tpu.memory_space<vmem>>, vector<64x32xbf16>
    %286 = arith.truncf %284 : vector<32x128xf32> to vector<32x128xbf16>
    %cst_131 = arith.constant dense<0.000000e+00> : vector<64x128xf32>
    %287 = tpu.matmul %285, %286, %cst_131 {dimension_numbers = #tpu.dot_dimension_numbers<[1], [0], [0], [1], [0, 0, 1, 1], [], []>} : vector<64x32xbf16>, vector<32x128xbf16>, vector<64x128xf32> -> vector<64x128xf32>
    %288 = arith.truncf %287 : vector<64x128xf32> to vector<64x128xbf16>
    %c0_132 = arith.constant 0 : index
    %c0_133 = arith.constant 0 : index
    %289 = vector.load %arg21[%c0_132, %c0_133] : memref<128x256xbf16, #tpu.memory_space<vmem>>, vector<128x256xbf16>
    %cst_134 = arith.constant dense<0.000000e+00> : vector<64x256xf32>
    %290 = tpu.matmul %288, %289, %cst_134 {dimension_numbers = #tpu.dot_dimension_numbers<[1], [0], [0], [1], [0, 0, 1, 1], [], []>} : vector<64x128xbf16>, vector<128x256xbf16>, vector<64x256xf32> -> vector<64x256xf32>
    %291 = tpu.iota {dimensions = array<i32: 0>} : vector<64x256xi32>
    %c0_i32_135 = arith.constant 0 : i32
    %292 = vector.broadcast %c0_i32_135 : i32 to vector<64x256xi32>
    %293 = arith.cmpi eq, %291, %292 : vector<64x256xi32>
    %c31_i32_136 = arith.constant 31 : i32
    %294 = vector.broadcast %c31_i32_136 : i32 to vector<64x256xi32>
    %295 = arith.cmpi eq, %291, %294 : vector<64x256xi32>
    %c32_i32 = arith.constant 32 : i32
    %296 = vector.broadcast %c32_i32 : i32 to vector<64x256xi32>
    %297 = arith.cmpi eq, %291, %296 : vector<64x256xi32>
    %298 = arith.ori %293, %297 : vector<64x256xi1>
    %c63_i32 = arith.constant 63 : i32
    %299 = vector.broadcast %c63_i32 : i32 to vector<64x256xi32>
    %300 = arith.cmpi eq, %291, %299 : vector<64x256xi32>
    %301 = arith.ori %295, %300 : vector<64x256xi1>
    %c0_137 = arith.constant 0 : index
    %c0_138 = arith.constant 0 : index
    %302 = vector.load %arg23[%c0_137, %c0_138] : memref<4x256xf32, #tpu.memory_space<vmem>>, vector<4x256xf32>
    %c0_139 = arith.constant 0 : index
    %c0_140 = arith.constant 0 : index
    %c0_141 = arith.constant 0 : index
    %303 = vector.load %arg22[%c0_139, %c0_140, %c0_141] : memref<2x768x256xbf16, #tpu.memory_space<vmem>>, vector<1x768x256xbf16>
    %304 = vector.shape_cast %303 : vector<1x768x256xbf16> to vector<768x256xbf16>
    %305 = vector.extract_strided_slice %302 {offsets = [0, 0], sizes = [1, 256], strides = [1, 1]} : vector<4x256xf32> to vector<1x256xf32>
    %306 = vector.extract_strided_slice %302 {offsets = [1, 0], sizes = [1, 256], strides = [1, 1]} : vector<4x256xf32> to vector<1x256xf32>
    %c1_i32_142 = arith.constant 1 : i32
    %307 = tpu.dynamic_rotate %290 by %c1_i32_142 dim 0 : vector<64x256xf32>, i32 -> vector<64x256xf32>
    %cst_143 = arith.constant 0.000000e+00 : f32
    %308 = vector.broadcast %cst_143 : f32 to vector<64x256xf32>
    %309 = arith.select %298, %308, %307 : vector<64x256xi1>, vector<64x256xf32>
    %c63_i32_144 = arith.constant 63 : i32
    %310 = tpu.dynamic_rotate %290 by %c63_i32_144 dim 0 : vector<64x256xf32>, i32 -> vector<64x256xf32>
    %cst_145 = arith.constant 0.000000e+00 : f32
    %311 = vector.broadcast %cst_145 : f32 to vector<64x256xf32>
    %312 = arith.select %301, %311, %310 : vector<64x256xi1>, vector<64x256xf32>
    %313 = tpu.concatenate %309, %290, %312 in 1 : vector<64x256xf32>, vector<64x256xf32>, vector<64x256xf32> -> vector<64x768xf32>
    %314 = arith.truncf %313 : vector<64x768xf32> to vector<64x768xbf16>
    %cst_146 = arith.constant dense<0.000000e+00> : vector<64x256xf32>
    %315 = tpu.matmul %314, %304, %cst_146 {dimension_numbers = #tpu.dot_dimension_numbers<[1], [0], [0], [1], [0, 0, 1, 1], [], []>} : vector<64x768xbf16>, vector<768x256xbf16>, vector<64x256xf32> -> vector<64x256xf32>
    %316 = vector.broadcast %305 : vector<1x256xf32> to vector<64x256xf32>
    %317 = arith.mulf %315, %316 : vector<64x256xf32>
    %318 = vector.broadcast %306 : vector<1x256xf32> to vector<64x256xf32>
    %319 = arith.addf %317, %318 : vector<64x256xf32>
    %cst_147 = arith.constant 0.000000e+00 : f32
    %320 = vector.broadcast %cst_147 : f32 to vector<64x256xf32>
    %321 = arith.maximumf %319, %320 : vector<64x256xf32>
    %c1_148 = arith.constant 1 : index
    %c0_149 = arith.constant 0 : index
    %c0_150 = arith.constant 0 : index
    %322 = vector.load %arg22[%c1_148, %c0_149, %c0_150] : memref<2x768x256xbf16, #tpu.memory_space<vmem>>, vector<1x768x256xbf16>
    %323 = vector.shape_cast %322 : vector<1x768x256xbf16> to vector<768x256xbf16>
    %324 = vector.extract_strided_slice %302 {offsets = [2, 0], sizes = [1, 256], strides = [1, 1]} : vector<4x256xf32> to vector<1x256xf32>
    %325 = vector.extract_strided_slice %302 {offsets = [3, 0], sizes = [1, 256], strides = [1, 1]} : vector<4x256xf32> to vector<1x256xf32>
    %c1_i32_151 = arith.constant 1 : i32
    %326 = tpu.dynamic_rotate %321 by %c1_i32_151 dim 0 : vector<64x256xf32>, i32 -> vector<64x256xf32>
    %cst_152 = arith.constant 0.000000e+00 : f32
    %327 = vector.broadcast %cst_152 : f32 to vector<64x256xf32>
    %328 = arith.select %298, %327, %326 : vector<64x256xi1>, vector<64x256xf32>
    %c63_i32_153 = arith.constant 63 : i32
    %329 = tpu.dynamic_rotate %321 by %c63_i32_153 dim 0 : vector<64x256xf32>, i32 -> vector<64x256xf32>
    %cst_154 = arith.constant 0.000000e+00 : f32
    %330 = vector.broadcast %cst_154 : f32 to vector<64x256xf32>
    %331 = arith.select %301, %330, %329 : vector<64x256xi1>, vector<64x256xf32>
    %332 = tpu.concatenate %328, %321, %331 in 1 : vector<64x256xf32>, vector<64x256xf32>, vector<64x256xf32> -> vector<64x768xf32>
    %333 = arith.truncf %332 : vector<64x768xf32> to vector<64x768xbf16>
    %cst_155 = arith.constant dense<0.000000e+00> : vector<64x256xf32>
    %334 = tpu.matmul %333, %323, %cst_155 {dimension_numbers = #tpu.dot_dimension_numbers<[1], [0], [0], [1], [0, 0, 1, 1], [], []>} : vector<64x768xbf16>, vector<768x256xbf16>, vector<64x256xf32> -> vector<64x256xf32>
    %335 = vector.broadcast %324 : vector<1x256xf32> to vector<64x256xf32>
    %336 = arith.mulf %334, %335 : vector<64x256xf32>
    %337 = vector.broadcast %325 : vector<1x256xf32> to vector<64x256xf32>
    %338 = arith.addf %336, %337 : vector<64x256xf32>
    %cst_156 = arith.constant 0.000000e+00 : f32
    %339 = vector.broadcast %cst_156 : f32 to vector<64x256xf32>
    %340 = arith.maximumf %338, %339 : vector<64x256xf32>
    %341 = arith.truncf %340 : vector<64x256xf32> to vector<64x256xbf16>
    %c0_157 = arith.constant 0 : index
    %c0_158 = arith.constant 0 : index
    %342 = vector.load %arg24[%c0_157, %c0_158] : memref<256x32xbf16, #tpu.memory_space<vmem>>, vector<256x32xbf16>
    %cst_159 = arith.constant dense<0.000000e+00> : vector<64x32xf32>
    %343 = tpu.matmul %341, %342, %cst_159 {dimension_numbers = #tpu.dot_dimension_numbers<[1], [0], [0], [1], [0, 0, 1, 1], [], []>} : vector<64x256xbf16>, vector<256x32xbf16>, vector<64x32xf32> -> vector<64x32xf32>
    %c0_160 = arith.constant 0 : index
    %c0_161 = arith.constant 0 : index
    %344 = vector.load %arg25[%c0_160, %c0_161] : memref<1x1xf32, #tpu.memory_space<vmem>>, vector<1x1xf32>
    %345 = vector.broadcast %344 : vector<1x1xf32> to vector<64x32xf32>
    %346 = arith.addf %343, %345 : vector<64x32xf32>
    %c0_162 = arith.constant 0 : index
    %c0_163 = arith.constant 0 : index
    %347 = vector.load %arg26[%c0_162, %c0_163] : memref<64x32xf32, #tpu.memory_space<vmem>>, vector<64x32xf32>
    tpu.vector_store %arg26[%c0_162, %c0_163], %346 {strides = array<i32>} : memref<64x32xf32, #tpu.memory_space<vmem>>, vector<64x32xf32>,
    return
  }
  func.func @transform_0(%arg0: i32) -> (i32, i32, i32) {
    %c0_i32 = arith.constant 0 : i32
    %c0_i32_0 = arith.constant 0 : i32
    %c0_i32_1 = arith.constant 0 : i32
    return %arg0, %c0_i32, %c0_i32_0 : i32, i32, i32
  }
  func.func @transform_1(%arg0: i32) -> (i32, i32) {
    %c0_i32 = arith.constant 0 : i32
    %c0_i32_0 = arith.constant 0 : i32
    %c0_i32_1 = arith.constant 0 : i32
    return %c0_i32, %c0_i32_0 : i32, i32
  }
  func.func @transform_2(%arg0: i32) -> (i32, i32) {
    %c0_i32 = arith.constant 0 : i32
    %c0_i32_0 = arith.constant 0 : i32
    %c0_i32_1 = arith.constant 0 : i32
    return %c0_i32, %c0_i32_0 : i32, i32
  }
  func.func @transform_3(%arg0: i32) -> (i32, i32) {
    %c0_i32 = arith.constant 0 : i32
    %c0_i32_0 = arith.constant 0 : i32
    %c0_i32_1 = arith.constant 0 : i32
    return %c0_i32, %c0_i32_0 : i32, i32
  }
  func.func @transform_4(%arg0: i32) -> (i32, i32) {
    %c0_i32 = arith.constant 0 : i32
    %c0_i32_0 = arith.constant 0 : i32
    %c0_i32_1 = arith.constant 0 : i32
    return %c0_i32, %c0_i32_0 : i32, i32
  }
  func.func @transform_5(%arg0: i32) -> (i32, i32, i32) {
    %c0_i32 = arith.constant 0 : i32
    %c0_i32_0 = arith.constant 0 : i32
    %c0_i32_1 = arith.constant 0 : i32
    %c0_i32_2 = arith.constant 0 : i32
    return %c0_i32, %c0_i32_0, %c0_i32_1 : i32, i32, i32
  }
  func.func @transform_6(%arg0: i32) -> (i32, i32) {
    %c0_i32 = arith.constant 0 : i32
    %c0_i32_0 = arith.constant 0 : i32
    %c0_i32_1 = arith.constant 0 : i32
    return %c0_i32, %c0_i32_0 : i32, i32
  }
  func.func @transform_7(%arg0: i32) -> (i32, i32) {
    %c0_i32 = arith.constant 0 : i32
    %c0_i32_0 = arith.constant 0 : i32
    %c0_i32_1 = arith.constant 0 : i32
    return %c0_i32, %c0_i32_0 : i32, i32
  }
  func.func @transform_8(%arg0: i32) -> (i32, i32) {
    %c0_i32 = arith.constant 0 : i32
    %c0_i32_0 = arith.constant 0 : i32
    %c0_i32_1 = arith.constant 0 : i32
    return %c0_i32, %c0_i32_0 : i32, i32
  }
  func.func @transform_9(%arg0: i32) -> (i32, i32, i32) {
    %c0_i32 = arith.constant 0 : i32
    %c0_i32_0 = arith.constant 0 : i32
    %c0_i32_1 = arith.constant 0 : i32
    %c0_i32_2 = arith.constant 0 : i32
    return %c0_i32, %c0_i32_0, %c0_i32_1 : i32, i32, i32
  }
  func.func @transform_10(%arg0: i32) -> (i32, i32) {
    %c0_i32 = arith.constant 0 : i32
    %c0_i32_0 = arith.constant 0 : i32
    %c0_i32_1 = arith.constant 0 : i32
    return %c0_i32, %c0_i32_0 : i32, i32
  }
  func.func @transform_11(%arg0: i32) -> (i32, i32) {
    %c0_i32 = arith.constant 0 : i32
    %c0_i32_0 = arith.constant 0 : i32
    %c0_i32_1 = arith.constant 0 : i32
    return %c0_i32, %c0_i32_0 : i32, i32
  }
  func.func @transform_12(%arg0: i32) -> (i32, i32) {
    %c0_i32 = arith.constant 0 : i32
    %c0_i32_0 = arith.constant 0 : i32
    %c0_i32_1 = arith.constant 0 : i32
    return %c0_i32, %c0_i32_0 : i32, i32
  }
  func.func @transform_13(%arg0: i32) -> (i32, i32, i32) {
    %c0_i32 = arith.constant 0 : i32
    %c0_i32_0 = arith.constant 0 : i32
    %c0_i32_1 = arith.constant 0 : i32
    %c0_i32_2 = arith.constant 0 : i32
    return %c0_i32, %c0_i32_0, %c0_i32_1 : i32, i32, i32
  }
  func.func @transform_14(%arg0: i32) -> (i32, i32) {
    %c0_i32 = arith.constant 0 : i32
    %c0_i32_0 = arith.constant 0 : i32
    %c0_i32_1 = arith.constant 0 : i32
    return %c0_i32, %c0_i32_0 : i32, i32
  }
  func.func @transform_15(%arg0: i32) -> (i32, i32) {
    %c0_i32 = arith.constant 0 : i32
    %c0_i32_0 = arith.constant 0 : i32
    %c0_i32_1 = arith.constant 0 : i32
    return %c0_i32, %c0_i32_0 : i32, i32
  }
  func.func @transform_16(%arg0: i32) -> (i32, i32) {
    %c0_i32 = arith.constant 0 : i32
    %c0_i32_0 = arith.constant 0 : i32
    %c0_i32_1 = arith.constant 0 : i32
    return %c0_i32, %c0_i32_0 : i32, i32
  }
  func.func @transform_17(%arg0: i32) -> (i32, i32, i32) {
    %c0_i32 = arith.constant 0 : i32
    %c0_i32_0 = arith.constant 0 : i32
    %c0_i32_1 = arith.constant 0 : i32
    %c0_i32_2 = arith.constant 0 : i32
    return %c0_i32, %c0_i32_0, %c0_i32_1 : i32, i32, i32
  }
  func.func @transform_18(%arg0: i32) -> (i32, i32) {
    %c0_i32 = arith.constant 0 : i32
    %c0_i32_0 = arith.constant 0 : i32
    %c0_i32_1 = arith.constant 0 : i32
    return %c0_i32, %c0_i32_0 : i32, i32
  }
  func.func @transform_19(%arg0: i32) -> (i32, i32) {
    %c0_i32 = arith.constant 0 : i32
    %c0_i32_0 = arith.constant 0 : i32
    %c0_i32_1 = arith.constant 0 : i32
    return %c0_i32, %c0_i32_0 : i32, i32
  }
  func.func @transform_20(%arg0: i32) -> (i32, i32) {
    %c0_i32 = arith.constant 0 : i32
    %c0_i32_0 = arith.constant 0 : i32
    %c0_i32_1 = arith.constant 0 : i32
    return %c0_i32, %c0_i32_0 : i32, i32
  }
  func.func @transform_21(%arg0: i32) -> (i32, i32, i32) {
    %c0_i32 = arith.constant 0 : i32
    %c0_i32_0 = arith.constant 0 : i32
    %c0_i32_1 = arith.constant 0 : i32
    %c0_i32_2 = arith.constant 0 : i32
    return %c0_i32, %c0_i32_0, %c0_i32_1 : i32, i32, i32
  }
  func.func @transform_22(%arg0: i32) -> (i32, i32) {
    %c0_i32 = arith.constant 0 : i32
    %c0_i32_0 = arith.constant 0 : i32
    %c0_i32_1 = arith.constant 0 : i32
    return %c0_i32, %c0_i32_0 : i32, i32
  }
  func.func @transform_23(%arg0: i32) -> (i32, i32) {
    %c0_i32 = arith.constant 0 : i32
    %c0_i32_0 = arith.constant 0 : i32
    %c0_i32_1 = arith.constant 0 : i32
    return %c0_i32, %c0_i32_0 : i32, i32
  }
  func.func @transform_24(%arg0: i32) -> (i32, i32) {
    %c0_i32 = arith.constant 0 : i32
    %c0_i32_0 = arith.constant 0 : i32
    %c0_i32_1 = arith.constant 0 : i32
    return %c0_i32, %c0_i32_0 : i32, i32
  }
  func.func @transform_25(%arg0: i32) -> (i32, i32) {
    %c0_i32 = arith.constant 0 : i32
    %c0_i32_0 = arith.constant 0 : i32
    return %arg0, %c0_i32 : i32, i32
  }
}

</mosaic_0001>

<bundles_post_ra>
// kernel: tpu_custom_call.1
= control target key start
LH: loop header
LB: loop body
LE: loop exit
PB: predicated region body
PF: predicated region fallthrough
CT: control target
= control target key end

     0   :  { %s8554_s0 = inlined_call_operand.vmem [shape: f32[2,1,256], index: 0, kind: input, shape index: {}]   ;;  %s8555_s1 = inlined_call_operand.vmem [shape: bf16[256,8], index: 1, kind: input, shape index: {}]   ;;  %s8556_s2 = inlined_call_operand.vmem [shape: f32[1,8], index: 2, kind: input, shape index: {}]   ;;  %s8557_s3 = inlined_call_operand.vmem [shape: bf16[4,2], index: 3, kind: input, shape index: {}]   ;;  %s8558_s4 = inlined_call_operand.vmem [shape: bf16[8,16], index: 4, kind: input, shape index: {}]   ;;  %s8559_s5 = inlined_call_operand.vmem [shape: bf16[2,48,16], index: 5, kind: input, shape index: {}]   ;;  %s8560_s6 = inlined_call_operand.vmem [shape: f32[4,16], index: 6, kind: input, shape index: {}]   ;;  %s8561_s7 = inlined_call_operand.vmem [shape: bf16[8,4], index: 7, kind: input, shape index: {}]   ;;  %s8562_s8 = inlined_call_operand.vmem [shape: bf16[16,32], index: 8, kind: input, shape index: {}]   ;;  %s8563_s9 = inlined_call_operand.vmem [shape: bf16[2,96,32], index: 9, kind: input, shape index: {}]   ;;  %s8564_s10 = inlined_call_operand.vmem [shape: f32[4,32], index: 10, kind: input, shape index: {}]   ;;  %s8565_s11 = inlined_call_operand.vmem [shape: bf16[16,8], index: 11, kind: input, shape index: {}]   ;;  %s8566_s12 = inlined_call_operand.vmem [shape: bf16[32,64], index: 12, kind: input, shape index: {}]   ;;  %s8567_s13 = inlined_call_operand.vmem [shape: bf16[2,192,64], index: 13, kind: input, shape index: {}]   ;;  %s8568_s14 = inlined_call_operand.vmem [shape: f32[4,64], index: 14, kind: input, shape index: {}]   ;;  %s8569_s15 = inlined_call_operand.vmem [shape: bf16[32,16], index: 15, kind: input, shape index: {}]   ;;  %s8570_s16 = inlined_call_operand.vmem [shape: bf16[64,128], index: 16, kind: input, shape index: {}]   ;;  %s8571_s17 = inlined_call_operand.vmem [shape: bf16[2,384,128], index: 17, kind: input, shape index: {}]   ;;  %s8572_s18 = inlined_call_operand.vmem [shape: f32[4,128], index: 18, kind: input, shape index: {}]   ;;  %s8573_s19 = inlined_call_operand.vmem [shape: bf16[64,32], index: 19, kind: input, shape index: {}]   ;;  %s8574_s20 = inlined_call_operand.vmem [shape: bf16[128,256], index: 20, kind: input, shape index: {}]   ;;  %s8575_s21 = inlined_call_operand.hbm [shape: bf16[2,768,256], index: 21, kind: input, shape index: {}]   ;;  %s8576_s22 = inlined_call_operand.vmem [shape: f32[4,256], index: 22, kind: input, shape index: {}]   ;;  %s8577_s23 = inlined_call_operand.vmem [shape: bf16[256,32], index: 23, kind: input, shape index: {}]   ;;  %s8578_s24 = inlined_call_operand.<no memory space> [shape: f32[1,1], index: 24, kind: input, shape index: {}]   ;;  %s8579_s25 = inlined_call_operand.vmem [shape: f32[64,32], index: 25, kind: output, shape index: {}]  }
   0x1   :  { %8584 = sst [smem:[#allocation6_spill]] %s8554_s0  ;;  %v30_v0 = vstv %s8578_s24 }
   0x2   :  { %8585 = sst [smem:[#allocation7_spill]] %s8555_s1  ;;  %31 = vst [vmem:[#allocation2] sm:$0x1] %v30_v0 }
   0x3   :  { %8586 = sst [smem:[#allocation8_spill]] %s8556_s2 }
   0x4   :  { %8587 = sst [smem:[#allocation9_spill]] %s8557_s3 }
   0x5   :  { %8588 = sst [smem:[#allocation10_spill]] %s8558_s4 }
   0x6   :  { %8589 = sst [smem:[#allocation11_spill]] %s8559_s5 }
   0x7   :  { %8590 = sst [smem:[#allocation12_spill]] %s8560_s6 }
   0x8   :  { %8591 = sst [smem:[#allocation13_spill]] %s8561_s7 }
   0x9   :  { %8592 = sst [smem:[#allocation14_spill]] %s8562_s8 }
   0xa   :  { %8593 = sst [smem:[#allocation15_spill]] %s8563_s9 }
   0xb   :  { %32 = vsyncpa [#allocation4], 0  ;;  %s6889_s6 = smov [#allocation3]  }
   0xc   :  { %s80_s30 = sshll.u32 %s6889_s6, 4  ;;  %s81_s30 = int_to_ptr.vmem [resolvable:$true] %s80_s30 }
   0xd   :  { %s6875_s7 = scalar_lea.vmem %s81_s30, 24576  ;;  %p6880_p1 = scmp.lt.s32.totalorder %s81_s30, %s81_s30 }
   0xe   :  { %p6876_p0 = scmp.ne.s32.totalorder %s81_s30, %s6875_s7  ;;  %p6881_p2 = scmp.lt.s32.totalorder %s6875_s7, %s6875_s7 }
  0x10   :  { %p6882_p3 = por %p6881_p2, %p6880_p1 }
  0x12   :  { %p6883_p4 = pnand %p6882_p3, %p6876_p0 }
  0x14   :  { %6886 = shalt.err (!%p6883_p4)
}
  0x15   :  { %s6890_s3 = smov 128   ;;  %s6891_s26 = smov 8  }
  0x16   :  { %86 = dma.hbm_to_vmem [thread:$0]  %s8575_s21, 24576, %s81_s30, [#allocation4], %s6890_s3, %s6890_s3, %s6891_s26  }
  0x17   :  { %6887 = dma.done.wait [#allocation4], 24576  }
  0x18   :  { %6888 = vsyncadd [#allocation4], 4294942720  ;;  %s8594_s4 = sld [smem:[#allocation7_spill]]  ;;  %v101_v6 = vlaneseq  ;;  %vm173_vm0 = vcmask 1041409   ;;  %v6892_v41 = vmov 0.0   ;;  %vm6893_vm1 = vmmov 0  }
  0x19   :  { %s8595_s21 = sld [smem:[#allocation6_spill]]  ;;  %6147 = vmatprep.subr.bf16.mxu1 %v6892_v41  ;;  %6149 = vmatprep.mubr.msk.bf16.mxu1 %vm6893_vm1, %v6892_v41  ;;  %vm326_vm3 = vcmask 1040384   ;;  %vm322_vm4 = vcmask 15360   ;;  %vm376_vm5 = vcmask 1043456   ;;  %vm372_vm6 = vcmask 64512  }
  0x1a   :  { %v7053_v9 = vshrl.u32 %v101_v6, 7  ;;  %s8596_s29 = sld [smem:[#allocation8_spill]]  ;;  %vm435_vm7 = vcmask 1047556   ;;  %vm455_vm8 = vcmask 130048   ;;  %vm796_vm15 = vcmask 1041408  }
  0x1b   :  { %s8597_s6 = sld [smem:[#allocation9_spill]] }
  0x1c   :  { %v7062_v12 = vsub.s32 0, %v7053_v9  ;;  %v7065_v13 = vsub.s32 1, %v7053_v9  ;;  %s8598_s3 = sld [smem:[#allocation10_spill]]  ;;  %vm422_vm9 = vcmp.eq.s32.totalorder %v7053_v9, 0  ;;  %vm424_vm10 = vcmp.eq.s32.totalorder %v7053_v9, 2 }
  0x1d   :  { %s8599_s8 = sld [smem:[#allocation11_spill]]  ;;  %vm7139_vm11 = vmor %vm422_vm9, %vm424_vm10  ;;  %vm423_vm12 = vcmp.eq.s32.totalorder %v7053_v9, 1  ;;  %vm426_vm13 = vcmp.eq.s32.totalorder %v7053_v9, 3 }
  0x1e   :  { %v6419_v1 = vld [vmem:[%s8594_s4 + $0x78] sm:$0xff]   ;;  %v6421_v3 = vld [vmem:[%s8594_s4 + $0x70] sm:$0xff]   ;;  %v6423_v5 = vld [vmem:[%s8594_s4 + $0x68] sm:$0xff]   ;;  %s8605_s1 = sld [smem:[#allocation13_spill]] }
  0x1f   :  { %v6420_v2 = vld [vmem:[%s8594_s4 + $0x38] sm:$0xff]   ;;  %5921 = vmatprep.subr.bf16.mxu0 %v6419_v1  ;;  %v6422_v4 = vld [vmem:[%s8594_s4 + $0x30] sm:$0xff]   ;;  %v6424_v7 = vld [vmem:[%s8594_s4 + $0x28] sm:$0xff]   ;;  %s8606_s27 = sld [smem:[#allocation14_spill]] }
  0x20   :  { %5922 = vmatpush3.bf16.msra.mxu0 %v6420_v2  ;;  %v6425_v8 = vld [vmem:[%s8594_s4 + $0x60] sm:$0xff]   ;;  %v6427_v11 = vld [vmem:[%s8594_s4 + $0x58] sm:$0xff]   ;;  %v6429_v15 = vld [vmem:[%s8594_s4 + $0x50] sm:$0xff]   ;;  %s8607_s5 = sld [smem:[#allocation15_spill]] }
  0x21   :  { %5923 = vmatprep.subr.bf16.mxu0 %v6421_v3  ;;  %v6426_v10 = vld [vmem:[%s8594_s4 + $0x20] sm:$0xff]   ;;  %v6428_v14 = vld [vmem:[%s8594_s4 + $0x18] sm:$0xff]   ;;  %v6430_v18 = vld [vmem:[%s8594_s4 + $0x10] sm:$0xff]  }
  0x22   :  { %v97_v16 = vld [vmem:[%s8595_s21] sm:$0x3]  ;;  %v98_v17 = vld [vmem:[%s8595_s21 + $0x2] sm:$0x3]  ;;  %v6431_v23 = vld [vmem:[%s8594_s4 + $0x48] sm:$0xff]  }
  0x23   :  { %v104_v19 = vrot.slane %v97_v16, %v7062_v12  ;;  %v108_v20 = vrot.slane %v97_v16, %v7065_v13  ;;  %v112_v21 = vrot.slane %v98_v17, %v7062_v12  ;;  %v116_v22 = vrot.slane %v98_v17, %v7065_v13  ;;  %v6432_v28 = vld [vmem:[%s8594_s4 + $0x8] sm:$0xff]   ;;  %v6433_v32 = vld [vmem:[%s8594_s4 + $0x40] sm:$0xff]   ;;  %vm7153_vm14 = vmor %vm423_vm12, %vm426_vm13 }
  0x24   :  { %5924 = vmatpush3.bf16.msra.mxu0 %v6422_v4  ;;  %v6434_v36 = vld [vmem:[%s8594_s4] sm:$0xff]   ;;  %v6435_v61 = vld [vmem:[%s8599_s8 + $0x8] sm:$0xff]   ;;  %vm1452_vm12 = vcmp.lt.s32.totalorder %v7053_v9, 7 }
  0x25   :  { %5925 = vmatprep.subr.bf16.mxu0 %v6423_v5  ;;  %v121_v24 = vpack.c.bf16 %v104_v19, %v104_v19  ;;  %v122_v25 = vpack.c.bf16 %v108_v20, %v108_v20  ;;  %v123_v26 = vpack.c.bf16 %v112_v21, %v112_v21  ;;  %v124_v27 = vpack.c.bf16 %v116_v22, %v116_v22  ;;  %v5353_v43 = vld [vmem:[%s8596_s29] ss:$0 sm:$0xff]  ;;  %v6439_v21 = vld [vmem:[%s8599_s8 + $0x18] sm:$0xff]  }
  0x26   :  { %v320_v53 = vld [vmem:[%s8597_s6] sm:$0x3]  ;;  %s8604_s6 = sld [smem:[#allocation12_spill]] }
  0x27   :  { %v169_v29 = vunpack.c.l.b16 %v122_v25  ;;  %v171_v30 = vunpack.c.l.b16 %v124_v27  ;;  %v170_v31 = vunpack.c.l.b16 %v123_v26  ;;  %v168_v34 = vunpack.c.l.b16 %v121_v24  ;;  %v371_v54 = vld [vmem:[%s8598_s3] sm:$0xf] }
  0x28   :  { %5926 = vmatpush3.bf16.msra.mxu0 %v6424_v7  ;;  %v378_v55 = vsel %vm376_vm5, %v371_v54, 0  ;;  %v6436_v63 = vld [vmem:[%s8599_s8] sm:$0xff]  }
  0x29   :  { %5927 = vmatprep.subr.bf16.mxu0 %v6425_v8  ;;  %v175_v33 = vrot.slane %v171_v30, 7  ;;  %v172_v35 = vrot.slane %v170_v31, 7  ;;  %v6438_v20 = vld [vmem:[%s8599_s8 + $0x20] sm:$0xff]  }
  0x2a   :  { %v790_v17 = vld [vmem:[%s8605_s1] sm:$0xf] }
  0x2b   :  { %v176_v37 = vsel %vm173_vm0, %v175_v33, %v169_v29  ;;  %v174_v39 = vsel %vm173_vm0, %v172_v35, %v168_v34  ;;  %vm792_vm0 = vcmask 31744  }
  0x2c   :  { %5928 = vmatpush3.bf16.msra.mxu0 %v6426_v10  ;;  %v178_v38 = vpack.c.b16 %v176_v37, %v176_v37  ;;  %v177_v40 = vpack.c.b16 %v174_v39, %v174_v39  ;;  %v428_v29 = vld [vmem:[%s8604_s6] sm:$0xf] }
  0x2d   :  { %5929 = vmatprep.subr.bf16.mxu0 %v6427_v11  ;;  %v607_v35 = vrot.slane %v428_v29, %v7065_v13 }
  0x2e   :  { %309 = vmatprep.mubr.bf16.mxu0 %v178_v38 }
  0x30   :  { %5930 = vmatpush3.bf16.msra.mxu0 %v6428_v14  ;;  %v6437_v14 = vld [vmem:[%s8599_s8 + $0x10] sm:$0xff]  }
  0x31   :  { %5931 = vmatprep.subr.bf16.mxu0 %v6429_v15 }
  0x34   :  { %5932 = vmatpush3.bf16.msra.mxu0 %v6430_v18 }
  0x35   :  { %5933 = vmatprep.subr.bf16.mxu0 %v6431_v23 }
  0x38   :  { %5934 = vmatpush3.bf16.msra.mxu0 %v6432_v28 }
  0x39   :  { %5935 = vmatprep.subr.bf16.mxu0 %v6433_v32  ;;  %v602_v32 = vrot.slane %v428_v29, %v7062_v12 }
  0x3c   :  { %5936 = vmatpush3.bf16.msra.mxu0 %v6434_v36 }
  0x3d   :  { %6177 = vmatprep.subr.bf16.mxu0 %v6892_v41 }
  0x3f   :  { %310 = vmatmul.mubr.bf16.vlgmr.msra.gmra.mxu0 %v177_v40 }
  0x40   :  { %6179 = vmatprep.mubr.msk.bf16.mxu0 %vm6893_vm1, %v6892_v41  ;;  %6178 = vmatpush3.bf16.msra.mxu0 %v6438_v20 }
  0x41   :  { %6189 = vmatprep.subr.bf16.mxu0 %v6892_v41 }
  0xff   :  { %v5937_v42 = vpop.f32.mrf.mxu0 }
 0x101   :  { %v5938_v44 = vpop.f32.mrf.mxu0 }
 0x102   :  { %v5939_v45 = vadd.f32 %v5938_v44, %v5937_v42 }
 0x103   :  { %v5940_v46 = vpop.f32.mrf.mxu0 }
 0x104   :  { %v312_v47 = vadd.f32 %v5939_v45, %v5353_v43  ;;  %v6440_v43 = vld [vmem:[%s8599_s8 + $0x28] sm:$0xff]  }
 0x105   :  { %v5941_v48 = vpop.f32.mrf.mxu0 }
 0x106   :  { %v318_v49 = vmul.f32 0.5, %v312_v47  ;;  %vm317_vm2 = vcmp.ge.f32.partialorder %v312_v47, 0.0 }
 0x108   :  { %v319_v50 = vsel %vm317_vm2, %v312_v47, %v318_v49  ;;  %vm892_vm2 = vcmp.eq.s32.totalorder %v7053_v9, 4 }
 0x109   :  { %v321_v51 = vpack.c.bf16 %v319_v50, %v319_v50 }
 0x10b   :  { %v328_v52 = vsel %vm326_vm3, %v321_v51, 0  ;;  %vm7238_vm3 = vmor %vm422_vm9, %vm892_vm2 }
 0x10c   :  { %6148 = vmatpush3.bf16.msra.mxu1 %v328_v52 }
 0x10d   :  { %6153 = vmatprep.subr.bf16.mxu1 %v6892_v41 }
 0x10f   :  { %6150 = vmatmul.mubr.msk.bf16.vlgmr.msra.gmra.mxu1 %vm322_vm4, %v320_v53  ;;  %vm894_vm4 = vcmp.eq.s32.totalorder %v7053_v9, 7 }
 0x110   :  { %6155 = vmatprep.mubr.msk.bf16.mxu1 %vm6893_vm1, %v6892_v41  ;;  %6154 = vmatpush3.bf16.msra.mxu1 %v378_v55  ;;  %vm7250_vm10 = vmor %vm426_vm13, %vm894_vm4 }
 0x111   :  { %6159 = vmatprep.subr.bf16.mxu1 %v6892_v41 }
 0x1cf   :  { %v364_v56 = vpop.f32.mrf.mxu1 }
 0x1d0   :  { %v370_v57 = vpack.c.bf16 %v364_v56, %v364_v56 }
 0x1d1   :  { %v6151_v58 = vpop.f32.mrf.mxu1 }
 0x1d2   :  { %6156 = vmatmul.mubr.msk.bf16.vlgmr.msra.gmra.mxu1 %vm372_vm6, %v370_v57 }
 0x1d3   :  { %v367_v59 = vpop.f32.mrf.mxu1  ;;  %6161 = vmatprep.mubr.msk.bf16.mxu1 %vm6893_vm1, %v6892_v41  ;;  %6160 = vmatpush3.bf16.msra.mxu1 %v6435_v61 }
 0x1d4   :  { %6165 = vmatprep.subr.bf16.mxu1 %v6892_v41  ;;  %v7199_v59 = vsub.s32 2, %v7053_v9 }
 0x1d5   :  { %v6152_v60 = vpop.f32.mrf.mxu1 }
 0x1d6   :  { %v7202_v60 = vsub.s32 3, %v7053_v9 }
 0x292   :  { %v414_v62 = vpop.f32.mrf.mxu1 }
 0x293   :  { %v436_v0 = vrot.slane %v414_v62, 4  ;;  %v448_v1 = vpack.c.bf16 %v414_v62, %v414_v62 }
 0x294   :  { %v6157_v2 = vpop.f32.mrf.mxu1 }
 0x295   :  { %v437_v3 = vsel %vm435_vm7, %v436_v0, %v414_v62  ;;  %6162 = vmatmul.mubr.msk.bf16.vlgmr.msra.gmra.mxu1 %vm455_vm8, %v448_v1  ;;  %v782_v0 = vrot.slane %v428_v29, %v7199_v59 }
 0x296   :  { %v438_v4 = vrot.slane %v437_v3, 4  ;;  %v417_v5 = vpop.f32.mrf.mxu1  ;;  %6166 = vmatpush3.bf16.msra.mxu1 %v6436_v63  ;;  %6167 = vmatprep.mubr.msk.bf16.mxu1 %vm6893_vm1, %v6892_v41 }
 0x297   :  { %6171 = vmatprep.subr.bf16.mxu1 %v6892_v41 }
 0x298   :  { %v439_v7 = vsel %vm435_vm7, %v438_v4, %v414_v62  ;;  %v6158_v8 = vpop.f32.mrf.mxu1  ;;  %v787_v4 = vrot.slane %v428_v29, %v7202_v60 }
 0x299   :  { %v441_v10 = vrot.slane %v439_v7, 3  ;;  %v444_v16 = vrot.slane %v439_v7, 1 }
 0x29b   :  { %v443_v11 = vsel %vm7139_vm11, 0.0, %v441_v10  ;;  %v446_v18 = vsel %vm7153_vm14, 0.0, %v444_v16 }
 0x29c   :  { %v447_v15 = vpack.c.bf16 %v443_v11, %v443_v11  ;;  %v548_v19 = vpack.c.bf16 %v446_v18, %v446_v18  ;;  %v6441_v18 = vld [vmem:[%s8606_s27] sm:$0xff]  }
 0x29e   :  { %6168 = vmatmul.mubr.msk.bf16.vlgmr.msra.gmra.mxu1 %vm455_vm8, %v447_v15 }
 0x29f   :  { %6172 = vmatpush3.bf16.msra.mxu1 %v6437_v14  ;;  %6173 = vmatprep.mubr.msk.bf16.mxu1 %vm6893_vm1, %v6892_v41 }
 0x2a0   :  { %6183 = vmatprep.subr.bf16.mxu1 %v6892_v41 }
 0x2a6   :  { %6174 = vmatmul.mubr.msk.bf16.vlgmr.msra.gmra.mxu1 %vm455_vm8, %v548_v19  ;;  %v6442_v19 = vld [vmem:[%s8607_s5 + $0x18] sm:$0xff]  }
 0x2a7   :  { %6185 = vmatprep.mubr.msk.bf16.mxu1 %vm6893_vm1, %v6892_v41  ;;  %6184 = vmatpush3.bf16.msra.mxu1 %v6439_v21  ;;  %v6443_v21 = vld [vmem:[%s8607_s5 + $0x8] sm:$0xff]  }
 0x2a8   :  { %6195 = vmatprep.subr.bf16.mxu1 %v6892_v41 }
 0x355   :  { %v493_v22 = vpop.f32.mrf.mxu1 }
 0x357   :  { %v6163_v23 = vpop.f32.mrf.mxu1 }
 0x359   :  { %v496_v24 = vpop.f32.mrf.mxu1 }
 0x35b   :  { %v6164_v25 = vpop.f32.mrf.mxu1 }
 0x35e   :  { %v542_v26 = vpop.f32.mrf.mxu1 }
 0x35f   :  { %v543_v31 = vadd.f32 %v542_v26, %v493_v22  ;;  %v6444_v26 = vld [vmem:[%s8607_s5 + $0x10] sm:$0xff]  }
 0x360   :  { %v6169_v27 = vpop.f32.mrf.mxu1 }
 0x361   :  { %v6445_v27 = vld [vmem:[%s8607_s5] sm:$0xff]  }
 0x362   :  { %v545_v28 = vpop.f32.mrf.mxu1 }
 0x364   :  { %v6170_v30 = vpop.f32.mrf.mxu1 }
 0x365   :  { %v6446_v30 = vld [vmem:[%s8607_s5 + $0x28] sm:$0xff]  }
 0x366   :  { %v592_v33 = vpop.f32.mrf.mxu1 }
 0x367   :  { %v598_v34 = vadd.f32 %v592_v33, %v543_v31 }
 0x368   :  { %v6175_v36 = vpop.f32.mrf.mxu1 }
 0x369   :  { %v603_v37 = vmul.f32 %v602_v32, %v598_v34 }
 0x36a   :  { %v595_v38 = vpop.f32.mrf.mxu1 }
 0x36b   :  { %v608_v39 = vadd.f32 %v607_v35, %v603_v37 }
 0x36c   :  { %v6176_v40 = vpop.f32.mrf.mxu1 }
 0x36d   :  { %v609_v42 = vmax.f32 %v608_v39, 0.0  ;;  %v6447_v39 = vld [vmem:[%s8607_s5 + $0x20] sm:$0xff]  }
 0x36f   :  { %v617_v44 = vrot.slane %v609_v42, 4  ;;  %v629_v45 = vpack.c.bf16 %v609_v42, %v609_v42 }
 0x371   :  { %v618_v46 = vsel %vm435_vm7, %v617_v44, %v609_v42  ;;  %6180 = vmatmul.mubr.msk.bf16.vlgmr.msra.gmra.mxu0 %vm455_vm8, %v629_v45  ;;  %v6448_v44 = vld [vmem:[%s8607_s5 + $0x48] sm:$0xff]   ;;  %v6449_v45 = vld [vmem:[%s8607_s5 + $0x38] sm:$0xff]  }
 0x372   :  { %v619_v47 = vrot.slane %v618_v46, 4  ;;  %6190 = vmatpush3.bf16.msra.mxu0 %v6440_v43  ;;  %6191 = vmatprep.mubr.msk.bf16.mxu0 %vm6893_vm1, %v6892_v41  ;;  %v6450_v46 = vld [vmem:[%s8607_s5 + $0x40] sm:$0xff]  }
 0x373   :  { %6201 = vmatprep.subr.bf16.mxu0 %v6892_v41 }
 0x374   :  { %v620_v48 = vsel %vm435_vm7, %v619_v47, %v609_v42  ;;  %vm927_vm7 = vcmask 261120   ;;  %v6451_v47 = vld [vmem:[%s8607_s5 + $0x30] sm:$0xff]  }
 0x375   :  { %v622_v49 = vrot.slane %v620_v48, 3  ;;  %v625_v50 = vrot.slane %v620_v48, 1 }
 0x377   :  { %v624_v51 = vsel %vm7139_vm11, 0.0, %v622_v49  ;;  %v627_v52 = vsel %vm7153_vm14, 0.0, %v625_v50 }
 0x378   :  { %v628_v53 = vpack.c.bf16 %v624_v51, %v624_v51  ;;  %v728_v54 = vpack.c.bf16 %v627_v52, %v627_v52  ;;  %v896_v52 = vld [vmem:[%s8564_s10] sm:$0xf] }
 0x379   :  { %v1288_v29 = vrot.slane %v896_v52, %v7202_v60 }
 0x37a   :  { %6186 = vmatmul.mubr.msk.bf16.vlgmr.msra.gmra.mxu1 %vm455_vm8, %v628_v53  ;;  %6192 = vmatmul.mubr.msk.bf16.vlgmr.msra.gmra.mxu0 %vm455_vm8, %v728_v54 }
 0x37b   :  { %6197 = vmatprep.mubr.msk.bf16.mxu1 %vm6893_vm1, %v6892_v41  ;;  %6203 = vmatprep.mubr.msk.bf16.mxu0 %vm6893_vm1, %v6892_v41 }
 0x37c   :  { %6202 = vmatpush3.bf16.msra.mxu0 %v6441_v18 }
 0x37d   :  { %6215 = vmatprep.subr.bf16.mxu0 %v6892_v41 }
 0x431   :  { %v673_v55 = vpop.f32.mrf.mxu0 }
 0x433   :  { %v6181_v56 = vpop.f32.mrf.mxu0 }
 0x435   :  { %v676_v57 = vpop.f32.mrf.mxu0 }
 0x436   :  { %v1086_v57 = vrot.slane %v896_v52, %v7062_v12 }
 0x437   :  { %v6182_v58 = vpop.f32.mrf.mxu0 }
 0x43a   :  { %v722_v61 = vpop.f32.mrf.mxu1  ;;  %v772_v62 = vpop.f32.mrf.mxu0 }
 0x43b   :  { %v723_v63 = vadd.f32 %v722_v61, %v673_v55 }
 0x43c   :  { %v6187_v1 = vpop.f32.mrf.mxu1  ;;  %v6193_v2 = vpop.f32.mrf.mxu0 }
 0x43d   :  { %v778_v3 = vadd.f32 %v772_v62, %v723_v63  ;;  %v1091_v62 = vrot.slane %v896_v52, %v7065_v13 }
 0x43e   :  { %v725_v5 = vpop.f32.mrf.mxu1  ;;  %v775_v6 = vpop.f32.mrf.mxu0 }
 0x43f   :  { %v783_v7 = vmul.f32 %v782_v0, %v778_v3  ;;  %v6452_v6 = vld [vmem:[%s8607_s5 + $0x58] sm:$0xff]  }
 0x440   :  { %v6188_v8 = vpop.f32.mrf.mxu1  ;;  %v6194_v10 = vpop.f32.mrf.mxu0 }
 0x441   :  { %v788_v11 = vadd.f32 %v787_v4, %v783_v7 }
 0x443   :  { %v789_v14 = vmax.f32 %v788_v11, 0.0 }
 0x445   :  { %v791_v15 = vpack.c.bf16 %v789_v14, %v789_v14 }
 0x447   :  { %v798_v16 = vsel %vm796_vm15, %v791_v15, 0  ;;  %v6453_v15 = vld [vmem:[%s8607_s5 + $0x50] sm:$0xff]  }
 0x448   :  { %6196 = vmatpush3.bf16.msra.mxu1 %v798_v16 }
 0x449   :  { %6207 = vmatprep.subr.bf16.mxu1 %v6892_v41 }
 0x44b   :  { %6198 = vmatmul.mubr.msk.bf16.vlgmr.msra.gmra.mxu1 %vm792_vm0, %v790_v17 }
 0x44c   :  { %6211 = vmatprep.mubr.msk.bf16.mxu1 %vm6893_vm1, %v6892_v41  ;;  %6208 = vmatpush3.bf16.msra.mxu1 %v6442_v19 }
 0x44d   :  { %6209 = vmatprep.subr.bf16.mxu1 %v6892_v41 }
 0x450   :  { %6210 = vmatpush3.bf16.msra.mxu1 %v6444_v26  ;;  %v1283_v26 = vrot.slane %v896_v52, %v7199_v59  ;;  %v6461_v52 = vld [vmem:[%s8567_s13 + $0x10] sm:$0xff]  }
 0x451   :  { %6223 = vmatprep.subr.bf16.mxu1 %v6892_v41 }
 0x50b   :  { %v834_v20 = vpop.f32.mrf.mxu1 }
 0x50c   :  { %v840_v22 = vpack.c.bf16 %v834_v20, %v834_v20 }
 0x50d   :  { %v6199_v23 = vpop.f32.mrf.mxu1 }
 0x50e   :  { %6204 = vmatmul.mubr.msk.bf16.vlgmr.msra.gmra.mxu0 %vm455_vm8, %v840_v22 }
 0x50f   :  { %v837_v24 = vpop.f32.mrf.mxu1  ;;  %6216 = vmatpush3.bf16.msra.mxu0 %v6443_v21  ;;  %6219 = vmatprep.mubr.msk.bf16.mxu0 %vm6893_vm1, %v6892_v41 }
 0x510   :  { %6217 = vmatprep.subr.bf16.mxu0 %v6892_v41 }
 0x511   :  { %v6200_v25 = vpop.f32.mrf.mxu1 }
 0x513   :  { %6218 = vmatpush3.bf16.msra.mxu0 %v6445_v27 }
 0x514   :  { %6231 = vmatprep.subr.bf16.mxu0 %v6892_v41 }
 0x5ce   :  { %v886_v28 = vpop.f32.mrf.mxu0 }
 0x5cf   :  { %v909_v31 = vrot.slane %v886_v28, 7  ;;  %v914_v32 = vpack.c.bf16 %v886_v28, %v886_v28  ;;  %v911_v33 = vrot.slane %v886_v28, 1 }
 0x5d0   :  { %v6205_v34 = vpop.f32.mrf.mxu0 }
 0x5d1   :  { %v910_v36 = vsel %vm7238_vm3, 0.0, %v909_v31  ;;  %6212 = vmatmul.mubr.msk.bf16.vlgmr.msra.gmra.mxu1 %vm927_vm7, %v914_v32  ;;  %v912_v40 = vsel %vm7250_vm10, 0.0, %v911_v33 }
 0x5d2   :  { %v913_v37 = vpack.c.bf16 %v910_v36, %v910_v36  ;;  %v889_v38 = vpop.f32.mrf.mxu0  ;;  %6224 = vmatpush3.bf16.msra.mxu1 %v6446_v30  ;;  %6227 = vmatprep.mubr.msk.bf16.mxu1 %vm6893_vm1, %v6892_v41  ;;  %v1026_v43 = vpack.c.bf16 %v912_v40, %v912_v40  ;;  %v6455_v40 = vld [vmem:[%s8566_s12 + $0x8] sm:$0xff]  }
 0x5d3   :  { %6225 = vmatprep.subr.bf16.mxu1 %v6892_v41 }
 0x5d4   :  { %v6206_v42 = vpop.f32.mrf.mxu0  ;;  %6220 = vmatmul.mubr.msk.bf16.vlgmr.msra.gmra.mxu0 %vm927_vm7, %v913_v37 }
 0x5d5   :  { %6235 = vmatprep.mubr.msk.bf16.mxu0 %vm6893_vm1, %v6892_v41  ;;  %6232 = vmatpush3.bf16.msra.mxu0 %v6448_v44  ;;  %v6456_v42 = vld [vmem:[%s8566_s12] sm:$0xff]   ;;  %v6458_v44 = vld [vmem:[%s8567_s13 + $0x30] sm:$0xff]  }
 0x5d6   :  { %6226 = vmatpush3.bf16.msra.mxu1 %v6447_v39  ;;  %6233 = vmatprep.subr.bf16.mxu0 %v6892_v41  ;;  %v6454_v39 = vld [vmem:[%s8565_s11] sm:$0xff]  }
 0x5d7   :  { %6239 = vmatprep.subr.bf16.mxu1 %v6892_v41 }
 0x5d9   :  { %6228 = vmatmul.mubr.msk.bf16.vlgmr.msra.gmra.mxu1 %vm927_vm7, %v1026_v43  ;;  %6234 = vmatpush3.bf16.msra.mxu0 %v6450_v46  ;;  %v6457_v43 = vld [vmem:[%s8567_s13 + $0x38] sm:$0xff]  }
 0x5da   :  { %6243 = vmatprep.mubr.msk.bf16.mxu1 %vm6893_vm1, %v6892_v41  ;;  %6240 = vmatpush3.bf16.msra.mxu1 %v6449_v45  ;;  %v6460_v45 = vld [vmem:[%s8567_s13 + $0x28] sm:$0xff]  }
 0x5db   :  { %6241 = vmatprep.subr.bf16.mxu1 %v6892_v41  ;;  %6247 = vmatprep.subr.bf16.mxu0 %v6892_v41 }
 0x5de   :  { %6242 = vmatpush3.bf16.msra.mxu1 %v6451_v47 }
 0x5df   :  { %6255 = vmatprep.subr.bf16.mxu1 %v6892_v41 }
 0x691   :  { %v965_v48 = vpop.f32.mrf.mxu1 }
 0x693   :  { %v6213_v49 = vpop.f32.mrf.mxu1 }
 0x694   :  { %v1020_v50 = vpop.f32.mrf.mxu0  ;;  %v6459_v49 = vld [vmem:[%s8567_s13 + $0x18] sm:$0xff]  }
 0x695   :  { %v968_v51 = vpop.f32.mrf.mxu1  ;;  %v1021_v55 = vadd.f32 %v1020_v50, %v965_v48 }
 0x696   :  { %v6221_v53 = vpop.f32.mrf.mxu0 }
 0x697   :  { %v6214_v54 = vpop.f32.mrf.mxu1  ;;  %v6462_v53 = vld [vmem:[%s8567_s13 + $0x20] sm:$0xff]  }
 0x698   :  { %v1023_v56 = vpop.f32.mrf.mxu0  ;;  %v6463_v54 = vld [vmem:[%s8567_s13 + $0x8] sm:$0xff]  }
 0x699   :  { %v1076_v58 = vpop.f32.mrf.mxu1 }
 0x69a   :  { %v1082_v61 = vadd.f32 %v1076_v58, %v1021_v55  ;;  %v6222_v63 = vpop.f32.mrf.mxu0  ;;  %v6465_v55 = vld [vmem:[%s8567_s13] sm:$0xff]  }
 0x69b   :  { %v6229_v0 = vpop.f32.mrf.mxu1 }
 0x69c   :  { %v1087_v1 = vmul.f32 %v1086_v57, %v1082_v61  ;;  %v7368_v57 = vadd.s32 8, %v7053_v9 }
 0x69d   :  { %v1079_v2 = vpop.f32.mrf.mxu1 }
 0x69e   :  { %v1092_v3 = vadd.f32 %v1091_v62, %v1087_v1  ;;  %v6464_v62 = vld [vmem:[%s8567_s13 + $0x58] sm:$0xff]   ;;  %vm1411_vm11 = vcmp.eq.s32.totalorder %v7368_v57, 8  ;;  %vm1415_vm13 = vcmp.eq.s32.totalorder %v7368_v57, 15 }
 0x69f   :  { %v6230_v4 = vpop.f32.mrf.mxu1 }
 0x6a0   :  { %v1093_v5 = vmax.f32 %v1092_v3, 0.0 }
 0x6a2   :  { %v1107_v7 = vrot.slane %v1093_v5, 7  ;;  %v1112_v8 = vpack.c.bf16 %v1093_v5, %v1093_v5  ;;  %v1109_v10 = vrot.slane %v1093_v5, 1 }
 0x6a4   :  { %v1108_v11 = vsel %vm7238_vm3, 0.0, %v1107_v7  ;;  %6236 = vmatmul.mubr.msk.bf16.vlgmr.msra.gmra.mxu0 %vm927_vm7, %v1112_v8  ;;  %v1110_v16 = vsel %vm7250_vm10, 0.0, %v1109_v10  ;;  %v6466_v7 = vld [vmem:[%s8567_s13 + $0x50] sm:$0xff]  }
 0x6a5   :  { %v1111_v14 = vpack.c.bf16 %v1108_v11, %v1108_v11  ;;  %6248 = vmatpush3.bf16.msra.mxu0 %v6452_v6  ;;  %6251 = vmatprep.mubr.msk.bf16.mxu0 %vm6893_vm1, %v6892_v41  ;;  %v1223_v17 = vpack.c.bf16 %v1110_v16, %v1110_v16  ;;  %v6467_v11 = vld [vmem:[%s8567_s13 + $0x48] sm:$0xff]  }
 0x6a6   :  { %6249 = vmatprep.subr.bf16.mxu0 %v6892_v41 }
 0x6a7   :  { %6244 = vmatmul.mubr.msk.bf16.vlgmr.msra.gmra.mxu1 %vm927_vm7, %v1111_v14 }
 0x6a8   :  { %6257 = vmatprep.mubr.msk.bf16.mxu1 %vm6893_vm1, %v6892_v41 }
 0x6a9   :  { %6250 = vmatpush3.bf16.msra.mxu0 %v6453_v15 }
 0x6aa   :  { %6261 = vmatprep.subr.bf16.mxu0 %v6892_v41 }
 0x6ac   :  { %6252 = vmatmul.mubr.msk.bf16.vlgmr.msra.gmra.mxu0 %vm927_vm7, %v1223_v17  ;;  %v6468_v17 = vld [vmem:[%s8567_s13 + $0x40] sm:$0xff]  }
 0x6ad   :  { %6265 = vmatprep.mubr.msk.bf16.mxu0 %vm6893_vm1, %v6892_v41  ;;  %6262 = vmatpush3.bf16.msra.mxu0 %v6455_v40 }
 0x6ae   :  { %6263 = vmatprep.subr.bf16.mxu0 %v6892_v41 }
 0x6b1   :  { %6264 = vmatpush3.bf16.msra.mxu0 %v6456_v42 }
 0x6b2   :  { %6281 = vmatprep.subr.bf16.mxu0 %v6892_v41 }
 0x764   :  { %v1162_v18 = vpop.f32.mrf.mxu0 }
 0x766   :  { %v6237_v19 = vpop.f32.mrf.mxu0 }
 0x767   :  { %v1217_v20 = vpop.f32.mrf.mxu1 }
 0x768   :  { %v1165_v21 = vpop.f32.mrf.mxu0  ;;  %v1218_v24 = vadd.f32 %v1217_v20, %v1162_v18 }
 0x769   :  { %v6245_v22 = vpop.f32.mrf.mxu1  ;;  %v6469_v21 = vld [vmem:[%s8567_s13 + $0x98] sm:$0xff]  }
 0x76a   :  { %v6238_v23 = vpop.f32.mrf.mxu0  ;;  %v6470_v22 = vld [vmem:[%s8567_s13 + $0x90] sm:$0xff]  }
 0x76b   :  { %v1220_v25 = vpop.f32.mrf.mxu1  ;;  %v6471_v23 = vld [vmem:[%s8567_s13 + $0x78] sm:$0xff]  }
 0x76c   :  { %v1273_v27 = vpop.f32.mrf.mxu0  ;;  %v6473_v25 = vld [vmem:[%s8567_s13 + $0x70] sm:$0xff]  }
 0x76d   :  { %v1279_v28 = vadd.f32 %v1273_v27, %v1218_v24  ;;  %v6246_v30 = vpop.f32.mrf.mxu1  ;;  %v6472_v24 = vld [vmem:[%s8567_s13 + $0x88] sm:$0xff]  }
 0x76e   :  { %v6253_v31 = vpop.f32.mrf.mxu0  ;;  %v6475_v27 = vld [vmem:[%s8567_s13 + $0x68] sm:$0xff]  }
 0x76f   :  { %v1284_v32 = vmul.f32 %v1283_v26, %v1279_v28  ;;  %v6474_v26 = vld [vmem:[%s8567_s13 + $0x80] sm:$0xff]  }
 0x770   :  { %v1276_v33 = vpop.f32.mrf.mxu0  ;;  %v6477_v28 = vld [vmem:[%s8567_s13 + $0x60] sm:$0xff]  }
 0x771   :  { %v1289_v34 = vadd.f32 %v1288_v29, %v1284_v32 }
 0x772   :  { %v6254_v35 = vpop.f32.mrf.mxu0 }
 0x773   :  { %v1290_v36 = vmax.f32 %v1289_v34, 0.0 }
 0x775   :  { %v1293_v37 = vpack.c.bf16 %v1290_v36, %v1290_v36 }
 0x777   :  { %v1303_v38 = vsel %vm376_vm5, %v1293_v37, 0  ;;  %vm1445_vm5 = vcmp.lt.s32.totalorder %v7053_v9, 1  ;;  %v7449_v37 = vld [vmem:[%s8568_s14] sm:$0xf] }
 0x778   :  { %6256 = vmatpush3.bf16.msra.mxu1 %v1303_v38 }
 0x779   :  { %6269 = vmatprep.subr.bf16.mxu1 %v6892_v41 }
 0x77b   :  { %6258 = vmatmul.mubr.msk.bf16.vlgmr.msra.gmra.mxu1 %vm372_vm6, %v6454_v39  ;;  %vm1483_vm6 = vcmask 523264   ;;  %v1670_v39 = vrot.slane %v7449_v37, %v7062_v12 }
 0x77c   :  { %6277 = vmatprep.mubr.msk.bf16.mxu1 %vm6893_vm1, %v6892_v41  ;;  %6270 = vmatpush3.bf16.msra.mxu1 %v6457_v43  ;;  %v1676_v43 = vrot.slane %v7449_v37, %v7065_v13 }
 0x77d   :  { %6271 = vmatprep.subr.bf16.mxu1 %v6892_v41 }
 0x780   :  { %6272 = vmatpush3.bf16.msra.mxu1 %v6458_v44 }
 0x781   :  { %6273 = vmatprep.subr.bf16.mxu1 %v6892_v41 }
 0x784   :  { %6274 = vmatpush3.bf16.msra.mxu1 %v6460_v45 }
 0x785   :  { %6275 = vmatprep.subr.bf16.mxu1 %v6892_v41 }
 0x788   :  { %6276 = vmatpush3.bf16.msra.mxu1 %v6462_v53 }
 0x789   :  { %6293 = vmatprep.subr.bf16.mxu1 %v6892_v41 }
 0x83b   :  { %v1339_v46 = vpop.f32.mrf.mxu1 }
 0x83d   :  { %v6259_v47 = vpop.f32.mrf.mxu1 }
 0x83f   :  { %v1342_v48 = vpop.f32.mrf.mxu1 }
 0x840   :  { %v1346_v50 = vpack.c.bf16 %v1342_v48, %v1339_v46 }
 0x841   :  { %v6260_v51 = vpop.f32.mrf.mxu1 }
 0x842   :  { %6266 = vmatmul.mubr.msk.bf16.vlgmr.msra.gmra.mxu0 %vm927_vm7, %v1346_v50 }
 0x843   :  { %6282 = vmatpush3.bf16.msra.mxu0 %v6459_v49  ;;  %6289 = vmatprep.mubr.msk.bf16.mxu0 %vm6893_vm1, %v6892_v41 }
 0x844   :  { %6283 = vmatprep.subr.bf16.mxu0 %v6892_v41 }
 0x847   :  { %6284 = vmatpush3.bf16.msra.mxu0 %v6461_v52 }
 0x848   :  { %6285 = vmatprep.subr.bf16.mxu0 %v6892_v41 }
 0x84b   :  { %6286 = vmatpush3.bf16.msra.mxu0 %v6463_v54 }
 0x84c   :  { %6287 = vmatprep.subr.bf16.mxu0 %v6892_v41 }
 0x84f   :  { %6288 = vmatpush3.bf16.msra.mxu0 %v6465_v55  ;;  %v6476_v55 = vld [vmem:[%s8567_s13 + $0xb8] sm:$0xff]  }
 0x850   :  { %6305 = vmatprep.subr.bf16.mxu0 %v6892_v41 }
 0x902   :  { %v1400_v56 = vpop.f32.mrf.mxu0 }
 0x903   :  { %v1443_v63 = vrot.slane %v1400_v56, 7  ;;  %v1450_v14 = vrot.slane %v1400_v56, 1 }
 0x904   :  { %v6267_v58 = vpop.f32.mrf.mxu0 }
 0x906   :  { %v1403_v61 = vpop.f32.mrf.mxu0 }
 0x907   :  { %v1444_v0 = vrot.slane %v1403_v61, 7  ;;  %v1458_v1 = vpack.c.bf16 %v1403_v61, %v1400_v56  ;;  %v1451_v10 = vrot.slane %v1403_v61, 1 }
 0x908   :  { %v6268_v2 = vpop.f32.mrf.mxu0 }
 0x909   :  { %v1446_v3 = vsel %vm1445_vm5, %v1443_v63, %v1444_v0  ;;  %v1447_v4 = vsel %vm1445_vm5, %v1444_v0, %v1443_v63  ;;  %6278 = vmatmul.mubr.msk.bf16.vlgmr.msra.gmra.mxu1 %vm1483_vm6, %v1458_v1  ;;  %v1453_v15 = vsel %vm1452_vm12, %v1450_v14, %v1451_v10  ;;  %v1454_v16 = vsel %vm1452_vm12, %v1451_v10, %v1450_v14  ;;  %v6478_v2 = vld [vmem:[%s8567_s13 + $0xb0] sm:$0xff]   ;;  %v6480_v10 = vld [vmem:[%s8567_s13 + $0xa0] sm:$0xff]  }
 0x90a   :  { %v1448_v5 = vsel %vm422_vm9, 0.0, %v1447_v4  ;;  %v1449_v6 = vsel %vm1411_vm11, 0.0, %v1446_v3  ;;  %6294 = vmatpush3.bf16.msra.mxu1 %v6464_v62  ;;  %6301 = vmatprep.mubr.msk.bf16.mxu1 %vm6893_vm1, %v6892_v41  ;;  %v1455_v18 = vsel %vm894_vm4, 0.0, %v1453_v15  ;;  %v1456_v19 = vsel %vm1415_vm13, 0.0, %v1454_v16  ;;  %v6481_v16 = vld [vmem:[%s8569_s15] sm:$0xff]  }
 0x90b   :  { %v1457_v8 = vpack.c.bf16 %v1449_v6, %v1448_v5  ;;  %6295 = vmatprep.subr.bf16.mxu1 %v6892_v41  ;;  %v1596_v20 = vpack.c.bf16 %v1456_v19, %v1455_v18  ;;  %v6479_v5 = vld [vmem:[%s8567_s13 + $0xa8] sm:$0xff]  }
 0x90d   :  { %6290 = vmatmul.mubr.msk.bf16.vlgmr.msra.gmra.mxu0 %vm1483_vm6, %v1457_v8 }
 0x90e   :  { %6296 = vmatpush3.bf16.msra.mxu1 %v6466_v7  ;;  %6313 = vmatprep.mubr.msk.bf16.mxu0 %vm6893_vm1, %v6892_v41 }
 0x90f   :  { %6297 = vmatprep.subr.bf16.mxu1 %v6892_v41  ;;  %6306 = vmatpush3.bf16.msra.mxu0 %v6469_v21 }
 0x910   :  { %6307 = vmatprep.subr.bf16.mxu0 %v6892_v41 }
 0x912   :  { %6298 = vmatpush3.bf16.msra.mxu1 %v6467_v11 }
 0x913   :  { %6299 = vmatprep.subr.bf16.mxu1 %v6892_v41  ;;  %6308 = vmatpush3.bf16.msra.mxu0 %v6470_v22 }
 0x914   :  { %6309 = vmatprep.subr.bf16.mxu0 %v6892_v41 }
 0x916   :  { %6300 = vmatpush3.bf16.msra.mxu1 %v6468_v17  ;;  %v6484_v17 = vld [vmem:[%s8570_s16 + $0x10] sm:$0xff]  }
 0x917   :  { %6317 = vmatprep.subr.bf16.mxu1 %v6892_v41  ;;  %6310 = vmatpush3.bf16.msra.mxu0 %v6472_v24 }
 0x918   :  { %6311 = vmatprep.subr.bf16.mxu0 %v6892_v41 }
 0x919   :  { %6302 = vmatmul.mubr.msk.bf16.vlgmr.msra.gmra.mxu1 %vm1483_vm6, %v1596_v20 }
 0x91a   :  { %6325 = vmatprep.mubr.msk.bf16.mxu1 %vm6893_vm1, %v6892_v41  ;;  %6318 = vmatpush3.bf16.msra.mxu1 %v6471_v23 }
 0x91b   :  { %6319 = vmatprep.subr.bf16.mxu1 %v6892_v41  ;;  %6312 = vmatpush3.bf16.msra.mxu0 %v6474_v26 }
 0x91c   :  { %6329 = vmatprep.subr.bf16.mxu0 %v6892_v41 }
 0x91e   :  { %6320 = vmatpush3.bf16.msra.mxu1 %v6473_v25 }
 0x91f   :  { %6321 = vmatprep.subr.bf16.mxu1 %v6892_v41 }
 0x922   :  { %6322 = vmatpush3.bf16.msra.mxu1 %v6475_v27  ;;  %v1930_v27 = vrot.slane %v7449_v37, %v7199_v59 }
 0x923   :  { %6323 = vmatprep.subr.bf16.mxu1 %v6892_v41 }
 0x926   :  { %6324 = vmatpush3.bf16.msra.mxu1 %v6477_v28 }
 0x9c9   :  { %v1521_v29 = vpop.f32.mrf.mxu1 }
 0x9cb   :  { %v6279_v30 = vpop.f32.mrf.mxu1 }
 0x9cd   :  { %v1524_v31 = vpop.f32.mrf.mxu1  ;;  %v1589_v32 = vpop.f32.mrf.mxu0 }
 0x9ce   :  { %v1590_v38 = vadd.f32 %v1589_v32, %v1521_v29 }
 0x9cf   :  { %v6280_v33 = vpop.f32.mrf.mxu1  ;;  %v6291_v34 = vpop.f32.mrf.mxu0 }
 0x9d0   :  { %v1936_v33 = vrot.slane %v7449_v37, %v7202_v60  ;;  %v6485_v37 = vld [vmem:[%s8570_s16 + $0x8] sm:$0xff]  }
 0x9d1   :  { %v1592_v35 = vpop.f32.mrf.mxu0 }
 0x9d2   :  { %v1593_v45 = vadd.f32 %v1592_v35, %v1524_v31 }
 0x9d3   :  { %v6292_v36 = vpop.f32.mrf.mxu0 }
 0x9d9   :  { %v1658_v40 = vpop.f32.mrf.mxu1 }
 0x9da   :  { %v1665_v42 = vadd.f32 %v1658_v40, %v1590_v38 }
 0x9db   :  { %v6303_v44 = vpop.f32.mrf.mxu1 }
 0x9dc   :  { %v1671_v46 = vmul.f32 %v1670_v39, %v1665_v42 }
 0x9dd   :  { %v1661_v47 = vpop.f32.mrf.mxu1 }
 0x9de   :  { %v1677_v48 = vadd.f32 %v1676_v43, %v1671_v46  ;;  %v1666_v49 = vadd.f32 %v1661_v47, %v1593_v45  ;;  %v6482_v45 = vld [vmem:[%s8569_s15 + $0x8] sm:$0xff]   ;;  %v6486_v46 = vld [vmem:[%s8570_s16] sm:$0xff]   ;;  %v6487_v47 = vld [vmem:[%s8571_s17 + $0x78] sm:$0xff]  }
 0x9df   :  { %v6304_v50 = vpop.f32.mrf.mxu1 }
 0x9e0   :  { %v1672_v51 = vmul.f32 %v1670_v39, %v1666_v49  ;;  %v1679_v52 = vmax.f32 %v1677_v48, 0.0  ;;  %v6488_v48 = vld [vmem:[%s8571_s17 + $0x38] sm:$0xff]   ;;  %v6490_v50 = vld [vmem:[%s8571_s17 + $0x70] sm:$0xff]  }
 0x9e1   :  { %v6489_v49 = vld [vmem:[%s8571_s17 + $0xb8] sm:$0xff]  }
 0x9e2   :  { %v1678_v53 = vadd.f32 %v1676_v43, %v1672_v51  ;;  %v1706_v56 = vrot.slane %v1679_v52, 7  ;;  %v1712_v6 = vrot.slane %v1679_v52, 1  ;;  %v6491_v51 = vld [vmem:[%s8571_s17 + $0x30] sm:$0xff]  }
 0x9e4   :  { %v1680_v54 = vmax.f32 %v1678_v53, 0.0  ;;  %v6494_v53 = vld [vmem:[%s8571_s17 + $0x28] sm:$0xff]  }
 0x9e6   :  { %v1707_v58 = vrot.slane %v1680_v54, 7  ;;  %v1719_v61 = vpack.c.bf16 %v1680_v54, %v1679_v52  ;;  %v1713_v4 = vrot.slane %v1680_v54, 1  ;;  %v6493_v52 = vld [vmem:[%s8571_s17 + $0x68] sm:$0xff]   ;;  %v6496_v54 = vld [vmem:[%s8571_s17 + $0x60] sm:$0xff]  }
 0x9e8   :  { %6314 = vmatmul.mubr.msk.bf16.vlgmr.msra.gmra.mxu0 %vm1483_vm6, %v1719_v61  ;;  %v1708_v62 = vsel %vm1445_vm5, %v1706_v56, %v1707_v58  ;;  %v1709_v63 = vsel %vm1445_vm5, %v1707_v58, %v1706_v56  ;;  %v1714_v7 = vsel %vm1452_vm12, %v1712_v6, %v1713_v4  ;;  %v1715_v8 = vsel %vm1452_vm12, %v1713_v4, %v1712_v6  ;;  %v6499_v56 = vld [vmem:[%s8571_s17 + $0x58] sm:$0xff]   ;;  %v6495_v4 = vld [vmem:[%s8571_s17 + $0xa8] sm:$0xff]  }
 0x9e9   :  { %6330 = vmatpush3.bf16.msra.mxu0 %v6476_v55  ;;  %v1710_v0 = vsel %vm422_vm9, 0.0, %v1709_v63  ;;  %v1711_v1 = vsel %vm1411_vm11, 0.0, %v1708_v62  ;;  %6337 = vmatprep.mubr.msk.bf16.mxu0 %vm6893_vm1, %v6892_v41  ;;  %v1716_v11 = vsel %vm894_vm4, 0.0, %v1714_v7  ;;  %v1717_v14 = vsel %vm1415_vm13, 0.0, %v1715_v8  ;;  %v6497_v55 = vld [vmem:[%s8571_s17 + $0x20] sm:$0xff]   ;;  %v6500_v58 = vld [vmem:[%s8571_s17 + $0x18] sm:$0xff]   ;;  %vm5516_vm1 = vmneg %vm422_vm9 }
 0x9ea   :  { %6331 = vmatprep.subr.bf16.mxu0 %v6892_v41  ;;  %v1718_v3 = vpack.c.bf16 %v1711_v1, %v1710_v0  ;;  %v1856_v15 = vpack.c.bf16 %v1717_v14, %v1716_v11  ;;  %v6501_v6 = vld [vmem:[%s8571_s17 + $0x98] sm:$0xff]   ;;  %v6502_v7 = vld [vmem:[%s8571_s17 + $0x50] sm:$0xff]   ;;  %v6505_v11 = vld [vmem:[%s8571_s17 + $0x48] sm:$0xff]   ;;  %vm6894_vm9 = vmmov 1  }
 0x9eb   :  { %v6503_v8 = vld [vmem:[%s8571_s17 + $0x10] sm:$0xff]   ;;  %v6506_v14 = vld [vmem:[%s8571_s17 + $0x8] sm:$0xff]   ;;  %vm7609_vm15 = vmpackc.low %vm6894_vm9, %vm5516_vm1 }
 0x9ec   :  { %6326 = vmatmul.mubr.msk.bf16.vlgmr.msra.gmra.mxu1 %vm1483_vm6, %v1718_v3  ;;  %v6492_v3 = vld [vmem:[%s8571_s17 + $0xb0] sm:$0xff]  }
 0x9ed   :  { %6332 = vmatpush3.bf16.msra.mxu0 %v6478_v2  ;;  %6343 = vmatprep.mubr.msk.bf16.mxu1 %vm455_vm8, %v6481_v16  ;;  %v6508_v16 = vld [vmem:[%s8571_s17 + $0x40] sm:$0xff]  }
 0x9ee   :  { %6333 = vmatprep.subr.bf16.mxu0 %v6892_v41 }
 0x9f1   :  { %6334 = vmatpush3.bf16.msra.mxu0 %v6479_v5  ;;  %v6498_v5 = vld [vmem:[%s8571_s17 + $0xa0] sm:$0xff]  }
 0x9f2   :  { %6335 = vmatprep.subr.bf16.mxu0 %v6892_v41  ;;  %v6483_v41 = vld [vmem:[%s8570_s16 + $0x18] sm:$0xff]  }
 0x9f5   :  { %6336 = vmatpush3.bf16.msra.mxu0 %v6480_v10  ;;  %v6504_v10 = vld [vmem:[%s8571_s17 + $0x90] sm:$0xff]  }
 0x9f6   :  { %6347 = vmatprep.subr.bf16.mxu0 %v6483_v41 }
 0x9f8   :  { %6338 = vmatmul.mubr.msk.bf16.vlgmr.msra.gmra.mxu0 %vm1483_vm6, %v1856_v15  ;;  %v6507_v15 = vld [vmem:[%s8571_s17 + $0x88] sm:$0xff]  }
 0x9f9   :  { %6348 = vmatpush3.bf16.msra.mxu0 %v6483_v41  ;;  %v6509_v41 = vld [vmem:[%s8571_s17] sm:$0xff]  }
 0x9fa   :  { %6349 = vmatprep.subr.bf16.mxu0 %v6484_v17 }
 0x9fd   :  { %6350 = vmatpush3.bf16.msra.mxu0 %v6484_v17  ;;  %v6510_v17 = vld [vmem:[%s8571_s17 + $0x80] sm:$0xff]  }
 0x9fe   :  { %6351 = vmatprep.subr.bf16.mxu0 %v6485_v37 }
 0xa01   :  { %6352 = vmatpush3.bf16.msra.mxu0 %v6485_v37  ;;  %v2100_v37 = vadd.s32 16, %v7053_v9 }
 0xa02   :  { %6353 = vmatprep.subr.bf16.mxu0 %v6486_v46 }
 0xa03   :  { %vm5917_vm3 = vcmp.ne.s32.totalorder %v2100_v37, 16 }
 0xa04   :  { %vm7649_vm4 = vmpackc.low %vm6894_vm9, %vm5917_vm3 }
 0xa05   :  { %6354 = vmatpush3.bf16.msra.mxu0 %v6486_v46  ;;  %v6513_v46 = vld [vmem:[%s8571_s17 + $0xf8] sm:$0xff]  }
 0xa06   :  { %6359 = vmatprep.subr.bf16.mxu0 %v6489_v49 }
 0xaa8   :  { %v1781_v18 = vpop.f32.mrf.mxu0 }
 0xaaa   :  { %v6315_v19 = vpop.f32.mrf.mxu0 }
 0xaab   :  { %v6512_v19 = vld [vmem:[%s8571_s17 + $0x178] sm:$0xff]  }
 0xaac   :  { %v1784_v20 = vpop.f32.mrf.mxu0  ;;  %v1849_v21 = vpop.f32.mrf.mxu1 }
 0xaad   :  { %v1850_v26 = vadd.f32 %v1849_v21, %v1781_v18  ;;  %v6511_v18 = vld [vmem:[%s8571_s17 + $0x138] sm:$0xff]  }
 0xaae   :  { %v6316_v22 = vpop.f32.mrf.mxu0  ;;  %v6327_v23 = vpop.f32.mrf.mxu1 }
 0xaaf   :  { %v2101_v22 = vadd.s32 24, %v7053_v9 }
 0xab0   :  { %v1852_v24 = vpop.f32.mrf.mxu1 }
 0xab1   :  { %v1853_v31 = vadd.f32 %v1852_v24, %v1784_v20  ;;  %vm5918_vm14 = vcmp.ne.s32.totalorder %v2101_v22, 31 }
 0xab2   :  { %v6328_v25 = vpop.f32.mrf.mxu1  ;;  %vm7630_vm2 = vmpackc.low %vm5918_vm14, %vm6894_vm9 }
 0xab8   :  { %v1918_v28 = vpop.f32.mrf.mxu0 }
 0xab9   :  { %v1925_v29 = vadd.f32 %v1918_v28, %v1850_v26 }
 0xaba   :  { %v6339_v30 = vpop.f32.mrf.mxu0 }
 0xabb   :  { %v1931_v32 = vmul.f32 %v1930_v27, %v1925_v29 }
 0xabc   :  { %v1921_v34 = vpop.f32.mrf.mxu0 }
 0xabd   :  { %v1926_v35 = vadd.f32 %v1921_v34, %v1853_v31  ;;  %v1937_v38 = vadd.f32 %v1936_v33, %v1931_v32 }
 0xabe   :  { %v6340_v36 = vpop.f32.mrf.mxu0 }
 0xabf   :  { %v1932_v39 = vmul.f32 %v1930_v27, %v1926_v35  ;;  %v1939_v42 = vmax.f32 %v1937_v38, 0.0 }
 0xac1   :  { %v1938_v40 = vadd.f32 %v1936_v33, %v1932_v39 }
 0xac3   :  { %v1940_v43 = vmax.f32 %v1938_v40, 0.0 }
 0xac5   :  { %v1945_v44 = vpack.c.bf16 %v1940_v43, %v1939_v42 }
 0xac7   :  { %6341 = vmatprep.subr.bf16.mxu1 %v1945_v44 }
 0xac8   :  { %6342 = vmatpush3.bf16.msra.mxu1 %v1945_v44 }
 0xac9   :  { %6025 = vmatprep.subr.bf16.mxu1 %v6487_v47 }
 0xacb   :  { %6344 = vmatmul.mubr.msk.bf16.vlgmr.msra.gmra.mxu1 %vm455_vm8, %v6482_v45  ;;  %vm7600_vm8 = vmneg %vm1415_vm13  ;;  %v6851_v45 = vld [vmem:[%s8577_s23 + $0x78] sm:$0xff]  }
 0xacc   :  { %6026 = vmatpush3.bf16.msra.mxu1 %v6488_v48  ;;  %vm7624_vm0 = vmpackc.low %vm7600_vm8, %vm6894_vm9 }
 0xacd   :  { %6027 = vmatprep.subr.bf16.mxu1 %v6490_v50 }
 0xad0   :  { %6028 = vmatpush3.bf16.msra.mxu1 %v6491_v51 }
 0xad1   :  { %6029 = vmatprep.subr.bf16.mxu1 %v6493_v52  ;;  %v6542_v52 = vld [vmem:[%s8574_s20 + $0x60] ss:$8 sps:$4 sm:$0xff]  }
 0xad4   :  { %6030 = vmatpush3.bf16.msra.mxu1 %v6494_v53 }
 0xad5   :  { %6031 = vmatprep.subr.bf16.mxu1 %v6496_v54  ;;  %v6514_v54 = vld [vmem:[%s8571_s17 + $0x130] sm:$0xff]  }
 0xad8   :  { %6032 = vmatpush3.bf16.msra.mxu1 %v6497_v55  ;;  %v6515_v55 = vld [vmem:[%s8571_s17 + $0x170] sm:$0xff]  }
 0xad9   :  { %6033 = vmatprep.subr.bf16.mxu1 %v6499_v56  ;;  %v6516_v56 = vld [vmem:[%s8571_s17 + $0xf0] sm:$0xff]  }
 0xadc   :  { %6034 = vmatpush3.bf16.msra.mxu1 %v6500_v58  ;;  %v6517_v58 = vld [vmem:[%s8571_s17 + $0x128] sm:$0xff]  }
 0xadd   :  { %6035 = vmatprep.subr.bf16.mxu1 %v6502_v7  ;;  %v6528_v7 = vld [vmem:[%s8571_s17 + $0xd0] sm:$0xff]  }
 0xae0   :  { %6036 = vmatpush3.bf16.msra.mxu1 %v6503_v8  ;;  %v6529_v8 = vld [vmem:[%s8571_s17 + $0x108] sm:$0xff]  }
 0xae1   :  { %6037 = vmatprep.subr.bf16.mxu1 %v6505_v11  ;;  %v6531_v11 = vld [vmem:[%s8571_s17 + $0xc8] sm:$0xff]  }
 0xae4   :  { %6038 = vmatpush3.bf16.msra.mxu1 %v6506_v14  ;;  %v6532_v14 = vld [vmem:[%s8571_s17 + $0x100] sm:$0xff]  }
 0xae5   :  { %6039 = vmatprep.subr.bf16.mxu1 %v6508_v16  ;;  %v6534_v16 = vld [vmem:[%s8571_s17 + $0xc0] sm:$0xff]  }
 0xae8   :  { %6040 = vmatpush3.bf16.msra.mxu1 %v6509_v41 }
 0xae9   :  { %6063 = vmatprep.subr.bf16.mxu1 %v6511_v18  ;;  %v7721_v18 = vld [vmem:[%s8572_s18] sm:$0xf] }
 0xaea   :  { %v2446_v22 = vrot.slane %v7721_v18, %v7062_v12 }
 0xb8b   :  { %v6345_v61 = vpop.f32.mrf.mxu1 }
 0xb8d   :  { %v1996_v62 = vpop.f32.mrf.mxu1 }
 0xb8f   :  { %v6346_v63 = vpop.f32.mrf.mxu1 }
 0xb90   :  { %v2012_v2 = vpack.c.bf16 %v6346_v63, %v6345_v61  ;;  %v6518_v61 = vld [vmem:[%s8571_s17 + $0x168] sm:$0xff]   ;;  %v6520_v63 = vld [vmem:[%s8571_s17 + $0x120] sm:$0xff]  }
 0xb91   :  { %v1999_v0 = vpop.f32.mrf.mxu1 }
 0xb92   :  { %v2011_v1 = vpack.c.bf16 %v1999_v0, %v1996_v62  ;;  %v6519_v62 = vld [vmem:[%s8571_s17 + $0xe8] sm:$0xff]   ;;  %v6521_v0 = vld [vmem:[%s8571_s17 + $0x160] sm:$0xff]  }
 0xb94   :  { %6355 = vmatprep.mubr.msk.bf16.mxu0 %vm1483_vm6, %v2011_v1  ;;  %v6522_v1 = vld [vmem:[%s8571_s17 + $0xe0] sm:$0xff]  }
 0xb95   :  { %6356 = vmatmul.mubr.msk.bf16.vlgmr.msra.gmra.mxu0 %vm1483_vm6, %v2012_v2  ;;  %v6523_v2 = vld [vmem:[%s8571_s17 + $0x118] sm:$0xff]  }
 0xb96   :  { %6360 = vmatpush3.bf16.msra.mxu0 %v6489_v49 }
 0xb97   :  { %6361 = vmatprep.subr.bf16.mxu0 %v6492_v3 }
 0xb9a   :  { %6362 = vmatpush3.bf16.msra.mxu0 %v6492_v3  ;;  %v6524_v3 = vld [vmem:[%s8571_s17 + $0x158] sm:$0xff]  }
 0xb9b   :  { %6363 = vmatprep.subr.bf16.mxu0 %v6495_v4 }
 0xb9e   :  { %6364 = vmatpush3.bf16.msra.mxu0 %v6495_v4  ;;  %v6525_v4 = vld [vmem:[%s8571_s17 + $0xd8] sm:$0xff]  }
 0xb9f   :  { %6365 = vmatprep.subr.bf16.mxu0 %v6498_v5 }
 0xba2   :  { %6366 = vmatpush3.bf16.msra.mxu0 %v6498_v5  ;;  %v6526_v5 = vld [vmem:[%s8571_s17 + $0x110] sm:$0xff]  }
 0xba3   :  { %6367 = vmatprep.subr.bf16.mxu0 %v6501_v6 }
 0xba6   :  { %6368 = vmatpush3.bf16.msra.mxu0 %v6501_v6  ;;  %v6527_v6 = vld [vmem:[%s8571_s17 + $0x150] sm:$0xff]  }
 0xba7   :  { %6369 = vmatprep.subr.bf16.mxu0 %v6504_v10 }
 0xbaa   :  { %6370 = vmatpush3.bf16.msra.mxu0 %v6504_v10  ;;  %v6530_v10 = vld [vmem:[%s8571_s17 + $0x148] sm:$0xff]  }
 0xbab   :  { %6371 = vmatprep.subr.bf16.mxu0 %v6507_v15 }
 0xbae   :  { %6372 = vmatpush3.bf16.msra.mxu0 %v6507_v15  ;;  %v6533_v15 = vld [vmem:[%s8571_s17 + $0x140] sm:$0xff]  }
 0xbaf   :  { %6373 = vmatprep.subr.bf16.mxu0 %v6510_v17 }
 0xbb2   :  { %6374 = vmatpush3.bf16.msra.mxu0 %v6510_v17 }
 0xbb3   :  { %6379 = vmatprep.subr.bf16.mxu0 %v6512_v19 }
 0xc55   :  { %v6357_v20 = vpop.f32.mrf.mxu0 }
 0xc56   :  { %v2185_v27 = vrot.slane %v6357_v20, 1  ;;  %v2173_v49 = vrot.slane %v6357_v20, 7 }
 0xc57   :  { %v2085_v21 = vpop.f32.mrf.mxu0 }
 0xc58   :  { %v2183_v28 = vrot.slane %v2085_v21, 1  ;;  %v2171_v30 = vrot.slane %v2085_v21, 7 }
 0xc59   :  { %v6358_v23 = vpop.f32.mrf.mxu0 }
 0xc5a   :  { %v2186_v24 = vrot.slane %v6358_v23, 1  ;;  %v2174_v25 = vrot.slane %v6358_v23, 7  ;;  %v2199_v47 = vpack.c.bf16 %v6358_v23, %v6357_v20 }
 0xc5b   :  { %v2088_v26 = vpop.f32.mrf.mxu0 }
 0xc5c   :  { %v2172_v31 = vrot.slane %v2088_v26, 7  ;;  %v2184_v32 = vrot.slane %v2088_v26, 1  ;;  %v2196_v33 = vpack.c.bf16 %v2088_v26, %v2085_v21  ;;  %v2187_v34 = vsel %vm1452_vm12, %v2185_v27, %v2186_v24 }
 0xc5d   :  { %v2190_v35 = vsel %vm1452_vm12, %v2186_v24, %v2183_v28  ;;  %v2178_v57 = vsel %vm1445_vm5, %v2174_v25, %v2171_v30  ;;  %v2175_v51 = vsel %vm1445_vm5, %v2173_v49, %v2174_v25 }
 0xc5e   :  { %v2177_v38 = vsel %vm1445_vm5, %v2171_v30, %v2172_v31  ;;  %v2188_v39 = vsel %vm1452_vm12, %v2184_v32, %v2185_v27  ;;  %v2189_v40 = vsel %vm1452_vm12, %v2183_v28, %v2184_v32  ;;  %2377 = vmatprep.mubr.bf16.mxu1 %v2196_v33  ;;  %v5530_v48 = vpack.c.bf16 %v2190_v35, %v2187_v34 }
 0xc5f   :  { %v5518_v43 = vpack.c.bf16 %v2177_v38, %v2178_v57  ;;  %v5526_v44 = vpack.c.bf16 %v2188_v39, %v2189_v40  ;;  %v2176_v50 = vsel %vm1445_vm5, %v2172_v31, %v2173_v49  ;;  %v2454_v30 = vrot.slane %v7721_v18, %v7065_v13 }
 0xc60   :  { %v5522_v53 = vpack.c.bf16 %v2175_v51, %v2176_v50 }
 0xc61   :  { %5519 = vmatmul.mubr.msk.bf16.vlgmr.msra.gmra.mxu1 %vm7609_vm15, %v5518_v43  ;;  %6375 = vmatprep.mubr.msk.bf16.mxu0 %vm7624_vm0, %v5526_v44 }
 0xc62   :  { %2385 = vmatprep.mubr.bf16.mxu1 %v2199_v47  ;;  %6376 = vmatmul.mubr.msk.bf16.vlgmr.msra.gmra.mxu0 %vm7630_vm2, %v5530_v48 }
 0xc63   :  { %6064 = vmatpush3.bf16.msra.mxu1 %v6513_v46  ;;  %6380 = vmatpush3.bf16.msra.mxu0 %v6512_v19 }
 0xc64   :  { %6065 = vmatprep.subr.bf16.mxu1 %v6514_v54  ;;  %6381 = vmatprep.subr.bf16.mxu0 %v6515_v55 }
 0xc67   :  { %6066 = vmatpush3.bf16.msra.mxu1 %v6516_v56  ;;  %6382 = vmatpush3.bf16.msra.mxu0 %v6515_v55 }
 0xc68   :  { %6067 = vmatprep.subr.bf16.mxu1 %v6517_v58  ;;  %6383 = vmatprep.subr.bf16.mxu0 %v6518_v61 }
 0xc69   :  { %5523 = vmatmul.mubr.msk.bf16.gmra.mxu1 %vm7649_vm4, %v5522_v53 }
 0xc6b   :  { %6068 = vmatpush3.bf16.msra.mxu1 %v6519_v62  ;;  %6384 = vmatpush3.bf16.msra.mxu0 %v6518_v61 }
 0xc6c   :  { %6069 = vmatprep.subr.bf16.mxu1 %v6520_v63  ;;  %6385 = vmatprep.subr.bf16.mxu0 %v6521_v0 }
 0xc6f   :  { %6070 = vmatpush3.bf16.msra.mxu1 %v6522_v1  ;;  %6386 = vmatpush3.bf16.msra.mxu0 %v6521_v0 }
 0xc70   :  { %6071 = vmatprep.subr.bf16.mxu1 %v6523_v2  ;;  %6387 = vmatprep.subr.bf16.mxu0 %v6524_v3 }
 0xc73   :  { %6072 = vmatpush3.bf16.msra.mxu1 %v6525_v4  ;;  %6388 = vmatpush3.bf16.msra.mxu0 %v6524_v3 }
 0xc74   :  { %6073 = vmatprep.subr.bf16.mxu1 %v6526_v5  ;;  %6389 = vmatprep.subr.bf16.mxu0 %v6527_v6 }
 0xc77   :  { %6074 = vmatpush3.bf16.msra.mxu1 %v6528_v7  ;;  %6390 = vmatpush3.bf16.msra.mxu0 %v6527_v6 }
 0xc78   :  { %6075 = vmatprep.subr.bf16.mxu1 %v6529_v8  ;;  %6391 = vmatprep.subr.bf16.mxu0 %v6530_v10 }
 0xc7b   :  { %6076 = vmatpush3.bf16.msra.mxu1 %v6531_v11  ;;  %6392 = vmatpush3.bf16.msra.mxu0 %v6530_v10 }
 0xc7c   :  { %6077 = vmatprep.subr.bf16.mxu1 %v6532_v14  ;;  %6393 = vmatprep.subr.bf16.mxu0 %v6533_v15 }
 0xc7f   :  { %6078 = vmatpush3.bf16.msra.mxu1 %v6534_v16  ;;  %6394 = vmatpush3.bf16.msra.mxu0 %v6533_v15 }
 0xd21   :  { %v6041_v41 = vpop.f32.mrf.mxu1 }
 0xd22   :  { %v6377_v17 = vpop.f32.mrf.mxu0 }
 0xd23   :  { %v6042_v19 = vpop.f32.mrf.mxu1 }
 0xd24   :  { %v6043_v20 = vadd.f32 %v6042_v19, %v6041_v41  ;;  %v2428_v21 = vpop.f32.mrf.mxu0  ;;  %v6539_v19 = vld [vmem:[%s8574_s20 + $0x70] ss:$8 sps:$4 sm:$0xff]  }
 0xd25   :  { %v6044_v23 = vpop.f32.mrf.mxu1 }
 0xd26   :  { %v2429_v24 = vadd.f32 %v6043_v20, %v2428_v21  ;;  %v6378_v25 = vpop.f32.mrf.mxu0  ;;  %v6541_v20 = vld [vmem:[%s8574_s20 + $0x74] ss:$8 sps:$4 sm:$0xff]   ;;  %v6544_v21 = vld [vmem:[%s8574_s20 + $0x64] ss:$8 sps:$4 sm:$0xff]  }
 0xd27   :  { %v6045_v26 = vpop.f32.mrf.mxu1  ;;  %3011 = vmatprep.subr.bf16.mxu0 %v6541_v20  ;;  %v6586_v20 = vld [vmem:[#allocation3 + $0x74] ss:$8 sps:$4 sm:$0xff]  }
 0xd28   :  { %v6046_v27 = vadd.f32 %v6045_v26, %v6044_v23  ;;  %v2431_v28 = vpop.f32.mrf.mxu0  ;;  %v2447_v29 = vmul.f32 %v2446_v22, %v2429_v24  ;;  %v6545_v23 = vld [vmem:[%s8574_s20 + $0x50] ss:$8 sps:$4 sm:$0xff]   ;;  %v6550_v24 = vld [vmem:[%s8574_s20 + $0x44] ss:$8 sps:$4 sm:$0xff]   ;;  %v6553_v26 = vld [vmem:[%s8574_s20 + $0x34] ss:$8 sps:$4 sm:$0xff]  }
 0xd29   :  { %v6047_v31 = vpop.f32.mrf.mxu1 }
 0xd2a   :  { %v2432_v32 = vadd.f32 %v6046_v27, %v2431_v28  ;;  %v2455_v57 = vadd.f32 %v2454_v30, %v2447_v29  ;;  %v6551_v27 = vld [vmem:[%s8574_s20 + $0x30] ss:$8 sps:$4 sm:$0xff]   ;;  %v6556_v28 = vld [vmem:[%s8574_s20 + $0x24] ss:$8 sps:$4 sm:$0xff]   ;;  %v6554_v29 = vld [vmem:[%s8574_s20 + $0x20] ss:$8 sps:$4 sm:$0xff]  }
 0xd2b   :  { %v6048_v33 = vpop.f32.mrf.mxu1 }
 0xd2c   :  { %v2448_v34 = vmul.f32 %v2446_v22, %v2432_v32  ;;  %v6049_v35 = vadd.f32 %v6048_v33, %v6047_v31  ;;  %v2459_v47 = vmax.f32 %v2455_v57, 0.0 }
 0xd2d   :  { %v6050_v38 = vpop.f32.mrf.mxu1 }
 0xd2e   :  { %v2456_v39 = vadd.f32 %v2454_v30, %v2448_v34  ;;  %v2437_v40 = vadd.f32 %v6377_v17, %v6049_v35  ;;  %v2524_v55 = vrot.slane %v2459_v47, 1  ;;  %v2512_v2 = vrot.slane %v2459_v47, 7  ;;  %v6535_v17 = vld [vmem:[%s8573_s19] sm:$0xff]  }
 0xd2f   :  { %v6051_v43 = vpop.f32.mrf.mxu1 }
 0xd30   :  { %v2460_v44 = vmax.f32 %v2456_v39, 0.0  ;;  %v2449_v37 = vmul.f32 %v2446_v22, %v2437_v40  ;;  %v6052_v46 = vadd.f32 %v6051_v43, %v6050_v38 }
 0xd32   :  { %v2457_v48 = vadd.f32 %v2454_v30, %v2449_v37  ;;  %v2440_v49 = vadd.f32 %v6378_v25, %v6052_v46  ;;  %v2537_v50 = vpack.c.bf16 %v2460_v44, %v2459_v47  ;;  %v2525_v51 = vrot.slane %v2460_v44, 1  ;;  %v6548_v25 = vld [vmem:[%s8574_s20 + $0x40] ss:$8 sps:$4 sm:$0xff]  }
 0xd33   :  { %v2513_v61 = vrot.slane %v2460_v44, 7 }
 0xd34   :  { %v2461_v53 = vmax.f32 %v2457_v48, 0.0  ;;  %v2450_v54 = vmul.f32 %v2446_v22, %v2440_v49  ;;  %2718 = vmatprep.mubr.bf16.mxu1 %v2537_v50  ;;  %v2530_v0 = vsel %vm1452_vm12, %v2524_v55, %v2525_v51  ;;  %v6547_v22 = vld [vmem:[%s8574_s20 + $0x54] ss:$8 sps:$4 sm:$0xff]   ;;  %v2787_v49 = vrot.slane %v7721_v18, %v7199_v59 }
 0xd35   :  { %v2518_v5 = vsel %vm1445_vm5, %v2512_v2, %v2513_v61 }
 0xd36   :  { %v2526_v56 = vrot.slane %v2461_v53, 1  ;;  %v2458_v58 = vadd.f32 %v2454_v30, %v2450_v54  ;;  %v2514_v42 = vrot.slane %v2461_v53, 7 }
 0xd38   :  { %v2462_v62 = vmax.f32 %v2458_v58, 0.0  ;;  %v2529_v63 = vsel %vm1452_vm12, %v2525_v51, %v2526_v56  ;;  %v2517_v16 = vsel %vm1445_vm5, %v2513_v61, %v2514_v42  ;;  %v2795_v58 = vrot.slane %v7721_v18, %v7202_v60  ;;  %v6537_v18 = vld [vmem:[%s8573_s19 + $0x10] sm:$0xff]  }
 0xd39   :  { %v5614_v1 = vpack.c.bf16 %v2529_v63, %v2530_v0 }
 0xd3a   :  { %v2515_v3 = vrot.slane %v2462_v62, 7  ;;  %v2527_v4 = vrot.slane %v2462_v62, 1  ;;  %v2540_v14 = vpack.c.bf16 %v2462_v62, %v2461_v53 }
 0xd3b   :  { %6395 = vmatprep.mubr.msk.bf16.mxu0 %vm7624_vm0, %v5614_v1 }
 0xd3c   :  { %v2519_v6 = vsel %vm1445_vm5, %v2515_v3, %v2512_v2  ;;  %v2528_v7 = vsel %vm1452_vm12, %v2526_v56, %v2527_v4  ;;  %v2531_v8 = vsel %vm1452_vm12, %v2527_v4, %v2524_v55  ;;  %v2516_v15 = vsel %vm1445_vm5, %v2514_v42, %v2515_v3  ;;  %v6559_v42 = vld [vmem:[%s8574_s20 + $0x14] ss:$8 sps:$4 sm:$0xff]  }
 0xd3d   :  { %v5606_v10 = vpack.c.bf16 %v2518_v5, %v2519_v6  ;;  %v5618_v11 = vpack.c.bf16 %v2531_v8, %v2528_v7  ;;  %v5610_v41 = vpack.c.bf16 %v2516_v15, %v2517_v16  ;;  %v6562_v15 = vld [vmem:[%s8574_s20 + $0x4] ss:$8 sps:$4 sm:$0xff]   ;;  %v6560_v16 = vld [vmem:[%s8574_s20] ss:$8 sps:$4 sm:$0xff]  }
 0xd3f   :  { %5607 = vmatmul.mubr.msk.bf16.vlgmr.msra.gmra.mxu1 %vm7609_vm15, %v5606_v10  ;;  %6396 = vmatmul.mubr.msk.bf16.vlgmr.msra.gmra.mxu0 %vm7630_vm2, %v5618_v11  ;;  %v6536_v10 = vld [vmem:[%s8573_s19 + $0x8] sm:$0xff]   ;;  %v6538_v11 = vld [vmem:[%s8573_s19 + $0x18] sm:$0xff]  }
 0xd40   :  { %2726 = vmatprep.mubr.bf16.mxu1 %v2540_v14  ;;  %3012 = vmatpush1.bf16.msra.mxu0 %v6539_v19  ;;  %v6557_v14 = vld [vmem:[%s8574_s20 + $0x10] ss:$8 sps:$4 sm:$0xff]  }
 0xd41   :  { %3013 = vmatprep.subr.bf16.mxu0 %v6544_v21  ;;  %v6584_v19 = vld [vmem:[#allocation3 + $0x70] ss:$8 sps:$4 sm:$0xff]   ;;  %v6592_v21 = vld [vmem:[#allocation3 + $0x64] ss:$8 sps:$4 sm:$0xff]  }
 0xd44   :  { %3014 = vmatpush1.bf16.msra.mxu0 %v6542_v52  ;;  %v6590_v52 = vld [vmem:[#allocation3 + $0x60] ss:$8 sps:$4 sm:$0xff]  }
 0xd45   :  { %3015 = vmatprep.subr.bf16.mxu0 %v6547_v22  ;;  %v6598_v22 = vld [vmem:[#allocation3 + $0x54] ss:$8 sps:$4 sm:$0xff]  }
 0xd47   :  { %5611 = vmatmul.mubr.msk.bf16.gmra.mxu1 %vm7649_vm4, %v5610_v41  ;;  %v6895_v41 = vmov 0  }
 0xd48   :  { %6403 = vmatprep.mubr.msk.bf16.mxu1 %vm927_vm7, %v6535_v17  ;;  %3016 = vmatpush1.bf16.msra.mxu0 %v6545_v23  ;;  %v6565_v17 = vld [vmem:[#allocation3 + $0x174] ss:$8 sps:$4 sm:$0xff]   ;;  %v6596_v23 = vld [vmem:[#allocation3 + $0x50] ss:$8 sps:$4 sm:$0xff]  }
 0xd49   :  { %3017 = vmatprep.subr.bf16.mxu0 %v6550_v24  ;;  %3043 = vmatprep.mubr.bf16.mxu0 %v6895_v41  ;;  %v6604_v24 = vld [vmem:[#allocation3 + $0x44] ss:$8 sps:$4 sm:$0xff]  }
 0xd4a   :  { %6418 = vset.pattern.permute.xlu0 %v6895_v41 }
 0xd4c   :  { %3018 = vmatpush1.bf16.msra.mxu0 %v6548_v25  ;;  %v6602_v25 = vld [vmem:[#allocation3 + $0x40] ss:$8 sps:$4 sm:$0xff]  }
 0xd4d   :  { %3019 = vmatprep.subr.bf16.mxu0 %v6553_v26  ;;  %v6610_v26 = vld [vmem:[#allocation3 + $0x34] ss:$8 sps:$4 sm:$0xff]  }
 0xd50   :  { %3020 = vmatpush1.bf16.msra.mxu0 %v6551_v27  ;;  %v6608_v27 = vld [vmem:[#allocation3 + $0x30] ss:$8 sps:$4 sm:$0xff]  }
 0xd51   :  { %3021 = vmatprep.subr.bf16.mxu0 %v6556_v28  ;;  %v6616_v28 = vld [vmem:[#allocation3 + $0x24] ss:$8 sps:$4 sm:$0xff]  }
 0xd54   :  { %3022 = vmatpush1.bf16.msra.mxu0 %v6554_v29  ;;  %v6614_v29 = vld [vmem:[#allocation3 + $0x20] ss:$8 sps:$4 sm:$0xff]  }
 0xd55   :  { %3023 = vmatprep.subr.bf16.mxu0 %v6559_v42  ;;  %v6623_v42 = vld [vmem:[#allocation3 + $0x1a0] ss:$8 sps:$4 sm:$0xff]  }
 0xd58   :  { %3024 = vmatpush1.bf16.msra.mxu0 %v6557_v14  ;;  %v6625_v14 = vld [vmem:[#allocation3 + $0x1a4] ss:$8 sps:$4 sm:$0xff]  }
 0xd59   :  { %3025 = vmatprep.subr.bf16.mxu0 %v6562_v15  ;;  %v6628_v15 = vld [vmem:[#allocation3 + $0x4] ss:$8 sps:$4 sm:$0xff]  }
 0xd5c   :  { %3026 = vmatpush1.bf16.msra.mxu0 %v6560_v16  ;;  %v6626_v16 = vld [vmem:[#allocation3] ss:$8 sps:$4 sm:$0xff]  }
 0xd5d   :  { %3898 = vmatprep.subr.bf16.mxu0 %v6565_v17  ;;  %v6629_v17 = vld [vmem:[#allocation3 + $0x190] ss:$8 sps:$4 sm:$0xff]  }
 0xdff   :  { %v6079_v30 = vpop.f32.mrf.mxu1  ;;  %v6397_v31 = vpop.f32.mrf.mxu0 }
 0xe01   :  { %v6080_v32 = vpop.f32.mrf.mxu1  ;;  %v2769_v33 = vpop.f32.mrf.mxu0 }
 0xe02   :  { %v6081_v40 = vadd.f32 %v6080_v32, %v6079_v30  ;;  %v6622_v30 = vld [vmem:[#allocation3 + $0x14] ss:$8 sps:$4 sm:$0xff]  }
 0xe03   :  { %v6082_v34 = vpop.f32.mrf.mxu1  ;;  %v6398_v35 = vpop.f32.mrf.mxu0 }
 0xe04   :  { %v2770_v48 = vadd.f32 %v6081_v40, %v2769_v33 }
 0xe05   :  { %v6083_v57 = vpop.f32.mrf.mxu1  ;;  %v2772_v43 = vpop.f32.mrf.mxu0 }
 0xe06   :  { %v6084_v38 = vadd.f32 %v6083_v57, %v6082_v34  ;;  %v2788_v56 = vmul.f32 %v2787_v49, %v2770_v48  ;;  %v6563_v57 = vld [vmem:[#allocation3 + $0x170] ss:$8 sps:$4 sm:$0xff]   ;;  %v6574_v48 = vld [vmem:[#allocation3 + $0x144] ss:$8 sps:$4 sm:$0xff]  }
 0xe07   :  { %v6085_v39 = vpop.f32.mrf.mxu1 }
 0xe08   :  { %v2773_v37 = vadd.f32 %v6084_v38, %v2772_v43  ;;  %v2796_v1 = vadd.f32 %v2795_v58, %v2788_v56  ;;  %v6566_v43 = vld [vmem:[#allocation3 + $0x160] ss:$8 sps:$4 sm:$0xff]   ;;  %v6580_v56 = vld [vmem:[#allocation3 + $0x124] ss:$8 sps:$4 sm:$0xff]  }
 0xe09   :  { %v6086_v44 = vpop.f32.mrf.mxu1 }
 0xe0a   :  { %v6087_v46 = vadd.f32 %v6086_v44, %v6085_v39  ;;  %v2789_v53 = vmul.f32 %v2787_v49, %v2773_v37  ;;  %v2800_v6 = vmax.f32 %v2796_v1, 0.0  ;;  %v6568_v39 = vld [vmem:[#allocation3 + $0x164] ss:$8 sps:$4 sm:$0xff]   ;;  %v6571_v44 = vld [vmem:[#allocation3 + $0x154] ss:$8 sps:$4 sm:$0xff]  }
 0xe0b   :  { %v6088_v47 = vpop.f32.mrf.mxu1  ;;  %v6587_v1 = vld [vmem:[#allocation3 + $0x100] ss:$8 sps:$4 sm:$0xff]  }
 0xe0c   :  { %v2778_v50 = vadd.f32 %v6397_v31, %v6087_v46  ;;  %v2797_v62 = vadd.f32 %v2795_v58, %v2789_v53  ;;  %v6620_v31 = vld [vmem:[#allocation3 + $0x10] ss:$8 sps:$4 sm:$0xff]  }
 0xe0d   :  { %v6089_v51 = vpop.f32.mrf.mxu1  ;;  %v6569_v46 = vld [vmem:[#allocation3 + $0x150] ss:$8 sps:$4 sm:$0xff]  }
 0xe0e   :  { %v2790_v54 = vmul.f32 %v2787_v49, %v2778_v50  ;;  %v6090_v55 = vadd.f32 %v6089_v51, %v6088_v47  ;;  %v2801_v3 = vmax.f32 %v2797_v62, 0.0  ;;  %v6572_v50 = vld [vmem:[#allocation3 + $0x140] ss:$8 sps:$4 sm:$0xff]   ;;  %v6577_v51 = vld [vmem:[#allocation3 + $0x134] ss:$8 sps:$4 sm:$0xff]  }
 0xe0f   :  { %v6581_v62 = vld [vmem:[#allocation3 + $0x110] ss:$8 sps:$4 sm:$0xff]  }
 0xe10   :  { %v2781_v61 = vadd.f32 %v6398_v35, %v6090_v55  ;;  %v2798_v0 = vadd.f32 %v2795_v58, %v2790_v54  ;;  %v2812_v8 = vpack.c.bf16 %v2801_v3, %v2800_v6  ;;  %v6575_v54 = vld [vmem:[#allocation3 + $0x130] ss:$8 sps:$4 sm:$0xff]   ;;  %v6607_v6 = vld [vmem:[#allocation3 + $0x1d4] ss:$8 sps:$4 sm:$0xff]  }
 0xe11   :  { %v6593_v3 = vld [vmem:[#allocation3 + $0x1f0] ss:$8 sps:$4 sm:$0xff]  }
 0xe12   :  { %v2791_v63 = vmul.f32 %v2787_v49, %v2781_v61  ;;  %v2802_v4 = vmax.f32 %v2798_v0, 0.0  ;;  %v6583_v61 = vld [vmem:[#allocation3 + $0x114] ss:$8 sps:$4 sm:$0xff]   ;;  %v6589_v0 = vld [vmem:[#allocation3 + $0x104] ss:$8 sps:$4 sm:$0xff]  }
 0xe14   :  { %v2799_v2 = vadd.f32 %v2795_v58, %v2791_v63  ;;  %v6578_v58 = vld [vmem:[#allocation3 + $0x120] ss:$8 sps:$4 sm:$0xff]  }
 0xe16   :  { %v2803_v5 = vmax.f32 %v2799_v2, 0.0  ;;  %v6595_v2 = vld [vmem:[#allocation3 + $0x1f4] ss:$8 sps:$4 sm:$0xff]  }
 0xe18   :  { %v2813_v7 = vpack.c.bf16 %v2803_v5, %v2802_v4  ;;  %v6601_v4 = vld [vmem:[#allocation3 + $0x1e4] ss:$8 sps:$4 sm:$0xff]   ;;  %v6599_v5 = vld [vmem:[#allocation3 + $0x1e0] ss:$8 sps:$4 sm:$0xff]  }
 0xe1a   :  { %6399 = vmatprep.subr.bf16.mxu1 %v2813_v7 }
 0xe1b   :  { %6400 = vmatpush3.bf16.msra.mxu1 %v2813_v7  ;;  %v6605_v7 = vld [vmem:[#allocation3 + $0x1d0] ss:$8 sps:$4 sm:$0xff]  }
 0xe1c   :  { %6401 = vmatprep.subr.bf16.mxu1 %v2812_v8 }
 0xe1f   :  { %6402 = vmatpush3.bf16.msra.mxu1 %v2812_v8  ;;  %v6613_v8 = vld [vmem:[#allocation3 + $0x1c4] ss:$8 sps:$4 sm:$0xff]  }
 0xe20   :  { %3825 = vmatprep.subr.bf16.mxu1 %v6586_v20  ;;  %v6632_v20 = vld [vmem:[#allocation3 + $0xf0] ss:$8 sps:$4 sm:$0xff]  }
 0xe22   :  { %6404 = vmatmul.mubr.msk.bf16.vlgmr.msra.gmra.mxu1 %vm927_vm7, %v6536_v10  ;;  %v6611_v10 = vld [vmem:[#allocation3 + $0x1c0] ss:$8 sps:$4 sm:$0xff]  }
 0xe23   :  { %6407 = vmatprep.mubr.msk.bf16.mxu1 %vm927_vm7, %v6537_v18  ;;  %3826 = vmatpush1.bf16.msra.mxu1 %v6584_v19  ;;  %v6619_v18 = vld [vmem:[#allocation3 + $0x1b4] ss:$8 sps:$4 sm:$0xff]  }
 0xe24   :  { %3827 = vmatprep.subr.bf16.mxu1 %v6592_v21  ;;  %v6634_v19 = vld [vmem:[#allocation3 + $0xf4] ss:$8 sps:$4 sm:$0xff]   ;;  %v6637_v21 = vld [vmem:[#allocation3 + $0x184] ss:$8 sps:$4 sm:$0xff]  }
 0xe27   :  { %3828 = vmatpush1.bf16.msra.mxu1 %v6590_v52  ;;  %v6635_v52 = vld [vmem:[#allocation3 + $0x180] ss:$8 sps:$4 sm:$0xff]  }
 0xe28   :  { %3829 = vmatprep.subr.bf16.mxu1 %v6598_v22  ;;  %v6640_v22 = vld [vmem:[#allocation3 + $0xe4] ss:$8 sps:$4 sm:$0xff]  }
 0xe2a   :  { %6408 = vmatmul.mubr.msk.bf16.gmra.mxu1 %vm927_vm7, %v6538_v11  ;;  %v6617_v11 = vld [vmem:[#allocation3 + $0x1b0] ss:$8 sps:$4 sm:$0xff]  }
 0xe2b   :  { %3830 = vmatpush1.bf16.msra.mxu1 %v6596_v23  ;;  %v6638_v23 = vld [vmem:[#allocation3 + $0xe0] ss:$8 sps:$4 sm:$0xff]  }
 0xe2c   :  { %3831 = vmatprep.subr.bf16.mxu1 %v6604_v24  ;;  %v6643_v24 = vld [vmem:[#allocation3 + $0xd4] ss:$8 sps:$4 sm:$0xff]  }
 0xe2f   :  { %3832 = vmatpush1.bf16.msra.mxu1 %v6602_v25  ;;  %v6641_v25 = vld [vmem:[#allocation3 + $0xd0] ss:$8 sps:$4 sm:$0xff]  }
 0xe30   :  { %3833 = vmatprep.subr.bf16.mxu1 %v6610_v26  ;;  %v6646_v26 = vld [vmem:[#allocation3 + $0xc4] ss:$8 sps:$4 sm:$0xff]  }
 0xe33   :  { %3834 = vmatpush1.bf16.msra.mxu1 %v6608_v27  ;;  %v6644_v27 = vld [vmem:[#allocation3 + $0xc0] ss:$8 sps:$4 sm:$0xff]  }
 0xe34   :  { %3835 = vmatprep.subr.bf16.mxu1 %v6616_v28  ;;  %v6649_v28 = vld [vmem:[#allocation3 + $0xb4] ss:$8 sps:$4 sm:$0xff]  }
 0xe37   :  { %3836 = vmatpush1.bf16.msra.mxu1 %v6614_v29  ;;  %v6647_v29 = vld [vmem:[#allocation3 + $0xb0] ss:$8 sps:$4 sm:$0xff]  }
 0xe38   :  { %3837 = vmatprep.subr.bf16.mxu1 %v6622_v30  ;;  %v6652_v30 = vld [vmem:[#allocation3 + $0xa4] ss:$8 sps:$4 sm:$0xff]  }
 0xe3b   :  { %3838 = vmatpush1.bf16.msra.mxu1 %v6620_v31  ;;  %v6650_v31 = vld [vmem:[#allocation3 + $0xa0] ss:$8 sps:$4 sm:$0xff]  }
 0xe3c   :  { %3839 = vmatprep.subr.bf16.mxu1 %v6628_v15 }
 0xe3f   :  { %3840 = vmatpush1.bf16.msra.mxu1 %v6626_v16 }
 0xe40   :  { %3841 = vmatprep.subr.bf16.mxu1 %v6634_v19 }
 0xe43   :  { %3842 = vmatpush2.bf16.msra.mxu1 %v6632_v20 }
 0xe44   :  { %3843 = vmatprep.subr.bf16.mxu1 %v6640_v22 }
 0xe47   :  { %3844 = vmatpush2.bf16.msra.mxu1 %v6638_v23 }
 0xe48   :  { %3845 = vmatprep.subr.bf16.mxu1 %v6643_v24 }
 0xe4b   :  { %3846 = vmatpush2.bf16.msra.mxu1 %v6641_v25 }
 0xe4c   :  { %3847 = vmatprep.subr.bf16.mxu1 %v6646_v26 }
 0xe4f   :  { %3848 = vmatpush2.bf16.msra.mxu1 %v6644_v27 }
 0xe50   :  { %3849 = vmatprep.subr.bf16.mxu1 %v6649_v28 }
 0xe53   :  { %3850 = vmatpush2.bf16.msra.mxu1 %v6647_v29 }
 0xe54   :  { %3851 = vmatprep.subr.bf16.mxu1 %v6652_v30 }
 0xe57   :  { %3852 = vmatpush2.bf16.msra.mxu1 %v6650_v31 }
 0xee2   :  { %v6405_v32 = vpop.f32.mrf.mxu1 }
 0xee4   :  { %v2880_v33 = vpop.f32.mrf.mxu1 }
 0xee6   :  { %v6406_v34 = vpop.f32.mrf.mxu1 }
 0xee7   :  { %v2912_v47 = vpack.c.bf16 %v6406_v34, %v6405_v32  ;;  %v6655_v32 = vld [vmem:[#allocation3 + $0x94] ss:$8 sps:$4 sm:$0xff]   ;;  %v6658_v34 = vld [vmem:[#allocation3 + $0x84] ss:$8 sps:$4 sm:$0xff]  }
 0xee8   :  { %v2883_v35 = vpop.f32.mrf.mxu1  ;;  %3853 = vmatprep.subr.bf16.mxu1 %v6655_v32 }
 0xee9   :  { %v2911_v38 = vpack.c.bf16 %v2883_v35, %v2880_v33  ;;  %v6653_v33 = vld [vmem:[#allocation3 + $0x90] ss:$8 sps:$4 sm:$0xff]   ;;  %v6656_v35 = vld [vmem:[#allocation3 + $0x80] ss:$8 sps:$4 sm:$0xff]  }
 0xeea   :  { %v6409_v40 = vpop.f32.mrf.mxu1  ;;  %3854 = vmatpush2.bf16.msra.mxu1 %v6653_v33 }
 0xeeb   :  { %3044 = vmatmul.mubr.bf16.vlgmr.msra.gmra.mxu0 %v2911_v38  ;;  %3855 = vmatprep.subr.bf16.mxu1 %v6658_v34 }
 0xeec   :  { %3053 = vmatprep.mubr.bf16.mxu0 %v6895_v41  ;;  %3899 = vmatpush1.bf16.msra.mxu0 %v6563_v57  ;;  %v2896_v37 = vpop.f32.mrf.mxu1  ;;  %v6661_v57 = vld [vmem:[#allocation3 + $0x274] ss:$8 sps:$4 sm:$0xff]  }
 0xeed   :  { %3900 = vmatprep.subr.bf16.mxu0 %v6568_v39 }
 0xeee   :  { %v6410_v49 = vpop.f32.mrf.mxu1  ;;  %3856 = vmatpush2.bf16.msra.mxu1 %v6656_v35 }
 0xeef   :  { %v2914_v63 = vpack.c.bf16 %v6410_v49, %v6409_v40  ;;  %3971 = vmatprep.subr.bf16.mxu1 %v6661_v57 }
 0xef0   :  { %3901 = vmatpush1.bf16.msra.mxu0 %v6566_v43  ;;  %v2899_v53 = vpop.f32.mrf.mxu1 }
 0xef1   :  { %3902 = vmatprep.subr.bf16.mxu0 %v6571_v44  ;;  %v2913_v55 = vpack.c.bf16 %v2899_v53, %v2896_v37 }
 0xef3   :  { %3054 = vmatmul.mubr.bf16.gmra.mxu0 %v2912_v47 }
 0xef4   :  { %3063 = vmatprep.mubr.bf16.mxu0 %v6895_v41  ;;  %3903 = vmatpush1.bf16.msra.mxu0 %v6569_v46 }
 0xef5   :  { %3904 = vmatprep.subr.bf16.mxu0 %v6574_v48 }
 0xef8   :  { %3905 = vmatpush1.bf16.msra.mxu0 %v6572_v50 }
 0xef9   :  { %3906 = vmatprep.subr.bf16.mxu0 %v6577_v51 }
 0xefb   :  { %3064 = vmatmul.mubr.bf16.gmra.mxu0 %v2913_v55 }
 0xefc   :  { %3073 = vmatprep.mubr.bf16.mxu0 %v6895_v41  ;;  %3907 = vmatpush1.bf16.msra.mxu0 %v6575_v54  ;;  %v6631_v41 = vld [vmem:[#allocation3 + $0x194] ss:$8 sps:$4 sm:$0xff]  }
 0xefd   :  { %3908 = vmatprep.subr.bf16.mxu0 %v6580_v56 }
 0xf00   :  { %3909 = vmatpush1.bf16.msra.mxu0 %v6578_v58 }
 0xf01   :  { %3910 = vmatprep.subr.bf16.mxu0 %v6583_v61 }
 0xf03   :  { %3074 = vmatmul.mubr.bf16.gmra.mxu0 %v2914_v63 }
 0xf04   :  { %3911 = vmatpush1.bf16.msra.mxu0 %v6581_v62 }
 0xf05   :  { %3912 = vmatprep.subr.bf16.mxu0 %v6589_v0 }
 0xf08   :  { %3913 = vmatpush1.bf16.msra.mxu0 %v6587_v1 }
 0xf09   :  { %3914 = vmatprep.subr.bf16.mxu0 %v6595_v2 }
 0xf0c   :  { %3915 = vmatpush2.bf16.msra.mxu0 %v6593_v3 }
 0xf0d   :  { %3916 = vmatprep.subr.bf16.mxu0 %v6601_v4 }
 0xf10   :  { %3917 = vmatpush2.bf16.msra.mxu0 %v6599_v5 }
 0xf11   :  { %3918 = vmatprep.subr.bf16.mxu0 %v6607_v6 }
 0xf14   :  { %3919 = vmatpush2.bf16.msra.mxu0 %v6605_v7 }
 0xf15   :  { %3920 = vmatprep.subr.bf16.mxu0 %v6613_v8 }
 0xf18   :  { %3921 = vmatpush2.bf16.msra.mxu0 %v6611_v10 }
 0xf19   :  { %3922 = vmatprep.subr.bf16.mxu0 %v6619_v18 }
 0xf1c   :  { %3923 = vmatpush2.bf16.msra.mxu0 %v6617_v11 }
 0xf1d   :  { %3924 = vmatprep.subr.bf16.mxu0 %v6625_v14 }
 0xf20   :  { %3925 = vmatpush2.bf16.msra.mxu0 %v6623_v42 }
 0xf21   :  { %3926 = vmatprep.subr.bf16.mxu0 %v6631_v41 }
 0xf24   :  { %3927 = vmatpush2.bf16.msra.mxu0 %v6629_v17 }
 0xf25   :  { %3928 = vmatprep.subr.bf16.mxu0 %v6637_v21 }
 0xf28   :  { %3929 = vmatpush2.bf16.msra.mxu0 %v6635_v52 }
 0xfab   :  { %v7824_v38 = vpop.f32.mrf.mxu0 }
 0xfac   :  { %v3273_v43 = vrot.slane %v7824_v38, 1  ;;  %v3225_v30 = vrot.slane %v7824_v38, 7 }
 0xfad   :  { %v7826_v39 = vpop.f32.mrf.mxu0 }
 0xfae   :  { %v3226_v31 = vrot.slane %v7826_v39, 7 }
 0xfaf   :  { %v7828_v40 = vpop.f32.mrf.mxu0 }
 0xfb0   :  { %v3275_v44 = vrot.slane %v7828_v40, 1  ;;  %v3323_v49 = vpack.c.bf16 %v7828_v40, %v7824_v38  ;;  %v3227_v32 = vrot.slane %v7828_v40, 7 }
 0xfb1   :  { %v7832_v37 = vpop.f32.mrf.mxu0 }
 0xfb2   :  { %v7836_v46 = vsel %vm1452_vm12, %v3273_v43, %v3275_v44  ;;  %v3324_v47 = vpack.c.bf16 %v7832_v37, %v7826_v39  ;;  %v3228_v24 = vrot.slane %v7832_v37, 7 }
 0xfb3   :  { %v7840_v48 = vpop.f32.mrf.mxu0 }
 0xfb4   :  { %v3277_v50 = vrot.slane %v7840_v48, 1  ;;  %3930 = vmatprep.mubr.bf16.mxu0 %v3324_v47 }
 0xfb5   :  { %v7845_v51 = vpop.f32.mrf.mxu0  ;;  %3931 = vmatmul.mubr.bf16.vlgmr.msra.gmra.mxu0 %v3323_v49 }
 0xfb6   :  { %v7849_v53 = vsel %vm1452_vm12, %v3275_v44, %v3277_v50  ;;  %v3278_v4 = vrot.slane %v7845_v51, 1  ;;  %v3230_v35 = vrot.slane %v7845_v51, 7  ;;  %v3254_v44 = vsel %vm1445_vm5, %v3226_v31, %v3228_v24 }
 0xfb7   :  { %v3325_v54 = vpack.c.bf16 %v7849_v53, %v7836_v46  ;;  %v7853_v55 = vpop.f32.mrf.mxu0 }
 0xfb8   :  { %v3279_v56 = vrot.slane %v7853_v55, 1  ;;  %v3329_v0 = vpack.c.bf16 %v7853_v55, %v7840_v48 }
 0xfb9   :  { %v7856_v58 = vpop.f32.mrf.mxu0 }
 0xfba   :  { %v7860_v61 = vsel %vm1452_vm12, %v3277_v50, %v3279_v56  ;;  %v3330_v62 = vpack.c.bf16 %v7856_v58, %v7845_v51  ;;  %v3280_v1 = vrot.slane %v7856_v58, 1  ;;  %v3232_v27 = vrot.slane %v7856_v58, 7  ;;  %v6685_v51 = vld [vmem:[#allocation3 + $0x2f4] ss:$8 sps:$4 sm:$0xff]  }
 0xfbb   :  { %v7864_v63 = vpop.f32.mrf.mxu0 }
 0xfbc   :  { %v3281_v2 = vrot.slane %v7864_v63, 1  ;;  %3940 = vmatprep.mubr.bf16.mxu0 %v3330_v62  ;;  %v7886_v10 = vsel %vm1452_vm12, %v3278_v4, %v3280_v1  ;;  %v3250_v58 = vsel %vm1445_vm5, %v3230_v35, %v3232_v27 }
 0xfbd   :  { %v7870_v3 = vpop.f32.mrf.mxu0  ;;  %3941 = vmatmul.mubr.bf16.gmra.mxu0 %v3329_v0  ;;  %v3253_v0 = vsel %vm1445_vm5, %v3225_v30, %v3227_v32 }
 0xfbe   :  { %v7875_v5 = vsel %vm1452_vm12, %v3279_v56, %v3281_v2  ;;  %v3282_v6 = vrot.slane %v7870_v3, 1 }
 0xfbf   :  { %v7878_v7 = vpop.f32.mrf.mxu0  ;;  %v5762_v8 = vpack.c.bf16 %v7875_v5, %v7860_v61  ;;  %v6707_v5 = vld [vmem:[#allocation3 + $0x470] ss:$8 sps:$4 sm:$0xff]  }
 0xfc0   :  { %v7890_v18 = vsel %vm1452_vm12, %v3280_v1, %v3282_v6  ;;  %v3283_v11 = vrot.slane %v7878_v7, 1  ;;  %v3335_v19 = vpack.c.bf16 %v7878_v7, %v7864_v63 }
 0xfc1   :  { %v7893_v14 = vpop.f32.mrf.mxu0  ;;  %v5758_v42 = vpack.c.bf16 %v7890_v18, %v7886_v10  ;;  %v6710_v10 = vld [vmem:[#allocation3 + $0x460] ss:$8 sps:$4 sm:$0xff]   ;;  %v6712_v18 = vld [vmem:[#allocation3 + $0x464] ss:$8 sps:$4 sm:$0xff]  }
 0xfc2   :  { %v3284_v15 = vrot.slane %v7893_v14, 1  ;;  %v3336_v16 = vpack.c.bf16 %v7893_v14, %v7870_v3  ;;  %v7904_v17 = vsel %vm1452_vm12, %v3281_v2, %v3283_v11  ;;  %v6659_v2 = vld [vmem:[#allocation3 + $0x270] ss:$8 sps:$4 sm:$0xff]  }
 0xfc3   :  { %v7900_v41 = vpop.f32.mrf.mxu0 }
 0xfc4   :  { %v3285_v20 = vrot.slane %v7900_v41, 1  ;;  %3950 = vmatprep.mubr.bf16.mxu0 %v3336_v16  ;;  %v7911_v21 = vsel %vm1452_vm12, %v3282_v6, %v3284_v15  ;;  %v3231_v16 = vrot.slane %v7853_v55, 7  ;;  %v6667_v55 = vld [vmem:[#allocation3 + $0x254] ss:$8 sps:$4 sm:$0xff]  }
 0xfc5   :  { %v7913_v52 = vpop.f32.mrf.mxu0  ;;  %3951 = vmatmul.mubr.bf16.gmra.mxu0 %v3335_v19 }
 0xfc6   :  { %v3286_v22 = vrot.slane %v7913_v52, 1  ;;  %v7918_v23 = vsel %vm1452_vm12, %v3283_v11, %v3285_v20  ;;  %v3252_v11 = vsel %vm1445_vm5, %v3228_v24, %v3230_v35  ;;  %v3234_v24 = vrot.slane %v7870_v3, 7 }
 0xfc7   :  { %v7921_v25 = vpop.f32.mrf.mxu0  ;;  %v3337_v26 = vpack.c.bf16 %v7918_v23, %v7904_v17  ;;  %v3328_v19 = vpack.c.bf16 %v3250_v58, %v3252_v11  ;;  %v6715_v17 = vld [vmem:[#allocation3 + $0x454] ss:$8 sps:$4 sm:$0xff]   ;;  %v6719_v23 = vld [vmem:[#allocation3 + $0x430] ss:$8 sps:$4 sm:$0xff]  }
 0xfc8   :  { %v3239_v28 = vrot.slane %v7921_v25, 7  ;;  %v3287_v29 = vrot.slane %v7921_v25, 1  ;;  %v7937_v34 = vsel %vm1452_vm12, %v3284_v15, %v3286_v22  ;;  %v6664_v15 = vld [vmem:[#allocation3 + $0x264] ss:$8 sps:$4 sm:$0xff]  }
 0xfc9   :  { %v7931_v33 = vpop.f32.mrf.mxu0  ;;  %v3338_v62 = vpack.c.bf16 %v7937_v34, %v7911_v21  ;;  %v6716_v21 = vld [vmem:[#allocation3 + $0x440] ss:$8 sps:$4 sm:$0xff]   ;;  %v6724_v34 = vld [vmem:[#allocation3 + $0x424] ss:$8 sps:$4 sm:$0xff]  }
 0xfca   :  { %v7942_v57 = vsel %vm1452_vm12, %v3285_v20, %v3287_v29  ;;  %v7946_v38 = vsel %vm1452_vm12, %v3287_v29, %v3273_v43  ;;  %v3240_v40 = vrot.slane %v7931_v33, 7  ;;  %v3255_v47 = vsel %vm1445_vm5, %v3239_v28, %v3225_v30 }
 0xfcb   :  { %v5770_v49 = vpack.c.bf16 %v7946_v38, %v7942_v57  ;;  %v3342_v50 = vpack.c.bf16 %v7931_v33, %v7913_v52  ;;  %v3341_v43 = vpack.c.bf16 %v7921_v25, %v7900_v41  ;;  %v5746_v6 = vpack.c.bf16 %v3253_v0, %v3255_v47  ;;  %v6734_v57 = vld [vmem:[#allocation3 + $0x360] ss:$8 sps:$4 sm:$0xff]  }
 0xfcc   :  { %v3256_v56 = vsel %vm1445_vm5, %v3240_v40, %v3226_v31  ;;  %v3084_v20 = vadd.s32 32, %v7053_v9  ;;  %v3236_v29 = vrot.slane %v7893_v14, 7  ;;  %v3229_v30 = vrot.slane %v7840_v48, 7  ;;  %v6662_v31 = vld [vmem:[#allocation3 + $0x260] ss:$8 sps:$4 sm:$0xff]  }
 0xfcd   :  { %3960 = vmatprep.mubr.bf16.mxu0 %v3342_v50  ;;  %v5742_v1 = vpack.c.bf16 %v3254_v44, %v3256_v56  ;;  %v6665_v14 = vld [vmem:[#allocation3 + $0x250] ss:$8 sps:$4 sm:$0xff]   ;;  %v3248_v48 = vsel %vm1445_vm5, %v3232_v27, %v3234_v24  ;;  %v3235_v56 = vrot.slane %v7878_v7, 7  ;;  %v3233_v0 = vrot.slane %v7864_v63, 7  ;;  %v6722_v38 = vld [vmem:[#allocation3 + $0x420] ss:$8 sps:$4 sm:$0xff]  }
 0xfce   :  { %3961 = vmatmul.mubr.bf16.gmra.mxu0 %v3341_v43  ;;  %v3249_v35 = vsel %vm1445_vm5, %v3229_v30, %v3231_v16  ;;  %vm5919_vm10 = vcmp.ne.s32.totalorder %v3084_v20, 32  ;;  %v3246_v44 = vsel %vm1445_vm5, %v3234_v24, %v3236_v29  ;;  %v3251_v47 = vsel %vm1445_vm5, %v3227_v32, %v3229_v30  ;;  %v6670_v43 = vld [vmem:[#allocation3 + $0x244] ss:$8 sps:$4 sm:$0xff]   ;;  %v6668_v32 = vld [vmem:[#allocation3 + $0x240] ss:$8 sps:$4 sm:$0xff]  }
 0xfcf   :  { %5743 = vmatprep.mubr.msk.bf16.mxu1 %vm7609_vm15, %v5742_v1  ;;  %v3327_v50 = vpack.c.bf16 %v3249_v35, %v3251_v47  ;;  %vm7989_vm6 = vmpackc.low %vm6894_vm9, %vm5919_vm10  ;;  %v5750_v58 = vpack.c.bf16 %v3246_v44, %v3248_v48  ;;  %v3238_v27 = vrot.slane %v7913_v52, 7  ;;  %v6673_v1 = vld [vmem:[#allocation3 + $0x234] ss:$8 sps:$4 sm:$0xff]   ;;  %v3247_v7 = vsel %vm1445_vm5, %v3231_v16, %v3233_v0  ;;  %v6671_v63 = vld [vmem:[#allocation3 + $0x230] ss:$8 sps:$4 sm:$0xff]  }
 0xfd0   :  { %5747 = vmatmul.mubr.msk.bf16.vlgmr.msra.gmra.mxu1 %vm7609_vm15, %v5746_v6  ;;  %v3237_v30 = vrot.slane %v7900_v41, 7  ;;  %v6679_v16 = vld [vmem:[#allocation3 + $0x214] ss:$8 sps:$4 sm:$0xff]   ;;  %v6677_v41 = vld [vmem:[#allocation3 + $0x210] ss:$8 sps:$4 sm:$0xff]  }
 0xfd1   :  { %3972 = vmatpush1.bf16.msra.mxu1 %v6659_v2  ;;  %3867 = vmatprep.mubr.bf16.mxu1 %v3328_v19  ;;  %v3245_v2 = vsel %vm1445_vm5, %v3233_v0, %v3235_v56  ;;  %v3242_v6 = vsel %vm1445_vm5, %v3238_v27, %v3240_v40  ;;  %v6676_v19 = vld [vmem:[#allocation3 + $0x224] ss:$8 sps:$4 sm:$0xff]   ;;  %v6674_v40 = vld [vmem:[#allocation3 + $0x220] ss:$8 sps:$4 sm:$0xff]   ;;  %v6691_v48 = vld [vmem:[#allocation3 + $0x2d4] ss:$8 sps:$4 sm:$0xff]  }
 0xfd2   :  { %3973 = vmatprep.subr.bf16.mxu1 %v6664_v15  ;;  %v5754_v11 = vpack.c.bf16 %v3245_v2, %v3247_v7  ;;  %v3244_v15 = vsel %vm1445_vm5, %v3236_v29, %v3238_v27  ;;  %v3241_v24 = vsel %vm1445_vm5, %v3237_v30, %v3239_v28  ;;  %v3274_v29 = vrot.slane %v7826_v39, 1  ;;  %v6682_v44 = vld [vmem:[#allocation3 + $0x204] ss:$8 sps:$4 sm:$0xff]   ;;  %v6680_v39 = vld [vmem:[#allocation3 + $0x200] ss:$8 sps:$4 sm:$0xff]  }
 0xfd3   :  { %v3340_v20 = vpack.c.bf16 %v3242_v6, %v3244_v15  ;;  %v3243_v35 = vsel %vm1445_vm5, %v3235_v56, %v3237_v30  ;;  %v6688_v28 = vld [vmem:[#allocation3 + $0x2e4] ss:$8 sps:$4 sm:$0xff]   ;;  %v6686_v47 = vld [vmem:[#allocation3 + $0x2e0] ss:$8 sps:$4 sm:$0xff]   ;;  %v6695_v0 = vld [vmem:[#allocation3 + $0x2b0] ss:$8 sps:$4 sm:$0xff]  }
 0xfd4   :  { %v6692_v56 = vld [vmem:[#allocation3 + $0x2c0] ss:$8 sps:$4 sm:$0xff]   ;;  %v6701_v2 = vld [vmem:[#allocation3 + $0x290] ss:$8 sps:$4 sm:$0xff]   ;;  %v6706_v6 = vld [vmem:[#allocation3 + $0x284] ss:$8 sps:$4 sm:$0xff]  }
 0xfd5   :  { %3974 = vmatpush1.bf16.msra.mxu1 %v6662_v31  ;;  %v3276_v31 = vrot.slane %v7832_v37, 1  ;;  %v3339_v37 = vpack.c.bf16 %v3241_v24, %v3243_v35  ;;  %v6698_v27 = vld [vmem:[#allocation3 + $0x2a0] ss:$8 sps:$4 sm:$0xff]   ;;  %v6718_v52 = vld [vmem:[#allocation3 + $0x444] ss:$8 sps:$4 sm:$0xff]  }
 0xfd6   :  { %3975 = vmatprep.subr.bf16.mxu1 %v6667_v55  ;;  %v6704_v7 = vld [vmem:[#allocation3 + $0x280] ss:$8 sps:$4 sm:$0xff]   ;;  %v6727_v15 = vld [vmem:[#allocation3 + $0x414] ss:$8 sps:$4 sm:$0xff]   ;;  %v6748_v30 = vld [vmem:[#allocation3 + $0x344] ss:$8 sps:$4 sm:$0xff]  }
 0xfd7   :  { %v3300_v55 = vsel %vm1452_vm12, %v3276_v31, %v3278_v4  ;;  %v3302_v25 = vsel %vm1452_vm12, %v3274_v29, %v3276_v31  ;;  %v6683_v4 = vld [vmem:[#allocation3 + $0x2f0] ss:$8 sps:$4 sm:$0xff]   ;;  %v6746_v31 = vld [vmem:[#allocation3 + $0x340] ss:$8 sps:$4 sm:$0xff]   ;;  %v6754_v24 = vld [vmem:[#allocation3 + $0x334] ss:$8 sps:$4 sm:$0xff]  }
 0xfd8   :  { %3868 = vmatmul.mubr.bf16.gmra.mxu1 %v3327_v50  ;;  %v6689_v50 = vld [vmem:[#allocation3 + $0x2d0] ss:$8 sps:$4 sm:$0xff]   ;;  %v6745_v35 = vld [vmem:[#allocation3 + $0x4e4] ss:$8 sps:$4 sm:$0xff]  }
 0xfd9   :  { %3976 = vmatpush1.bf16.msra.mxu1 %v6665_v14  ;;  %5751 = vmatprep.mubr.msk.bf16.mxu1 %vm7989_vm6, %v5750_v58  ;;  %v3326_v14 = vpack.c.bf16 %v3300_v55, %v3302_v25  ;;  %v6697_v58 = vld [vmem:[#allocation3 + $0x2b4] ss:$8 sps:$4 sm:$0xff]   ;;  %v6752_v55 = vld [vmem:[#allocation3 + $0x330] ss:$8 sps:$4 sm:$0xff]  }
 0xfda   :  { %3977 = vmatprep.subr.bf16.mxu1 %v6670_v43  ;;  %v6694_v43 = vld [vmem:[#allocation3 + $0x2c4] ss:$8 sps:$4 sm:$0xff]   ;;  %v6751_v25 = vld [vmem:[#allocation3 + $0x4d4] ss:$8 sps:$4 sm:$0xff]  }
 0xfdd   :  { %3978 = vmatpush1.bf16.msra.mxu1 %v6668_v32  ;;  %v6700_v32 = vld [vmem:[#allocation3 + $0x2a4] ss:$8 sps:$4 sm:$0xff]  }
 0xfde   :  { %3979 = vmatprep.subr.bf16.mxu1 %v6673_v1  ;;  %v6703_v1 = vld [vmem:[#allocation3 + $0x294] ss:$8 sps:$4 sm:$0xff]  }
 0xfe0   :  { %5755 = vmatmul.mubr.msk.bf16.gmra.mxu1 %vm7989_vm6, %v5754_v11  ;;  %v3288_v11 = vrot.slane %v7931_v33, 1  ;;  %v6730_v33 = vld [vmem:[#allocation3 + $0x374] ss:$8 sps:$4 sm:$0xff]  }
 0xfe1   :  { %3980 = vmatpush1.bf16.msra.mxu1 %v6671_v63  ;;  %3887 = vmatprep.mubr.bf16.mxu1 %v3340_v20  ;;  %v3087_v63 = vadd.s32 56, %v7053_v9  ;;  %v6725_v20 = vld [vmem:[#allocation3 + $0x410] ss:$8 sps:$4 sm:$0xff]  }
 0xfe2   :  { %3981 = vmatprep.subr.bf16.mxu1 %v6676_v19  ;;  %v3290_v46 = vsel %vm1452_vm12, %v3286_v22, %v3288_v11  ;;  %v3304_v53 = vsel %vm1452_vm12, %v3288_v11, %v3274_v29  ;;  %v6721_v22 = vld [vmem:[#allocation3 + $0x434] ss:$8 sps:$4 sm:$0xff]   ;;  %4826 = vmatprep.subr.bf16.mxu0 %v6730_v33  ;;  %v6740_v19 = vld [vmem:[#allocation3 + $0x350] ss:$8 sps:$4 sm:$0xff]   ;;  %v6782_v11 = vld [vmem:[#allocation3 + $0x3e0] ss:$8 sps:$4 sm:$0xff]  }
 0xfe3   :  { %vm5920_vm11 = vcmp.ne.s32.totalorder %v3087_v63, 63  ;;  %v5766_v61 = vpack.c.bf16 %v3304_v53, %v3290_v46  ;;  %v6739_v29 = vld [vmem:[#allocation3 + $0x4f4] ss:$8 sps:$4 sm:$0xff]   ;;  %v6784_v63 = vld [vmem:[#allocation3 + $0x3e4] ss:$8 sps:$4 sm:$0xff]  }
 0xfe4   :  { %vm8048_vm13 = vmpackc.low %vm5920_vm11, %vm6894_vm9  ;;  %v6787_v46 = vld [vmem:[#allocation3 + $0x3d4] ss:$8 sps:$4 sm:$0xff]   ;;  %v6785_v53 = vld [vmem:[#allocation3 + $0x3d0] ss:$8 sps:$4 sm:$0xff]  }
 0xfe5   :  { %3982 = vmatpush1.bf16.msra.mxu1 %v6674_v40  ;;  %v6733_v40 = vld [vmem:[#allocation3 + $0x404] ss:$8 sps:$4 sm:$0xff]  }
 0xfe6   :  { %3983 = vmatprep.subr.bf16.mxu1 %v6679_v16  ;;  %v6731_v16 = vld [vmem:[#allocation3 + $0x400] ss:$8 sps:$4 sm:$0xff]  }
 0xfe8   :  { %3888 = vmatmul.mubr.bf16.gmra.mxu1 %v3339_v37  ;;  %v6743_v37 = vld [vmem:[#allocation3 + $0x4e0] ss:$8 sps:$4 sm:$0xff]  }
 0xfe9   :  { %3984 = vmatpush1.bf16.msra.mxu1 %v6677_v41  ;;  %4003 = vmatprep.mubr.bf16.mxu1 %v3326_v14  ;;  %v6737_v41 = vld [vmem:[#allocation3 + $0x4f0] ss:$8 sps:$4 sm:$0xff]   ;;  %v6757_v14 = vld [vmem:[#allocation3 + $0x4c4] ss:$8 sps:$4 sm:$0xff]  }
 0xfea   :  { %3985 = vmatprep.subr.bf16.mxu1 %v6682_v44  ;;  %v6749_v44 = vld [vmem:[#allocation3 + $0x4d0] ss:$8 sps:$4 sm:$0xff]  }
 0xfed   :  { %3986 = vmatpush1.bf16.msra.mxu1 %v6680_v39  ;;  %v6755_v39 = vld [vmem:[#allocation3 + $0x4c0] ss:$8 sps:$4 sm:$0xff]  }
 0xfee   :  { %3987 = vmatprep.subr.bf16.mxu1 %v6685_v51  ;;  %v6760_v51 = vld [vmem:[#allocation3 + $0x324] ss:$8 sps:$4 sm:$0xff]  }
 0xff1   :  { %3988 = vmatpush2.bf16.msra.mxu1 %v6683_v4  ;;  %v6758_v4 = vld [vmem:[#allocation3 + $0x320] ss:$8 sps:$4 sm:$0xff]  }
 0xff2   :  { %3989 = vmatprep.subr.bf16.mxu1 %v6688_v28  ;;  %v6763_v28 = vld [vmem:[#allocation3 + $0x4b4] ss:$8 sps:$4 sm:$0xff]  }
 0xff5   :  { %3990 = vmatpush2.bf16.msra.mxu1 %v6686_v47  ;;  %v6761_v47 = vld [vmem:[#allocation3 + $0x4b0] ss:$8 sps:$4 sm:$0xff]  }
 0xff6   :  { %3991 = vmatprep.subr.bf16.mxu1 %v6691_v48  ;;  %v6766_v48 = vld [vmem:[#allocation3 + $0x314] ss:$8 sps:$4 sm:$0xff]  }
 0xff9   :  { %3992 = vmatpush2.bf16.msra.mxu1 %v6689_v50  ;;  %v6764_v50 = vld [vmem:[#allocation3 + $0x310] ss:$8 sps:$4 sm:$0xff]  }
 0xffa   :  { %3993 = vmatprep.subr.bf16.mxu1 %v6694_v43  ;;  %v6769_v43 = vld [vmem:[#allocation3 + $0x4a4] ss:$8 sps:$4 sm:$0xff]  }
 0xffd   :  { %3994 = vmatpush2.bf16.msra.mxu1 %v6692_v56  ;;  %v6767_v56 = vld [vmem:[#allocation3 + $0x4a0] ss:$8 sps:$4 sm:$0xff]  }
 0xffe   :  { %3995 = vmatprep.subr.bf16.mxu1 %v6697_v58  ;;  %v6772_v58 = vld [vmem:[#allocation3 + $0x304] ss:$8 sps:$4 sm:$0xff]  }
0x1001   :  { %3996 = vmatpush2.bf16.msra.mxu1 %v6695_v0  ;;  %v6770_v0 = vld [vmem:[#allocation3 + $0x300] ss:$8 sps:$4 sm:$0xff]  }
0x1002   :  { %3997 = vmatprep.subr.bf16.mxu1 %v6700_v32  ;;  %v6775_v32 = vld [vmem:[#allocation3 + $0x494] ss:$8 sps:$4 sm:$0xff]  }
0x1005   :  { %3998 = vmatpush2.bf16.msra.mxu1 %v6698_v27  ;;  %v6773_v27 = vld [vmem:[#allocation3 + $0x490] ss:$8 sps:$4 sm:$0xff]  }
0x1006   :  { %3999 = vmatprep.subr.bf16.mxu1 %v6703_v1  ;;  %v6778_v1 = vld [vmem:[#allocation3 + $0x3f4] ss:$8 sps:$4 sm:$0xff]  }
0x1009   :  { %4000 = vmatpush2.bf16.msra.mxu1 %v6701_v2  ;;  %v6776_v2 = vld [vmem:[#allocation3 + $0x3f0] ss:$8 sps:$4 sm:$0xff]  }
0x100a   :  { %4001 = vmatprep.subr.bf16.mxu1 %v6706_v6  ;;  %v6781_v6 = vld [vmem:[#allocation3 + $0x484] ss:$8 sps:$4 sm:$0xff]  }
0x100d   :  { %4002 = vmatpush2.bf16.msra.mxu1 %v6704_v7  ;;  %v6779_v7 = vld [vmem:[#allocation3 + $0x480] ss:$8 sps:$4 sm:$0xff]  }
0x1010   :  { %4004 = vmatmul.mubr.bf16.vlgmr.msra.gmra.mxu1 %v3325_v54  ;;  %v6855_v54 = vld [vmem:[%s8577_s23 + $0x68] sm:$0xff]  }
0x1011   :  { %5759 = vmatprep.mubr.msk.bf16.mxu1 %vm7630_vm2, %v5758_v42  ;;  %v6713_v42 = vld [vmem:[#allocation3 + $0x450] ss:$8 sps:$4 sm:$0xff]  }
0x1018   :  { %5763 = vmatmul.mubr.msk.bf16.gmra.mxu1 %vm7630_vm2, %v5762_v8  ;;  %v6709_v8 = vld [vmem:[#allocation3 + $0x474] ss:$8 sps:$4 sm:$0xff]  }
0x1019   :  { %4023 = vmatprep.mubr.bf16.mxu1 %v3338_v62  ;;  %4899 = vmatprep.subr.bf16.mxu1 %v6709_v8  ;;  %v6736_v62 = vld [vmem:[#allocation3 + $0x364] ss:$8 sps:$4 sm:$0xff]   ;;  %v6793_v8 = vld [vmem:[#allocation3 + $0x3b4] ss:$8 sps:$4 sm:$0xff]  }
0x101a   :  { %4900 = vmatpush1.bf16.msra.mxu1 %v6707_v5  ;;  %v6788_v5 = vld [vmem:[#allocation3 + $0x3c0] ss:$8 sps:$4 sm:$0xff]  }
0x101b   :  { %4901 = vmatprep.subr.bf16.mxu1 %v6712_v18  ;;  %v6796_v18 = vld [vmem:[#allocation3 + $0x3a4] ss:$8 sps:$4 sm:$0xff]  }
0x101e   :  { %4902 = vmatpush1.bf16.msra.mxu1 %v6710_v10  ;;  %v6791_v10 = vld [vmem:[#allocation3 + $0x3b0] ss:$8 sps:$4 sm:$0xff]  }
0x101f   :  { %4903 = vmatprep.subr.bf16.mxu1 %v6715_v17  ;;  %v6799_v17 = vld [vmem:[#allocation3 + $0x394] ss:$8 sps:$4 sm:$0xff]  }
0x1020   :  { %4024 = vmatmul.mubr.bf16.gmra.mxu1 %v3337_v26  ;;  %v6728_v26 = vld [vmem:[#allocation3 + $0x370] ss:$8 sps:$4 sm:$0xff]  }
0x1021   :  { %5767 = vmatprep.mubr.msk.bf16.mxu1 %vm8048_vm13, %v5766_v61  ;;  %4827 = vmatpush1.bf16.msra.mxu0 %v6728_v26  ;;  %v6790_v61 = vld [vmem:[#allocation3 + $0x3c4] ss:$8 sps:$4 sm:$0xff]  }
0x1022   :  { %4904 = vmatpush1.bf16.msra.mxu1 %v6713_v42  ;;  %4828 = vmatprep.subr.bf16.mxu0 %v6736_v62  ;;  %v6794_v42 = vld [vmem:[#allocation3 + $0x3a0] ss:$8 sps:$4 sm:$0xff]  }
0x1023   :  { %4905 = vmatprep.subr.bf16.mxu1 %v6718_v52  ;;  %v6800_v52 = vld [vmem:[#allocation3 + $0x380] ss:$8 sps:$4 sm:$0xff]  }
0x1025   :  { %4829 = vmatpush1.bf16.msra.mxu0 %v6734_v57 }
0x1026   :  { %4906 = vmatpush1.bf16.msra.mxu1 %v6716_v21  ;;  %v6797_v21 = vld [vmem:[#allocation3 + $0x390] ss:$8 sps:$4 sm:$0xff]  }
0x1027   :  { %4907 = vmatprep.subr.bf16.mxu1 %v6721_v22  ;;  %v6802_v22 = vld [vmem:[#allocation3 + $0x384] ss:$8 sps:$4 sm:$0xff]  }
0x1028   :  { %5771 = vmatmul.mubr.msk.bf16.gmra.mxu1 %vm8048_vm13, %v5770_v49  ;;  %v6742_v49 = vld [vmem:[#allocation3 + $0x354] ss:$8 sps:$4 sm:$0xff]  }
0x1029   :  { %4830 = vmatprep.subr.bf16.mxu0 %v6742_v49 }
0x102a   :  { %4908 = vmatpush1.bf16.msra.mxu1 %v6719_v23  ;;  %4831 = vmatpush1.bf16.msra.mxu0 %v6740_v19  ;;  %v6805_v23 = vld [vmem:[#allocation3 + $0x574] ss:$8 sps:$4 sm:$0xff]  }
0x102b   :  { %4909 = vmatprep.subr.bf16.mxu1 %v6724_v34  ;;  %4832 = vmatprep.subr.bf16.mxu0 %v6748_v30 }
0x102e   :  { %4910 = vmatpush1.bf16.msra.mxu1 %v6722_v38  ;;  %4833 = vmatpush1.bf16.msra.mxu0 %v6746_v31 }
0x102f   :  { %4911 = vmatprep.subr.bf16.mxu1 %v6727_v15  ;;  %4834 = vmatprep.subr.bf16.mxu0 %v6754_v24 }
0x1032   :  { %4912 = vmatpush1.bf16.msra.mxu1 %v6725_v20  ;;  %4835 = vmatpush1.bf16.msra.mxu0 %v6752_v55 }
0x1033   :  { %4913 = vmatprep.subr.bf16.mxu1 %v6733_v40  ;;  %4836 = vmatprep.subr.bf16.mxu0 %v6760_v51  ;;  %v4051_v51 = vsub.s32 4, %v7053_v9 }
0x1036   :  { %4914 = vmatpush1.bf16.msra.mxu1 %v6731_v16  ;;  %4837 = vmatpush1.bf16.msra.mxu0 %v6758_v4 }
0x1037   :  { %4915 = vmatprep.subr.bf16.mxu1 %v6739_v29  ;;  %4838 = vmatprep.subr.bf16.mxu0 %v6766_v48 }
0x103a   :  { %4916 = vmatpush2.bf16.msra.mxu1 %v6737_v41  ;;  %4839 = vmatpush1.bf16.msra.mxu0 %v6764_v50 }
0x103b   :  { %4917 = vmatprep.subr.bf16.mxu1 %v6745_v35  ;;  %4840 = vmatprep.subr.bf16.mxu0 %v6772_v58 }
0x103e   :  { %4918 = vmatpush2.bf16.msra.mxu1 %v6743_v37  ;;  %4841 = vmatpush1.bf16.msra.mxu0 %v6770_v0 }
0x103f   :  { %4919 = vmatprep.subr.bf16.mxu1 %v6751_v25  ;;  %4842 = vmatprep.subr.bf16.mxu0 %v6778_v1 }
0x1042   :  { %4920 = vmatpush2.bf16.msra.mxu1 %v6749_v44  ;;  %4843 = vmatpush2.bf16.msra.mxu0 %v6776_v2  ;;  %v8077_v44 = vld [vmem:[%s8576_s22] sm:$0xff] }
0x1043   :  { %4921 = vmatprep.subr.bf16.mxu1 %v6757_v14  ;;  %4844 = vmatprep.subr.bf16.mxu0 %v6784_v63  ;;  %v4048_v4 = vrot.slane %v8077_v44, %v7062_v12  ;;  %v4052_v50 = vrot.slane %v8077_v44, %v4051_v51 }
0x1045   :  { %v8091_v58 = vrot.slane %v4048_v4, %v7062_v12 }
0x1046   :  { %4922 = vmatpush2.bf16.msra.mxu1 %v6755_v39  ;;  %4845 = vmatpush2.bf16.msra.mxu0 %v6782_v11 }
0x1047   :  { %4923 = vmatprep.subr.bf16.mxu1 %v6763_v28  ;;  %4846 = vmatprep.subr.bf16.mxu0 %v6787_v46 }
0x104a   :  { %4924 = vmatpush2.bf16.msra.mxu1 %v6761_v47  ;;  %4847 = vmatpush2.bf16.msra.mxu0 %v6785_v53  ;;  %v4082_v47 = vrot.slane %v8077_v44, %v7065_v13 }
0x104b   :  { %4925 = vmatprep.subr.bf16.mxu1 %v6769_v43  ;;  %4848 = vmatprep.subr.bf16.mxu0 %v6790_v61  ;;  %v4085_v43 = vsub.s32 5, %v7053_v9 }
0x104c   :  { %v8094_v2 = vrot.slane %v4082_v47, %v7065_v13 }
0x104d   :  { %v4086_v63 = vrot.slane %v8077_v44, %v4085_v43 }
0x104e   :  { %4926 = vmatpush2.bf16.msra.mxu1 %v6767_v56  ;;  %4849 = vmatpush2.bf16.msra.mxu0 %v6788_v5 }
0x104f   :  { %4927 = vmatprep.subr.bf16.mxu1 %v6775_v32  ;;  %4850 = vmatprep.subr.bf16.mxu0 %v6793_v8 }
0x1052   :  { %4928 = vmatpush2.bf16.msra.mxu1 %v6773_v27  ;;  %4851 = vmatpush2.bf16.msra.mxu0 %v6791_v10 }
0x1053   :  { %4929 = vmatprep.subr.bf16.mxu1 %v6781_v6  ;;  %4852 = vmatprep.subr.bf16.mxu0 %v6796_v18 }
0x1056   :  { %4930 = vmatpush2.bf16.msra.mxu1 %v6779_v7  ;;  %4853 = vmatpush2.bf16.msra.mxu0 %v6794_v42  ;;  %v8097_v7 = vrot.slane %v4052_v50, %v7062_v12 }
0x1057   :  { %4854 = vmatprep.subr.bf16.mxu0 %v6799_v17  ;;  %v8104_v17 = vrot.slane %v4086_v63, %v7065_v13  ;;  %6107 = vmatprep.subr.bf16.mxu1 %v6851_v45 }
0x105a   :  { %4855 = vmatpush2.bf16.msra.mxu0 %v6797_v21 }
0x105b   :  { %4856 = vmatprep.subr.bf16.mxu0 %v6802_v22 }
0x105e   :  { %4857 = vmatpush2.bf16.msra.mxu0 %v6800_v52 }
0x105f   :  { %4972 = vmatprep.subr.bf16.mxu0 %v6805_v23 }
0x1075   :  { %v3932_v15 = vpop.f32.mrf.mxu0 }
0x1077   :  { %v3934_v20 = vpop.f32.mrf.mxu0 }
0x1079   :  { %v3936_v40 = vpop.f32.mrf.mxu0 }
0x107b   :  { %v3938_v16 = vpop.f32.mrf.mxu0 }
0x107d   :  { %v3942_v29 = vpop.f32.mrf.mxu0 }
0x107f   :  { %v3944_v41 = vpop.f32.mrf.mxu0 }
0x1081   :  { %v3946_v37 = vpop.f32.mrf.mxu0 }
0x1083   :  { %v3948_v14 = vpop.f32.mrf.mxu0 }
0x1085   :  { %v3952_v28 = vpop.f32.mrf.mxu0 }
0x1087   :  { %v3954_v32 = vpop.f32.mrf.mxu0 }
0x1089   :  { %v3956_v5 = vpop.f32.mrf.mxu0 }
0x108b   :  { %v3958_v23 = vpop.f32.mrf.mxu0 }
0x108e   :  { %v3962_v43 = vpop.f32.mrf.mxu0 }
0x1090   :  { %v3859_v26 = vpop.f32.mrf.mxu1 }
0x1091   :  { %v3933_v56 = vadd.f32 %v3932_v15, %v3859_v26 }
0x1092   :  { %v3861_v33 = vpop.f32.mrf.mxu1 }
0x1093   :  { %v3935_v27 = vadd.f32 %v3934_v20, %v3861_v33 }
0x1094   :  { %v3863_v34 = vpop.f32.mrf.mxu1 }
0x1095   :  { %v3937_v11 = vadd.f32 %v3936_v40, %v3863_v34 }
0x1096   :  { %v3865_v62 = vpop.f32.mrf.mxu1 }
0x1097   :  { %v3939_v8 = vadd.f32 %v3938_v16, %v3865_v62 }
0x1098   :  { %v3869_v57 = vpop.f32.mrf.mxu1 }
0x1099   :  { %v3943_v26 = vadd.f32 %v3942_v29, %v3869_v57 }
0x109a   :  { %v3871_v38 = vpop.f32.mrf.mxu1 }
0x109b   :  { %v3945_v33 = vadd.f32 %v3944_v41, %v3871_v38 }
0x109c   :  { %v3873_v49 = vpop.f32.mrf.mxu1 }
0x109d   :  { %v3947_v4 = vadd.f32 %v3946_v37, %v3873_v49 }
0x109e   :  { %v3875_v19 = vpop.f32.mrf.mxu1 }
0x109f   :  { %v3949_v57 = vadd.f32 %v3948_v14, %v3875_v19 }
0x10a0   :  { %v8062_v30 = vpop.f32.mrf.mxu1 }
0x10a1   :  { %v3953_v37 = vadd.f32 %v3952_v28, %v8062_v30 }
0x10a2   :  { %v8064_v31 = vpop.f32.mrf.mxu1 }
0x10a4   :  { %v8066_v24 = vpop.f32.mrf.mxu1 }
0x10a5   :  { %v3957_v28 = vadd.f32 %v3956_v5, %v8066_v24 }
0x10a6   :  { %v8068_v55 = vpop.f32.mrf.mxu1 }
0x10a8   :  { %v8070_v35 = vpop.f32.mrf.mxu1 }
0x10aa   :  { %v8072_v25 = vpop.f32.mrf.mxu1 }
0x10ac   :  { %v8079_v39 = vpop.f32.mrf.mxu1 }
0x10ae   :  { %v8086_v48 = vpop.f32.mrf.mxu1 }
0x10d0   :  { %v4005_v0 = vpop.f32.mrf.mxu1 }
0x10d1   :  { %v4006_v1 = vadd.f32 %v4005_v0, %v3933_v56 }
0x10d2   :  { %v4007_v6 = vpop.f32.mrf.mxu1 }
0x10d3   :  { %v4063_v46 = vmul.f32 %v8091_v58, %v4006_v1  ;;  %v4008_v53 = vadd.f32 %v4007_v6, %v3935_v27 }
0x10d4   :  { %v4009_v61 = vpop.f32.mrf.mxu1 }
0x10d5   :  { %v4097_v10 = vadd.f32 %v8094_v2, %v4063_v46  ;;  %v4010_v18 = vadd.f32 %v4009_v61, %v3937_v11  ;;  %v4064_v42 = vmul.f32 %v8097_v7, %v4008_v53  ;;  %v3964_v46 = vpop.f32.mrf.mxu0  ;;  %v3955_v53 = vadd.f32 %v3954_v32, %v8064_v31 }
0x10d6   :  { %v4011_v21 = vpop.f32.mrf.mxu1 }
0x10d7   :  { %v4065_v12 = vmul.f32 %v8091_v58, %v4010_v18  ;;  %v4012_v52 = vadd.f32 %v4011_v21, %v3939_v8  ;;  %v8107_v34 = vmax.f32 %v4097_v10, 0.0  ;;  %v4098_v15 = vadd.f32 %v8104_v17, %v4064_v42  ;;  %v3966_v32 = vpop.f32.mrf.mxu0 }
0x10d8   :  { %v4015_v22 = vpop.f32.mrf.mxu1 }
0x10d9   :  { %v4099_v62 = vadd.f32 %v8094_v2, %v4065_v12  ;;  %v4066_v20 = vmul.f32 %v8097_v7, %v4012_v52  ;;  %v4016_v13 = vadd.f32 %v4015_v22, %v3943_v26  ;;  %v4274_v38 = vrot.slane %v8107_v34, 1 }
0x10da   :  { %v4017_v40 = vpop.f32.mrf.mxu1  ;;  %v8117_v41 = vmax.f32 %v4098_v15, 0.0  ;;  %v3959_v15 = vadd.f32 %v3958_v23, %v8068_v55  ;;  %v3965_v55 = vadd.f32 %v3964_v46, %v8072_v25  ;;  %v3967_v23 = vadd.f32 %v3966_v32, %v8079_v39 }
0x10db   :  { %v8112_v16 = vmax.f32 %v4099_v62, 0.0  ;;  %v4018_v51 = vadd.f32 %v4017_v40, %v3945_v33  ;;  %v4100_v47 = vadd.f32 %v8104_v17, %v4066_v20  ;;  %v4067_v6 = vmul.f32 %v8091_v58, %v4016_v13 }
0x10dc   :  { %v4019_v50 = vpop.f32.mrf.mxu1  ;;  %v4227_v25 = vrot.slane %v8117_v41, 7  ;;  %v4275_v39 = vrot.slane %v8117_v41, 1 }
0x10dd   :  { %v4276_v29 = vrot.slane %v8112_v16, 1  ;;  %v8119_v56 = vmax.f32 %v4100_v47, 0.0  ;;  %v4068_v0 = vmul.f32 %v8097_v7, %v4018_v51  ;;  %v4020_v27 = vadd.f32 %v4019_v50, %v3947_v4 }
0x10de   :  { %v4021_v1 = vpop.f32.mrf.mxu1  ;;  %v4324_v61 = vpack.c.bf16 %v8112_v16, %v8107_v34  ;;  %v4101_v21 = vadd.f32 %v8094_v2, %v4067_v6  ;;  %v3963_v51 = vadd.f32 %v3962_v43, %v8070_v35 }
0x10df   :  { %v4022_v49 = vadd.f32 %v4021_v1, %v3949_v57  ;;  %v8129_v19 = vsel %vm1452_vm12, %v4274_v38, %v4276_v29  ;;  %v4069_v14 = vmul.f32 %v8091_v58, %v4020_v27  ;;  %v4325_v11 = vpack.c.bf16 %v8119_v56, %v8117_v41  ;;  %v6833_v41 = vld [vmem:[#allocation3 + $0x5d0] ss:$8 sps:$4 sm:$0xff]  }
0x10e0   :  { %v4025_v63 = vpop.f32.mrf.mxu1  ;;  %v4102_v10 = vadd.f32 %v8104_v17, %v4068_v0  ;;  %v8153_v40 = vmax.f32 %v4101_v21, 0.0  ;;  %v3968_v0 = vpop.f32.mrf.mxu0 }
0x10e1   :  { %v4070_v8 = vmul.f32 %v8097_v7, %v4022_v49  ;;  %v4103_v18 = vadd.f32 %v8094_v2, %v4069_v14  ;;  %v4026_v42 = vadd.f32 %v4025_v63, %v3953_v37  ;;  %4931 = vmatprep.mubr.bf16.mxu1 %v4325_v11  ;;  %v3969_v6 = vadd.f32 %v3968_v0, %v8086_v48 }
0x10e2   :  { %v4027_v30 = vpop.f32.mrf.mxu1  ;;  %4932 = vmatmul.mubr.bf16.vlgmr.msra.gmra.mxu1 %v4324_v61  ;;  %v8150_v20 = vmax.f32 %v4102_v10, 0.0  ;;  %v4226_v14 = vrot.slane %v8107_v34, 7  ;;  %v4228_v11 = vrot.slane %v8112_v16, 7  ;;  %v6806_v34 = vld [vmem:[#allocation3 + $0x560] ss:$8 sps:$4 sm:$0xff]  }
0x10e3   :  { %v4104_v12 = vadd.f32 %v8104_v17, %v4070_v8  ;;  %v4028_v52 = vadd.f32 %v4027_v30, %v3955_v53  ;;  %v8144_v22 = vmax.f32 %v4103_v18, 0.0  ;;  %v4071_v24 = vmul.f32 %v8091_v58, %v4026_v42  ;;  %v6812_v16 = vld [vmem:[#allocation3 + $0x540] ss:$8 sps:$4 sm:$0xff]  }
0x10e4   :  { %v4029_v31 = vpop.f32.mrf.mxu1  ;;  %v4229_v8 = vrot.slane %v8119_v56, 7  ;;  %v4278_v30 = vrot.slane %v8153_v40, 1 }
0x10e5   :  { %v8146_v26 = vmax.f32 %v4104_v12, 0.0  ;;  %v4072_v33 = vmul.f32 %v8097_v7, %v4028_v52  ;;  %v4030_v62 = vadd.f32 %v4029_v31, %v3957_v28  ;;  %v4330_v1 = vpack.c.bf16 %v8144_v22, %v8153_v40 }
0x10e6   :  { %v4031_v5 = vpop.f32.mrf.mxu1  ;;  %v4105_v35 = vadd.f32 %v8094_v2, %v4071_v24  ;;  %v4255_v0 = vsel %vm1445_vm5, %v4227_v25, %v4229_v8 }
0x10e7   :  { %v4073_v13 = vmul.f32 %v8091_v58, %v4030_v62  ;;  %v4106_v4 = vadd.f32 %v8104_v17, %v4072_v33  ;;  %v4032_v47 = vadd.f32 %v4031_v5, %v3959_v15  ;;  %v4331_v57 = vpack.c.bf16 %v8146_v26, %v8150_v20 }
0x10e8   :  { %v4035_v50 = vpop.f32.mrf.mxu1  ;;  %v8181_v28 = vmax.f32 %v4105_v35, 0.0  ;;  %v4231_v33 = vrot.slane %v8150_v20, 7  ;;  %v4233_v62 = vrot.slane %v8146_v26, 7  ;;  %v4281_v15 = vrot.slane %v8146_v26, 1 }
0x10e9   :  { %v4107_v27 = vadd.f32 %v8094_v2, %v4073_v13  ;;  %v4074_v43 = vmul.f32 %v8097_v7, %v4032_v47  ;;  %v4036_v49 = vadd.f32 %v4035_v50, %v3963_v51  ;;  %4941 = vmatprep.mubr.bf16.mxu1 %v4331_v57  ;;  %v8172_v46 = vmax.f32 %v4106_v4, 0.0 }
0x10ea   :  { %v4037_v37 = vpop.f32.mrf.mxu1  ;;  %4942 = vmatmul.mubr.bf16.gmra.mxu1 %v4330_v1  ;;  %v4254_v50 = vsel %vm1445_vm5, %v4226_v14, %v4228_v11  ;;  %v4282_v57 = vrot.slane %v8181_v28, 1  ;;  %v8225_v35 = vsel %vm1452_vm12, %v4276_v29, %v4278_v30 }
0x10eb   :  { %v4038_v63 = vadd.f32 %v4037_v37, %v3965_v55  ;;  %v4108_v48 = vadd.f32 %v8104_v17, %v4074_v43  ;;  %v4075_v53 = vmul.f32 %v8091_v58, %v4036_v49  ;;  %v8177_v10 = vmax.f32 %v4107_v27, 0.0 }
0x10ec   :  { %v4039_v61 = vpop.f32.mrf.mxu1  ;;  %v4283_v24 = vrot.slane %v8172_v46, 1  ;;  %v4251_v27 = vsel %vm1445_vm5, %v4231_v33, %v4233_v62  ;;  %v4326_v29 = vpack.c.bf16 %v8225_v35, %v8129_v19  ;;  %v6852_v19 = vld [vmem:[%s8577_s23 + $0x38] sm:$0xff]   ;;  %v6853_v35 = vld [vmem:[%s8577_s23 + $0x70] sm:$0xff]  }
0x10ed   :  { %v4076_v18 = vmul.f32 %v8097_v7, %v4038_v63  ;;  %v4040_v42 = vadd.f32 %v4039_v61, %v3967_v23  ;;  %v8183_v21 = vmax.f32 %v4108_v48, 0.0  ;;  %v4109_v12 = vadd.f32 %v8094_v2, %v4075_v53  ;;  %6108 = vmatpush3.bf16.msra.mxu1 %v6852_v19 }
0x10ee   :  { %v4041_v52 = vpop.f32.mrf.mxu1  ;;  %v4336_v47 = vpack.c.bf16 %v8177_v10, %v8181_v28  ;;  %v4284_v1 = vrot.slane %v8177_v10, 1  ;;  %v8229_v43 = vsel %vm1452_vm12, %v4281_v15, %v4283_v24  ;;  %6109 = vmatprep.subr.bf16.mxu1 %v6853_v35 }
0x10ef   :  { %v4077_v31 = vmul.f32 %v8091_v58, %v4040_v42  ;;  %v4042_v32 = vadd.f32 %v4041_v52, %v3969_v6  ;;  %v4110_v5 = vadd.f32 %v8104_v17, %v4076_v18  ;;  %v4337_v13 = vpack.c.bf16 %v8183_v21, %v8172_v46 }
0x10f0   :  { %v8194_v51 = vmax.f32 %v4109_v12, 0.0 }
0x10f1   :  { %v4111_v4 = vadd.f32 %v8094_v2, %v4077_v31  ;;  %v4078_v58 = vmul.f32 %v8097_v7, %v4042_v32  ;;  %4951 = vmatprep.mubr.bf16.mxu1 %v4337_v13  ;;  %v4279_v2 = vrot.slane %v8150_v20, 1  ;;  %v4280_v7 = vrot.slane %v8144_v22, 1  ;;  %v6824_v20 = vld [vmem:[#allocation3 + $0x500] ss:$8 sps:$4 sm:$0xff]  }
0x10f2   :  { %4952 = vmatmul.mubr.bf16.gmra.mxu1 %v4336_v47  ;;  %v8219_v6 = vmax.f32 %v4110_v5, 0.0  ;;  %v4253_v31 = vsel %vm1445_vm5, %v4229_v8, %v4231_v33  ;;  %v4232_v32 = vrot.slane %v8144_v22, 7  ;;  %v4285_v5 = vrot.slane %v8183_v21, 1 }
0x10f3   :  { %v8211_v55 = vmax.f32 %v4111_v4, 0.0  ;;  %v4112_v23 = vadd.f32 %v8104_v17, %v4078_v58  ;;  %v4286_v17 = vrot.slane %v8194_v51, 1  ;;  %v8239_v63 = vsel %vm1452_vm12, %v4279_v2, %v4281_v15  ;;  %v6803_v58 = vld [vmem:[#allocation3 + $0x570] ss:$8 sps:$4 sm:$0xff]  }
0x10f4   :  { %v5886_v53 = vpack.c.bf16 %v8229_v43, %v8239_v63  ;;  %v8248_v61 = vsel %vm1452_vm12, %v4280_v7, %v4282_v57  ;;  %v8263_v15 = vsel %vm1452_vm12, %v4278_v30, %v4280_v7  ;;  %v4329_v4 = vpack.c.bf16 %v4251_v27, %v4253_v31  ;;  %v6808_v7 = vld [vmem:[#allocation3 + $0x564] ss:$8 sps:$4 sm:$0xff]   ;;  %v6809_v31 = vld [vmem:[#allocation3 + $0x550] ss:$8 sps:$4 sm:$0xff]  }
0x10f5   :  { %v4240_v49 = vrot.slane %v8211_v55, 7  ;;  %v8233_v37 = vmax.f32 %v4112_v23, 0.0  ;;  %v4288_v48 = vrot.slane %v8211_v55, 1  ;;  %v5890_v8 = vpack.c.bf16 %v8248_v61, %v8263_v15  ;;  %v6854_v43 = vld [vmem:[%s8577_s23 + $0x30] sm:$0xff]   ;;  %v6856_v63 = vld [vmem:[%s8577_s23 + $0x28] sm:$0xff]   ;;  %v6859_v61 = vld [vmem:[%s8577_s23 + $0x58] sm:$0xff]  }
0x10f6   :  { %v4287_v30 = vrot.slane %v8219_v6, 1  ;;  %v8277_v47 = vsel %vm1452_vm12, %v4283_v24, %v4285_v5  ;;  %v8281_v23 = vsel %vm1452_vm12, %v4284_v1, %v4286_v17  ;;  %6110 = vmatpush3.bf16.msra.mxu1 %v6854_v43  ;;  %v6860_v15 = vld [vmem:[%s8577_s23 + $0x18] sm:$0xff]  }
0x10f7   :  { %v4256_v18 = vsel %vm1445_vm5, %v4240_v49, %v4226_v14  ;;  %v4241_v42 = vrot.slane %v8233_v37, 7  ;;  %v4289_v12 = vrot.slane %v8233_v37, 1  ;;  %v4343_v52 = vpack.c.bf16 %v8233_v37, %v8219_v6  ;;  %6111 = vmatprep.subr.bf16.mxu1 %v6855_v54 }
0x10f8   :  { %v4342_v14 = vpack.c.bf16 %v8211_v55, %v8194_v51  ;;  %v5874_v22 = vpack.c.bf16 %v4254_v50, %v4256_v18  ;;  %v8295_v24 = vsel %vm1452_vm12, %v4286_v17, %v4288_v48  ;;  %v4237_v17 = vrot.slane %v8183_v21, 7  ;;  %v6811_v21 = vld [vmem:[#allocation3 + $0x554] ss:$8 sps:$4 sm:$0xff]   ;;  %v6826_v55 = vld [vmem:[#allocation3 + $0x504] ss:$8 sps:$4 sm:$0xff]  }
0x10f9   :  { %4961 = vmatprep.mubr.bf16.mxu1 %v4343_v52  ;;  %v4257_v13 = vsel %vm1445_vm5, %v4241_v42, %v4227_v25  ;;  %v8285_v25 = vsel %vm1452_vm12, %v4282_v57, %v4284_v1  ;;  %v8291_v50 = vsel %vm1452_vm12, %v4289_v12, %v4275_v39  ;;  %v8307_v27 = vsel %vm1452_vm12, %v4287_v30, %v4289_v12 }
0x10fa   :  { %v5870_v33 = vpack.c.bf16 %v4255_v0, %v4257_v13  ;;  %4962 = vmatmul.mubr.bf16.gmra.mxu1 %v4342_v14  ;;  %v8301_v0 = vsel %vm1452_vm12, %v4285_v5, %v4287_v30  ;;  %v4338_v57 = vpack.c.bf16 %v8281_v23, %v8285_v25  ;;  %v8313_v1 = vsel %vm1452_vm12, %v4288_v48, %v4274_v38  ;;  %v6863_v23 = vld [vmem:[%s8577_s23 + $0x48] sm:$0xff]  }
0x10fb   :  { %v4339_v37 = vpack.c.bf16 %v8301_v0, %v8277_v47  ;;  %v5894_v18 = vpack.c.bf16 %v8291_v50, %v8307_v27  ;;  %v5898_v12 = vpack.c.bf16 %v8313_v1, %v8295_v24  ;;  %v4230_v38 = vrot.slane %v8153_v40, 7  ;;  %6112 = vmatpush3.bf16.msra.mxu1 %v6856_v63  ;;  %v6862_v47 = vld [vmem:[%s8577_s23 + $0x10] sm:$0xff]   ;;  %v6864_v25 = vld [vmem:[%s8577_s23 + $0x8] sm:$0xff]   ;;  %v6865_v50 = vld [vmem:[%s8577_s23 + $0x40] sm:$0xff]  }
0x10fc   :  { %5871 = vmatprep.mubr.msk.bf16.mxu0 %vm7609_vm15, %v5870_v33  ;;  %v4235_v48 = vrot.slane %v8172_v46, 7  ;;  %v6814_v46 = vld [vmem:[#allocation3 + $0x544] ss:$8 sps:$4 sm:$0xff]   ;;  %v4236_v13 = vrot.slane %v8177_v10, 7  ;;  %v4239_v33 = vrot.slane %v8219_v6, 7 }
0x10fd   :  { %5875 = vmatmul.mubr.msk.bf16.vlgmr.msra.gmra.mxu0 %vm7609_vm15, %v5874_v22  ;;  %v4250_v36 = vsel %vm1445_vm5, %v4230_v38, %v4232_v32  ;;  %v4252_v5 = vsel %vm1445_vm5, %v4228_v11, %v4230_v38  ;;  %v4234_v22 = vrot.slane %v8181_v28, 7  ;;  %v6817_v11 = vld [vmem:[#allocation3 + $0x534] ss:$8 sps:$4 sm:$0xff]   ;;  %v6815_v10 = vld [vmem:[#allocation3 + $0x530] ss:$8 sps:$4 sm:$0xff]  }
0x10fe   :  { %4973 = vmatpush1.bf16.msra.mxu0 %v6803_v58  ;;  %4868 = vmatprep.mubr.bf16.mxu0 %v4329_v4  ;;  %v4247_v52 = vsel %vm1445_vm5, %v4235_v48, %v4237_v17  ;;  %v4328_v14 = vpack.c.bf16 %v4250_v36, %v4252_v5  ;;  %v4249_v40 = vsel %vm1445_vm5, %v4233_v62, %v4235_v48  ;;  %v6818_v6 = vld [vmem:[#allocation3 + $0x520] ss:$8 sps:$4 sm:$0xff]   ;;  %v6823_v38 = vld [vmem:[#allocation3 + $0x514] ss:$8 sps:$4 sm:$0xff]   ;;  %v4277_v48 = vrot.slane %v8119_v56, 1 }
0x10ff   :  { %4974 = vmatprep.subr.bf16.mxu0 %v6808_v7  ;;  %v5878_v4 = vpack.c.bf16 %v4247_v52, %v4249_v40  ;;  %v4246_v26 = vsel %vm1445_vm5, %v4234_v22, %v4236_v13  ;;  %v4243_v62 = vsel %vm1445_vm5, %v4239_v33, %v4241_v42  ;;  %v4248_v28 = vsel %vm1445_vm5, %v4232_v32, %v4234_v22  ;;  %v6820_v7 = vld [vmem:[#allocation3 + $0x524] ss:$8 sps:$4 sm:$0xff]   ;;  %v6835_v5 = vld [vmem:[#allocation3 + $0x5d4] ss:$8 sps:$4 sm:$0xff]  }
0x1100   :  { %v5882_v58 = vpack.c.bf16 %v4246_v26, %v4248_v28  ;;  %v4245_v30 = vsel %vm1445_vm5, %v4237_v17, %v4239_v33  ;;  %v4238_v42 = vrot.slane %v8194_v51, 7  ;;  %v4301_v3 = vsel %vm1452_vm12, %v4277_v48, %v4279_v2  ;;  %v6821_v17 = vld [vmem:[#allocation3 + $0x510] ss:$8 sps:$4 sm:$0xff]   ;;  %v6829_v2 = vld [vmem:[#allocation3 + $0x5f4] ss:$8 sps:$4 sm:$0xff]  }
0x1101   :  { %v4303_v56 = vsel %vm1452_vm12, %v4275_v39, %v4277_v48  ;;  %v6832_v52 = vld [vmem:[#allocation3 + $0x5e4] ss:$8 sps:$4 sm:$0xff]   ;;  %v6841_v40 = vld [vmem:[#allocation3 + $0x5b4] ss:$8 sps:$4 sm:$0xff]   ;;  %v6848_v33 = vld [vmem:[#allocation3 + $0x580] ss:$8 sps:$4 sm:$0xff]  }
0x1102   :  { %4975 = vmatpush1.bf16.msra.mxu0 %v6806_v34  ;;  %v4341_v34 = vpack.c.bf16 %v4243_v62, %v4245_v30  ;;  %v4242_v32 = vsel %vm1445_vm5, %v4238_v42, %v4240_v49  ;;  %v4327_v36 = vpack.c.bf16 %v4301_v3, %v4303_v56  ;;  %v6827_v49 = vld [vmem:[#allocation3 + $0x5f0] ss:$8 sps:$4 sm:$0xff]   ;;  %v6838_v39 = vld [vmem:[#allocation3 + $0x5c4] ss:$8 sps:$4 sm:$0xff]   ;;  %v6847_v22 = vld [vmem:[#allocation3 + $0x594] ss:$8 sps:$4 sm:$0xff]  }
0x1103   :  { %4976 = vmatprep.subr.bf16.mxu0 %v6811_v21  ;;  %v4244_v21 = vsel %vm1445_vm5, %v4236_v13, %v4238_v42  ;;  %v6844_v13 = vld [vmem:[#allocation3 + $0x5a4] ss:$8 sps:$4 sm:$0xff]   ;;  %v5900_v0 = vld [vmem:[#allocation2] ss:$0 sm:$0xff] }
0x1104   :  { %v4340_v51 = vpack.c.bf16 %v4242_v32, %v4244_v21  ;;  %v6866_v24 = vld [vmem:[%s8577_s23] sm:$0xff]   ;;  %5176 = vperm.xlu0 %6418, %v5900_v0   ;;  %v5051_v21 = vsub.s32 6, %v7053_v9 }
0x1105   :  { %4869 = vmatmul.mubr.bf16.gmra.mxu0 %v4328_v14  ;;  %v6836_v14 = vld [vmem:[#allocation3 + $0x5c0] ss:$8 sps:$4 sm:$0xff]  }
0x1106   :  { %4977 = vmatpush1.bf16.msra.mxu0 %v6809_v31  ;;  %5879 = vmatprep.mubr.msk.bf16.mxu0 %vm7989_vm6, %v5878_v4  ;;  %v6830_v31 = vld [vmem:[#allocation3 + $0x5e0] ss:$8 sps:$4 sm:$0xff]  }
0x1107   :  { %4978 = vmatprep.subr.bf16.mxu0 %v6814_v46  ;;  %v6839_v46 = vld [vmem:[#allocation3 + $0x5b0] ss:$8 sps:$4 sm:$0xff]   ;;  %v6842_v4 = vld [vmem:[#allocation3 + $0x5a0] ss:$8 sps:$4 sm:$0xff]  }
0x110a   :  { %4979 = vmatpush1.bf16.msra.mxu0 %v6812_v16  ;;  %v6845_v16 = vld [vmem:[#allocation3 + $0x590] ss:$8 sps:$4 sm:$0xff]  }
0x110b   :  { %4980 = vmatprep.subr.bf16.mxu0 %v6817_v11  ;;  %v6850_v11 = vld [vmem:[#allocation3 + $0x584] ss:$8 sps:$4 sm:$0xff]  }
0x110d   :  { %5883 = vmatmul.mubr.msk.bf16.gmra.mxu0 %vm7989_vm6, %v5882_v58 }
0x110e   :  { %4981 = vmatpush1.bf16.msra.mxu0 %v6815_v10  ;;  %4888 = vmatprep.mubr.bf16.mxu0 %v4341_v34 }
0x110f   :  { %4982 = vmatprep.subr.bf16.mxu0 %v6820_v7 }
0x1112   :  { %4983 = vmatpush1.bf16.msra.mxu0 %v6818_v6 }
0x1113   :  { %4984 = vmatprep.subr.bf16.mxu0 %v6823_v38 }
0x1115   :  { %4889 = vmatmul.mubr.bf16.gmra.mxu0 %v4340_v51 }
0x1116   :  { %4985 = vmatpush1.bf16.msra.mxu0 %v6821_v17  ;;  %5004 = vmatprep.mubr.bf16.mxu0 %v4327_v36  ;;  %v5085_v36 = vsub.s32 7, %v7053_v9  ;;  %v5082_v9 = vrot.slane %v8077_v44, %v7202_v60 }
0x1117   :  { %4986 = vmatprep.subr.bf16.mxu0 %v6826_v55  ;;  %v5052_v55 = vrot.slane %v8077_v44, %v5051_v21 }
0x111a   :  { %4987 = vmatpush1.bf16.msra.mxu0 %v6824_v20 }
0x111b   :  { %4988 = vmatprep.subr.bf16.mxu0 %v6829_v2  ;;  %v5048_v2 = vrot.slane %v8077_v44, %v7199_v59 }
0x111e   :  { %4989 = vmatpush2.bf16.msra.mxu0 %v6827_v49 }
0x111f   :  { %4990 = vmatprep.subr.bf16.mxu0 %v6832_v52 }
0x1122   :  { %4991 = vmatpush2.bf16.msra.mxu0 %v6830_v31 }
0x1123   :  { %4992 = vmatprep.subr.bf16.mxu0 %v6835_v5 }
0x1126   :  { %4993 = vmatpush2.bf16.msra.mxu0 %v6833_v41  ;;  %v8468_v41 = vrot.slane %v5052_v55, %v7199_v59 }
0x1127   :  { %4994 = vmatprep.subr.bf16.mxu0 %v6838_v39  ;;  %v5086_v39 = vrot.slane %v8077_v44, %v5085_v36 }
0x1129   :  { %v8478_v45 = vrot.slane %v5086_v39, %v7202_v60 }
0x112a   :  { %4995 = vmatpush2.bf16.msra.mxu0 %v6836_v14 }
0x112b   :  { %4996 = vmatprep.subr.bf16.mxu0 %v6841_v40  ;;  %v8472_v40 = vrot.slane %v5048_v2, %v7199_v59  ;;  %v8482_v59 = vrot.slane %v5082_v9, %v7202_v60 }
0x112e   :  { %4997 = vmatpush2.bf16.msra.mxu0 %v6839_v46 }
0x112f   :  { %4998 = vmatprep.subr.bf16.mxu0 %v6844_v13 }
0x1132   :  { %4999 = vmatpush2.bf16.msra.mxu0 %v6842_v4 }
0x1133   :  { %5000 = vmatprep.subr.bf16.mxu0 %v6847_v22 }
0x1136   :  { %5001 = vmatpush2.bf16.msra.mxu0 %v6845_v16 }
0x1137   :  { %5002 = vmatprep.subr.bf16.mxu0 %v6850_v11 }
0x113a   :  { %5003 = vmatpush2.bf16.msra.mxu0 %v6848_v33 }
0x113d   :  { %5005 = vmatmul.mubr.bf16.vlgmr.msra.gmra.mxu0 %v4326_v29  ;;  %v6857_v29 = vld [vmem:[%s8577_s23 + $0x60] sm:$0xff]  }
0x113e   :  { %5887 = vmatprep.mubr.msk.bf16.mxu0 %vm7630_vm2, %v5886_v53  ;;  %v6858_v53 = vld [vmem:[%s8577_s23 + $0x20] sm:$0xff]   ;;  %6113 = vmatprep.subr.bf16.mxu1 %v6857_v29 }
0x113f   :  { %6114 = vmatpush3.bf16.msra.mxu1 %v6858_v53 }
0x1140   :  { %6115 = vmatprep.subr.bf16.mxu1 %v6859_v61 }
0x1143   :  { %6116 = vmatpush3.bf16.msra.mxu1 %v6860_v15 }
0x1145   :  { %5891 = vmatmul.mubr.msk.bf16.gmra.mxu0 %vm7630_vm2, %v5890_v8  ;;  %v6861_v8 = vld [vmem:[%s8577_s23 + $0x50] sm:$0xff]  }
0x1146   :  { %5024 = vmatprep.mubr.bf16.mxu0 %v4339_v37  ;;  %6117 = vmatprep.subr.bf16.mxu1 %v6861_v8 }
0x1147   :  { %6118 = vmatpush3.bf16.msra.mxu1 %v6862_v47 }
0x1148   :  { %6119 = vmatprep.subr.bf16.mxu1 %v6863_v23 }
0x114b   :  { %6120 = vmatpush3.bf16.msra.mxu1 %v6864_v25 }
0x114c   :  { %6121 = vmatprep.subr.bf16.mxu1 %v6865_v50 }
0x114d   :  { %5025 = vmatmul.mubr.bf16.gmra.mxu0 %v4338_v57 }
0x114e   :  { %5895 = vmatprep.mubr.msk.bf16.mxu0 %vm8048_vm13, %v5894_v18 }
0x114f   :  { %6122 = vmatpush3.bf16.msra.mxu1 %v6866_v24 }
0x1155   :  { %5899 = vmatmul.mubr.msk.bf16.gmra.mxu0 %vm8048_vm13, %v5898_v12 }
0x11a2   :  { %v4933_v10 = vpop.f32.mrf.mxu1 }
0x11a4   :  { %v4935_v58 = vpop.f32.mrf.mxu1 }
0x11a6   :  { %v4937_v7 = vpop.f32.mrf.mxu1 }
0x11a8   :  { %v4939_v6 = vpop.f32.mrf.mxu1 }
0x11aa   :  { %v4943_v38 = vpop.f32.mrf.mxu1 }
0x11ac   :  { %v4945_v32 = vpop.f32.mrf.mxu1 }
0x11ae   :  { %v4947_v17 = vpop.f32.mrf.mxu1 }
0x11b0   :  { %v4949_v56 = vpop.f32.mrf.mxu1 }
0x11b2   :  { %v4953_v49 = vpop.f32.mrf.mxu1 }
0x11b4   :  { %v4955_v13 = vpop.f32.mrf.mxu1 }
0x11b6   :  { %v4957_v54 = vpop.f32.mrf.mxu1 }
0x11b8   :  { %v4959_v50 = vpop.f32.mrf.mxu1 }
0x11bd   :  { %v4860_v57 = vpop.f32.mrf.mxu0 }
0x11be   :  { %v4934_v52 = vadd.f32 %v4933_v10, %v4860_v57 }
0x11bf   :  { %v4862_v27 = vpop.f32.mrf.mxu0 }
0x11c0   :  { %v4936_v5 = vadd.f32 %v4935_v58, %v4862_v27 }
0x11c1   :  { %v4864_v1 = vpop.f32.mrf.mxu0 }
0x11c2   :  { %v4938_v4 = vadd.f32 %v4937_v7, %v4864_v1 }
0x11c3   :  { %v4866_v37 = vpop.f32.mrf.mxu0 }
0x11c4   :  { %v4940_v11 = vadd.f32 %v4939_v6, %v4866_v37 }
0x11c5   :  { %v4870_v18 = vpop.f32.mrf.mxu0 }
0x11c6   :  { %v4944_v29 = vadd.f32 %v4943_v38, %v4870_v18  ;;  %v4963_v38 = vpop.f32.mrf.mxu1 }
0x11c7   :  { %v4872_v12 = vpop.f32.mrf.mxu0 }
0x11c8   :  { %v4946_v61 = vadd.f32 %v4945_v32, %v4872_v12 }
0x11c9   :  { %v4874_v26 = vpop.f32.mrf.mxu0 }
0x11ca   :  { %v4948_v57 = vadd.f32 %v4947_v17, %v4874_v26 }
0x11cb   :  { %v4876_v62 = vpop.f32.mrf.mxu0 }
0x11cc   :  { %v4950_v37 = vadd.f32 %v4949_v56, %v4876_v62 }
0x11cd   :  { %v8446_v28 = vpop.f32.mrf.mxu0 }
0x11ce   :  { %v4954_v26 = vadd.f32 %v4953_v49, %v8446_v28 }
0x11cf   :  { %v8448_v30 = vpop.f32.mrf.mxu0 }
0x11d0   :  { %v4956_v62 = vadd.f32 %v4955_v13, %v8448_v30 }
0x11d1   :  { %v8450_v34 = vpop.f32.mrf.mxu0 }
0x11d2   :  { %v4958_v56 = vadd.f32 %v4957_v54, %v8450_v34 }
0x11d3   :  { %v8452_v42 = vpop.f32.mrf.mxu0 }
0x11d4   :  { %v4960_v30 = vadd.f32 %v4959_v50, %v8452_v42 }
0x11d5   :  { %v8454_v48 = vpop.f32.mrf.mxu0 }
0x11d7   :  { %v8456_v3 = vpop.f32.mrf.mxu0 }
0x11d9   :  { %v8459_v51 = vpop.f32.mrf.mxu0 }
0x11db   :  { %v8463_v20 = vpop.f32.mrf.mxu0 }
0x11fd   :  { %v5006_v31 = vpop.f32.mrf.mxu0 }
0x11fe   :  { %v5007_v14 = vadd.f32 %v5006_v31, %v4934_v52 }
0x11ff   :  { %v5008_v46 = vpop.f32.mrf.mxu0 }
0x1200   :  { %v5009_v22 = vadd.f32 %v5008_v46, %v4936_v5  ;;  %v5063_v35 = vmul.f32 %v8472_v40, %v5007_v14  ;;  %v4965_v14 = vpop.f32.mrf.mxu1 }
0x1201   :  { %v5010_v16 = vpop.f32.mrf.mxu0 }
0x1202   :  { %v5064_v33 = vmul.f32 %v8468_v41, %v5009_v22  ;;  %v5011_v19 = vadd.f32 %v5010_v16, %v4938_v4  ;;  %v5097_v23 = vadd.f32 %v8482_v59, %v5063_v35 }
0x1203   :  { %v5012_v43 = vpop.f32.mrf.mxu0 }
0x1204   :  { %v5065_v44 = vmul.f32 %v8472_v40, %v5011_v19  ;;  %v5013_v63 = vadd.f32 %v5012_v43, %v4940_v11  ;;  %v5098_v15 = vadd.f32 %v8478_v45, %v5064_v33  ;;  %v5113_v10 = vmax.f32 %v5097_v23, 0.0  ;;  %v4967_v19 = vpop.f32.mrf.mxu1 }
0x1205   :  { %v5016_v53 = vpop.f32.mrf.mxu0 }
0x1206   :  { %v5099_v8 = vadd.f32 %v8482_v59, %v5065_v44  ;;  %v5066_v47 = vmul.f32 %v8468_v41, %v5013_v63  ;;  %v5017_v24 = vadd.f32 %v5016_v53, %v4944_v29  ;;  %v5114_v18 = vmax.f32 %v5098_v15, 0.0 }
0x1207   :  { %v5018_v25 = vpop.f32.mrf.mxu0  ;;  %v4964_v63 = vadd.f32 %v4963_v38, %v8454_v48  ;;  %v4966_v29 = vadd.f32 %v4965_v14, %v8456_v3  ;;  %v4968_v3 = vadd.f32 %v4967_v19, %v8459_v51 }
0x1208   :  { %v5100_v60 = vadd.f32 %v8478_v45, %v5066_v47  ;;  %v5019_v0 = vadd.f32 %v5018_v25, %v4946_v61  ;;  %v5115_v27 = vmax.f32 %v5099_v8, 0.0  ;;  %v5067_v32 = vmul.f32 %v8472_v40, %v5017_v24  ;;  %v4969_v25 = vpop.f32.mrf.mxu1 }
0x1209   :  { %v5020_v1 = vpop.f32.mrf.mxu0 }
0x120a   :  { %v5116_v12 = vmax.f32 %v5100_v60, 0.0  ;;  %v5068_v58 = vmul.f32 %v8468_v41, %v5019_v0  ;;  %v5021_v7 = vadd.f32 %v5020_v1, %v4948_v57  ;;  %v5129_v36 = vpack.c.bf16 %v5115_v27, %v5113_v10 }
0x120b   :  { %v5022_v6 = vpop.f32.mrf.mxu0  ;;  %v5101_v9 = vadd.f32 %v8482_v59, %v5067_v32  ;;  %v4970_v0 = vadd.f32 %v4969_v25, %v8463_v20 }
0x120c   :  { %v5023_v21 = vadd.f32 %v5022_v6, %v4950_v37  ;;  %v5130_v55 = vpack.c.bf16 %v5116_v12, %v5114_v18  ;;  %v5069_v2 = vmul.f32 %v8472_v40, %v5021_v7  ;;  %v5102_v31 = vadd.f32 %v8478_v45, %v5068_v58 }
0x120d   :  { %v5026_v52 = vpop.f32.mrf.mxu0  ;;  %v5117_v35 = vmax.f32 %v5101_v9, 0.0 }
0x120e   :  { %v5070_v17 = vmul.f32 %v8468_v41, %v5023_v21  ;;  %5307 = vmatprep.mubr.bf16.mxu1 %v5130_v55  ;;  %v5103_v5 = vadd.f32 %v8482_v59, %v5069_v2  ;;  %v5027_v4 = vadd.f32 %v5026_v52, %v4954_v26  ;;  %v5118_v11 = vmax.f32 %v5102_v31, 0.0 }
0x120f   :  { %v5028_v39 = vpop.f32.mrf.mxu0  ;;  %5308 = vmatmul.mubr.bf16.vlgmr.msra.gmra.mxu1 %v5129_v36 }
0x1210   :  { %v5104_v46 = vadd.f32 %v8478_v45, %v5070_v17  ;;  %v5029_v28 = vadd.f32 %v5028_v39, %v4956_v62  ;;  %v5119_v13 = vmax.f32 %v5103_v5, 0.0  ;;  %v5071_v43 = vmul.f32 %v8472_v40, %v5027_v4  ;;  %v5177_v39 = vpop.permute.xlu0 %5176 }
0x1211   :  { %v5030_v49 = vpop.f32.mrf.mxu0 }
0x1212   :  { %v5120_v22 = vmax.f32 %v5104_v46, 0.0  ;;  %v5072_v34 = vmul.f32 %v8468_v41, %v5029_v28  ;;  %v5031_v16 = vadd.f32 %v5030_v49, %v4958_v56  ;;  %v5131_v61 = vpack.c.bf16 %v5119_v13, %v5117_v35 }
0x1213   :  { %v5032_v33 = vpop.f32.mrf.mxu0  ;;  %v5105_v50 = vadd.f32 %v8482_v59, %v5071_v43 }
0x1214   :  { %v5073_v54 = vmul.f32 %v8472_v40, %v5031_v16  ;;  %v5033_v44 = vadd.f32 %v5032_v33, %v4960_v30  ;;  %v5132_v53 = vpack.c.bf16 %v5120_v22, %v5118_v11  ;;  %v5106_v15 = vadd.f32 %v8478_v45, %v5072_v34 }
0x1215   :  { %v5036_v42 = vpop.f32.mrf.mxu0  ;;  %v5121_v58 = vmax.f32 %v5105_v50, 0.0 }
0x1216   :  { %v5107_v8 = vadd.f32 %v8482_v59, %v5073_v54  ;;  %v5074_v47 = vmul.f32 %v8468_v41, %v5033_v44  ;;  %5315 = vmatprep.mubr.bf16.mxu1 %v5132_v53  ;;  %v5037_v24 = vadd.f32 %v5036_v42, %v4964_v63  ;;  %v5122_v27 = vmax.f32 %v5106_v15, 0.0 }
0x1217   :  { %v5038_v23 = vpop.f32.mrf.mxu0  ;;  %5316 = vmatmul.mubr.bf16.gmra.mxu1 %v5131_v61 }
0x1218   :  { %v5108_v60 = vadd.f32 %v8478_v45, %v5074_v47  ;;  %v5039_v48 = vadd.f32 %v5038_v23, %v4966_v29  ;;  %v5123_v1 = vmax.f32 %v5107_v8, 0.0  ;;  %v5075_v7 = vmul.f32 %v8472_v40, %v5037_v24 }
0x1219   :  { %v5040_v57 = vpop.f32.mrf.mxu0 }
0x121a   :  { %v5124_v37 = vmax.f32 %v5108_v60, 0.0  ;;  %v5076_v18 = vmul.f32 %v8468_v41, %v5039_v48  ;;  %v5041_v12 = vadd.f32 %v5040_v57, %v4968_v3  ;;  %v5133_v21 = vpack.c.bf16 %v5123_v1, %v5121_v58 }
0x121b   :  { %v5042_v10 = vpop.f32.mrf.mxu0  ;;  %v5109_v36 = vadd.f32 %v8482_v59, %v5075_v7 }
0x121c   :  { %v5043_v6 = vadd.f32 %v5042_v10, %v4970_v0  ;;  %v5134_v38 = vpack.c.bf16 %v5124_v37, %v5122_v27  ;;  %v5077_v32 = vmul.f32 %v8472_v40, %v5041_v12  ;;  %v5110_v51 = vadd.f32 %v8478_v45, %v5076_v18 }
0x121d   :  { %v5125_v17 = vmax.f32 %v5109_v36, 0.0 }
0x121e   :  { %v5078_v20 = vmul.f32 %v8468_v41, %v5043_v6  ;;  %5323 = vmatprep.mubr.bf16.mxu1 %v5134_v38  ;;  %v5111_v55 = vadd.f32 %v8482_v59, %v5077_v32  ;;  %v5126_v52 = vmax.f32 %v5110_v51, 0.0 }
0x121f   :  { %5324 = vmatmul.mubr.bf16.gmra.mxu1 %v5133_v21 }
0x1220   :  { %v5112_v2 = vadd.f32 %v8478_v45, %v5078_v20  ;;  %v5127_v26 = vmax.f32 %v5111_v55, 0.0 }
0x1222   :  { %v5128_v62 = vmax.f32 %v5112_v2, 0.0  ;;  %v5135_v31 = vpack.c.bf16 %v5127_v26, %v5125_v17 }
0x1224   :  { %v5136_v56 = vpack.c.bf16 %v5128_v62, %v5126_v52 }
0x1226   :  { %5331 = vmatprep.mubr.bf16.mxu1 %v5136_v56 }
0x1227   :  { %5332 = vmatmul.mubr.bf16.gmra.mxu1 %v5135_v31 }
0x12cf   :  { %v6123_v40 = vpop.f32.mrf.mxu1 }
0x12d1   :  { %v6124_v5 = vpop.f32.mrf.mxu1 }
0x12d2   :  { %v6125_v41 = vadd.f32 %v6124_v5, %v6123_v40 }
0x12d3   :  { %v6126_v14 = vpop.f32.mrf.mxu1 }
0x12d4   :  { %v5310_v9 = vadd.f32 %v6125_v41, %v5177_v39 }
0x12d5   :  { %v6127_v46 = vpop.f32.mrf.mxu1 }
0x12d6   :  { %5340 = vst.msk [vmem:[%s8579_s25] sm:$0xff] %vm927_vm7, %v5310_v9  ;;  %v6128_v45 = vadd.f32 %v6127_v46, %v6126_v14 }
0x12d7   :  { %v6129_v4 = vpop.f32.mrf.mxu1 }
0x12d8   :  { %v5313_v59 = vadd.f32 %v6128_v45, %v5177_v39 }
0x12d9   :  { %v6130_v28 = vpop.f32.mrf.mxu1 }
0x12da   :  { %5341 = vst.msk [vmem:[%s8579_s25 + $0x8] sm:$0xff] %vm927_vm7, %v5313_v59  ;;  %v6131_v30 = vadd.f32 %v6130_v28, %v6129_v4 }
0x12db   :  { %v6132_v49 = vpop.f32.mrf.mxu1 }
0x12dc   :  { %v5318_v13 = vadd.f32 %v6131_v30, %v5177_v39 }
0x12dd   :  { %v6133_v22 = vpop.f32.mrf.mxu1 }
0x12de   :  { %5342 = vst.msk [vmem:[%s8579_s25 + $0x10] sm:$0xff] %vm927_vm7, %v5318_v13  ;;  %v6134_v34 = vadd.f32 %v6133_v22, %v6132_v49 }
0x12df   :  { %v6135_v16 = vpop.f32.mrf.mxu1 }
0x12e0   :  { %v5321_v11 = vadd.f32 %v6134_v34, %v5177_v39 }
0x12e1   :  { %v6136_v33 = vpop.f32.mrf.mxu1 }
0x12e2   :  { %5343 = vst.msk [vmem:[%s8579_s25 + $0x18] sm:$0xff] %vm927_vm7, %v5321_v11  ;;  %v6137_v19 = vadd.f32 %v6136_v33, %v6135_v16 }
0x12e3   :  { %v6138_v35 = vpop.f32.mrf.mxu1 }
0x12e4   :  { %v5326_v43 = vadd.f32 %v6137_v19, %v5177_v39 }
0x12e5   :  { %v6139_v54 = vpop.f32.mrf.mxu1 }
0x12e6   :  { %5344 = vst.msk [vmem:[%s8579_s25 + $0x20] sm:$0xff] %vm927_vm7, %v5326_v43  ;;  %v6140_v44 = vadd.f32 %v6139_v54, %v6138_v35 }
0x12e7   :  { %v6141_v63 = vpop.f32.mrf.mxu1 }
0x12e8   :  { %v5329_v29 = vadd.f32 %v6140_v44, %v5177_v39 }
0x12e9   :  { %v6142_v42 = vpop.f32.mrf.mxu1 }
0x12ea   :  { %5345 = vst.msk [vmem:[%s8579_s25 + $0x28] sm:$0xff] %vm927_vm7, %v5329_v29  ;;  %v6143_v53 = vadd.f32 %v6142_v42, %v6141_v63 }
0x12eb   :  { %v6144_v61 = vpop.f32.mrf.mxu1 }
0x12ec   :  { %v5334_v15 = vadd.f32 %v6143_v53, %v5177_v39 }
0x12ed   :  { %v6145_v8 = vpop.f32.mrf.mxu1 }
0x12ee   :  { %5346 = vst.msk [vmem:[%s8579_s25 + $0x30] sm:$0xff] %vm927_vm7, %v5334_v15  ;;  %v6146_v47 = vadd.f32 %v6145_v8, %v6144_v61 }
0x12f0   :  { %v5337_v23 = vadd.f32 %v6146_v47, %v5177_v39 }
0x12f2   :  { %5347 = vst.msk [vmem:[%s8579_s25 + $0x38] sm:$0xff] %vm927_vm7, %v5337_v23 }
0x12f3   :  { %5352 = vsyncpa [#allocation4], 1 }

</bundles_post_ra>
